<compile_context>
chip_gen: v7x
topology: tpu7x:2x2x1
jax: 0.10.0
libtpu: 0.0.40
codegen_flags: <defaults>
</compile_context>

<pallas_src>
import functools

import jax
import jax.numpy as jnp
from jax import lax
from jax.experimental import pallas as pl
from jax.experimental.pallas import tpu as pltpu


# ----------------------------------------------------------------------------- helpers
def _full_spec(arr):
    """Whole-array block; constant block index (array stays VMEM-resident)."""
    zeros = (0,) * arr.ndim
    return pl.BlockSpec(arr.shape, lambda i, _z=zeros: _z)


def _layer_norm(x, g, b, eps=1e-5):
    mu = jnp.mean(x, axis=-1, keepdims=True)
    var = jnp.mean((x - mu) ** 2, axis=-1, keepdims=True)
    return (x - mu) * lax.rsqrt(var + eps) * g + b


# ----------------------------------------------------------------------------- fused kernel
def _fused_text_encoder_kernel(x_ref, bias_ref, poolw_ref,
                               wqkv_ref, bqkv_ref, wo_ref, bo_ref,
                               ln1g_ref, ln1b_ref,
                               w1_ref, b1_ref, w2_ref, b2_ref,
                               ln2g_ref, ln2b_ref,
                               wf1_ref, bf1_ref, wf2_ref, bf2_ref,
                               o_ref, *, num_heads):
    B, S, D = x_ref.shape
    L = wqkv_ref.shape[0]
    M = B * S                                   # all batch rows folded into the matmul M dim
    dh = D // num_heads
    scale = 1.0 / float(dh) ** 0.5
    bf16 = jnp.bfloat16

    x = x_ref[...].reshape(M, D)                # (M, D) f32 (leading-dim merge, layout-free)
    attn_bias = bias_ref[...]                   # (M, M): 0 same-batch & valid key, else -1e30
    pool_w = poolw_ref[...]                     # (B, M): block-diagonal {0,1} pooling weights

    # ---- F.normalize(p=2, dim=-1): x / max(||x||_2, 1e-12)
    nrm = jnp.sqrt(jnp.sum(x * x, axis=-1, keepdims=True))
    x = x / jnp.maximum(nrm, 1e-12)

    for l in range(L):                          # static unroll over layers (L small)
        wqkv_l = wqkv_ref[l]
        wo_l = wo_ref[l]

        # ---- fused (D, 3D) QKV projection for all batch rows at once
        qkv = jnp.dot(x.astype(bf16), wqkv_l,
                      preferred_element_type=jnp.float32) + bqkv_ref[l]   # (M, 3D)

        # ---- multi-head self attention over the flattened (B*S) sequence.
        # The block-diagonal bias guarantees rows never attend across batch elements,
        # so this is exactly per-batch attention but with 2x the M per MXU push and
        # no per-batch Python loop / no lane-axis head concatenation.
        attn = jnp.zeros((M, D), jnp.float32)
        for h in range(num_heads):              # static unroll, H small
            qh = qkv[:, h * dh:(h + 1) * dh]
            kh = qkv[:, D + h * dh:D + (h + 1) * dh]
            vh = qkv[:, 2 * D + h * dh:2 * D + (h + 1) * dh]
            s = lax.dot_general(qh, kh, (((1,), (1,)), ((), ())),
                                preferred_element_type=jnp.float32)       # (M, M)
            s = s * scale + attn_bias
            s = s - jnp.max(s, axis=-1, keepdims=True)
            e = jnp.exp(s)
            p = e / jnp.sum(e, axis=-1, keepdims=True)    # exact division (parity w/ PyTorch)
            ctx_h = jnp.dot(p, vh, preferred_element_type=jnp.float32)    # (M, dh)
            # fold the head concat into the output projection: sum_h ctx_h @ Wo[h rows]
            attn = attn + jnp.dot(ctx_h.astype(bf16), wo_l[h * dh:(h + 1) * dh, :],
                                  preferred_element_type=jnp.float32)
        attn = attn + bo_ref[l]
        x = _layer_norm(x + attn, ln1g_ref[l], ln1b_ref[l])   # norm1 (post-LN)

        # ---- feed-forward: Linear -> ReLU -> Linear (bf16 weights, f32 accumulation)
        h1 = jnp.dot(x.astype(bf16), w1_ref[l],
                     preferred_element_type=jnp.float32) + b1_ref[l]
        h1 = jnp.maximum(h1, 0.0)
        ff = jnp.dot(h1.astype(bf16), w2_ref[l],
                     preferred_element_type=jnp.float32) + b2_ref[l]
        x = _layer_norm(x + ff, ln2g_ref[l], ln2b_ref[l])     # norm2

    # ---- masked mean pool: one (B, M) x (M, D) matmul + exact division
    pooled = jnp.dot(pool_w, x, preferred_element_type=jnp.float32)       # (B, D)
    den = jnp.sum(pool_w, axis=-1, keepdims=True)                         # (B, 1)
    # clamp only protects degenerate all-padding rows (reference PyTorch would NaN there)
    pooled = pooled / jnp.maximum(den, 1.0)

    # ---- FakeTransformer head: fc1 -> ReLU -> fc2
    hh = jnp.dot(pooled.astype(bf16), wf1_ref[...],
                 preferred_element_type=jnp.float32) + bf1_ref[...]
    hh = jnp.maximum(hh, 0.0)
    out = jnp.dot(hh.astype(bf16), wf2_ref[...],
                  preferred_element_type=jnp.float32) + bf2_ref[...]
    o_ref[...] = out


# ----------------------------------------------------------------------------- wrapper
def text_learnable_encoder_forward(text_fea, mask, params, n_heads):
    # TODO(synk): Bert backbone not provided in the reference; `text_fea` is its output.
    B, S, D = text_fea.shape
    M = B * S
    img_dim = params["wf2"].shape[-1]

    # Mask preprocessing (pure layout plumbing on a (B, S) {0,1} mask, fused into the same
    # tiny XLA op that casts the mask; keeps iota/div/reshape relayouts out of the kernel):
    #   attn_bias[i, j] = 0 if (i, j) in the same batch element AND key j is valid, else -1e30
    #   pool_w[b, j]    = mask[b, s] if j belongs to batch b, else 0
    mask_f = mask.astype(jnp.float32)                         # (B, S)
    mask_flat = mask_f.reshape(1, M)                          # (1, M)
    seg = jnp.repeat(jnp.arange(B, dtype=jnp.int32), S)       # (M,) batch id per position
    same_batch = seg[:, None] == seg[None, :]                 # (M, M)
    key_valid = (mask_flat > 0.5)                             # (1, M)
    attn_bias = jnp.where(same_batch & key_valid, 0.0, -1e30).astype(jnp.float32)
    pool_w = jnp.where(jnp.arange(B, dtype=jnp.int32)[:, None] == seg[None, :],
                       mask_flat, 0.0).astype(jnp.float32)    # (B, M)

    weight_names = ("wqkv", "bqkv", "wo", "bo", "ln1g", "ln1b",
                    "w1", "b1", "w2", "b2", "ln2g", "ln2b",
                    "wf1", "bf1", "wf2", "bf2")
    weights = [params[k] for k in weight_names]

    # Single grid step: everything (activations + all L layers' weights) stays VMEM-resident;
    # the only HBM store is the final (B, IMG) result.
    in_specs = [_full_spec(text_fea), _full_spec(attn_bias), _full_spec(pool_w)]
    in_specs += [_full_spec(w) for w in weights]

    kernel = functools.partial(_fused_text_encoder_kernel, num_heads=n_heads)
    out = pl.pallas_call(
        kernel,
        out_shape=jax.ShapeDtypeStruct((B, img_dim), jnp.float32),
        grid=(1,),
        in_specs=in_specs,
        out_specs=pl.BlockSpec((B, img_dim), lambda i: (0, 0)),
        compiler_params=pltpu.CompilerParams(dimension_semantics=("arbitrary",)),
    )(text_fea, attn_bias, pool_w, *weights)
    return out


# ----------------------------------------------------------------------------- params
def init_params(key, d_model, n_heads, n_layers, ffn_dim, img_dim):
    def nrm(k, shape, scale=0.05):
        return scale * jax.random.normal(k, shape, jnp.float32)

    keys = jax.random.split(key, n_layers + 1)
    wqkv, bqkv, wo, bo = [], [], [], []
    w1, b1, w2, b2 = [], [], [], []
    ln1g, ln1b, ln2g, ln2b = [], [], [], []
    for li in range(n_layers):
        ks = jax.random.split(keys[li], 8)
        in_proj_w = nrm(ks[0], (3 * d_model, d_model))        # PyTorch in_proj_weight
        in_proj_b = nrm(ks[1], (3 * d_model,), 0.02)          # in_proj_bias
        wo_t = nrm(ks[2], (d_model, d_model))                 # out_proj.weight
        bo_t = nrm(ks[3], (d_model,), 0.02)
        w1_t = nrm(ks[4], (ffn_dim, d_model))                 # linear1.weight
        b1_t = nrm(ks[5], (ffn_dim,), 0.02)
        w2_t = nrm(ks[6], (d_model, ffn_dim))                 # linear2.weight
        b2_t = nrm(ks[7], (d_model,), 0.02)
        wqkv.append(in_proj_w.T)                              # (D, 3D): x @ Wqkv -> [q|k|v]
        bqkv.append(in_proj_b.reshape(1, 3 * d_model))
        wo.append(wo_t.T)                                     # (D, D)
        bo.append(bo_t.reshape(1, d_model))
        w1.append(w1_t.T)                                     # (D, F)
        b1.append(b1_t.reshape(1, ffn_dim))
        w2.append(w2_t.T)                                     # (F, D)
        b2.append(b2_t.reshape(1, d_model))
        ln1g.append(jnp.ones((1, d_model), jnp.float32))
        ln1b.append(jnp.zeros((1, d_model), jnp.float32))
        ln2g.append(jnp.ones((1, d_model), jnp.float32))
        ln2b.append(jnp.zeros((1, d_model), jnp.float32))

    kf = jax.random.split(keys[-1], 4)
    wf1 = nrm(kf[0], (img_dim, d_model)).T                    # FakeTransformer fc1
    bf1 = nrm(kf[1], (img_dim,), 0.02).reshape(1, img_dim)
    wf2 = nrm(kf[2], (img_dim, img_dim)).T                    # FakeTransformer fc2
    bf2 = nrm(kf[3], (img_dim,), 0.02).reshape(1, img_dim)

    stack = lambda xs: jnp.stack(xs, axis=0)
    to_bf16 = lambda a: a.astype(jnp.bfloat16)
    return dict(
        wqkv=to_bf16(stack(wqkv)), bqkv=stack(bqkv),
        wo=to_bf16(stack(wo)), bo=stack(bo),
        ln1g=stack(ln1g), ln1b=stack(ln1b),
        w1=to_bf16(stack(w1)), b1=stack(b1),
        w2=to_bf16(stack(w2)), b2=stack(b2),
        ln2g=stack(ln2g), ln2b=stack(ln2b),
        wf1=to_bf16(wf1), bf1=bf1, wf2=to_bf16(wf2), bf2=bf2,
    )


# ----------------------------------------------------------------------------- main
if __name__ == "__main__":
    B, S = 2, 8
    TEXT_FEATURE_DIM = 32
    IMG_FEATURE_DIM = 32
    TEXT_TRANSFORMER_HEAD = 4
    TEXT_TRANSFORMER_LAYER = 2
    FFN_DIM = 2048   # PyTorch nn.TransformerEncoderLayer default dim_feedforward

    key = jax.random.PRNGKey(0)
    k_x, k_p = jax.random.split(key)
    # backbone output hidden states (see TODO above)
    text_fea = jax.random.normal(k_x, (B, S, TEXT_FEATURE_DIM), jnp.float32)
    mask_texts = jnp.array([[1, 1, 1, 1, 1, 1, 1, 1],
                            [1, 1, 1, 1, 1, 0, 0, 0]], jnp.float32)

    params = init_params(k_p, TEXT_FEATURE_DIM, TEXT_TRANSFORMER_HEAD,
                         TEXT_TRANSFORMER_LAYER, FFN_DIM, IMG_FEATURE_DIM)

    out = text_learnable_encoder_forward(text_fea, mask_texts, params,
                                         TEXT_TRANSFORMER_HEAD)
    out = jax.block_until_ready(out)
    assert out.shape == (B, IMG_FEATURE_DIM), out.shape
    assert bool(jnp.all(jnp.isfinite(out)))
    print("KERNEL_OK")
</pallas_src>

<mosaic_0001>
module attributes {stable_mosaic.version = 11 : i64} {
  func.func @_fused_text_encoder_kernel(%arg0: i32, %arg1: memref<2x8x32xf32, #tpu.memory_space<vmem>>, %arg2: memref<16x16xf32, #tpu.memory_space<vmem>>, %arg3: memref<2x16xf32, #tpu.memory_space<vmem>>, %arg4: memref<2x32x96xbf16, #tpu.memory_space<vmem>>, %arg5: memref<2x1x96xf32, #tpu.memory_space<vmem>>, %arg6: memref<2x32x32xbf16, #tpu.memory_space<vmem>>, %arg7: memref<2x1x32xf32, #tpu.memory_space<vmem>>, %arg8: memref<2x1x32xf32, #tpu.memory_space<vmem>>, %arg9: memref<2x1x32xf32, #tpu.memory_space<vmem>>, %arg10: memref<2x32x2048xbf16, #tpu.memory_space<vmem>>, %arg11: memref<2x1x2048xf32, #tpu.memory_space<vmem>>, %arg12: memref<2x2048x32xbf16, #tpu.memory_space<vmem>>, %arg13: memref<2x1x32xf32, #tpu.memory_space<vmem>>, %arg14: memref<2x1x32xf32, #tpu.memory_space<vmem>>, %arg15: memref<2x1x32xf32, #tpu.memory_space<vmem>>, %arg16: memref<32x32xbf16, #tpu.memory_space<vmem>>, %arg17: memref<1x32xf32, #tpu.memory_space<vmem>>, %arg18: memref<32x32xbf16, #tpu.memory_space<vmem>>, %arg19: memref<1x32xf32, #tpu.memory_space<vmem>>, %arg20: memref<2x32xf32, #tpu.memory_space<vmem>>) attributes {dimension_semantics = [#tpu.dimension_semantics<arbitrary>], iteration_bounds = array<i64: 1>, scalar_prefetch = 0 : i64, scratch_operands = 0 : i64, tpu.core_type = #tpu.core_type<tc>, window_params = [{pipeline_mode = #tpu.pipeline_mode<synchronous>, transform_indices = @transform_0, window_bounds = array<i64: 2, 8, 32>}, {pipeline_mode = #tpu.pipeline_mode<synchronous>, transform_indices = @transform_1, window_bounds = array<i64: 16, 16>}, {pipeline_mode = #tpu.pipeline_mode<synchronous>, transform_indices = @transform_2, window_bounds = array<i64: 2, 16>}, {pipeline_mode = #tpu.pipeline_mode<synchronous>, transform_indices = @transform_3, window_bounds = array<i64: 2, 32, 96>}, {pipeline_mode = #tpu.pipeline_mode<synchronous>, transform_indices = @transform_4, window_bounds = array<i64: 2, 1, 96>}, {pipeline_mode = #tpu.pipeline_mode<synchronous>, transform_indices = @transform_5, window_bounds = array<i64: 2, 32, 32>}, {pipeline_mode = #tpu.pipeline_mode<synchronous>, transform_indices = @transform_6, window_bounds = array<i64: 2, 1, 32>}, {pipeline_mode = #tpu.pipeline_mode<synchronous>, transform_indices = @transform_7, window_bounds = array<i64: 2, 1, 32>}, {pipeline_mode = #tpu.pipeline_mode<synchronous>, transform_indices = @transform_8, window_bounds = array<i64: 2, 1, 32>}, {pipeline_mode = #tpu.pipeline_mode<synchronous>, transform_indices = @transform_9, window_bounds = array<i64: 2, 32, 2048>}, {pipeline_mode = #tpu.pipeline_mode<synchronous>, transform_indices = @transform_10, window_bounds = array<i64: 2, 1, 2048>}, {pipeline_mode = #tpu.pipeline_mode<synchronous>, transform_indices = @transform_11, window_bounds = array<i64: 2, 2048, 32>}, {pipeline_mode = #tpu.pipeline_mode<synchronous>, transform_indices = @transform_12, window_bounds = array<i64: 2, 1, 32>}, {pipeline_mode = #tpu.pipeline_mode<synchronous>, transform_indices = @transform_13, window_bounds = array<i64: 2, 1, 32>}, {pipeline_mode = #tpu.pipeline_mode<synchronous>, transform_indices = @transform_14, window_bounds = array<i64: 2, 1, 32>}, {pipeline_mode = #tpu.pipeline_mode<synchronous>, transform_indices = @transform_15, window_bounds = array<i64: 32, 32>}, {pipeline_mode = #tpu.pipeline_mode<synchronous>, transform_indices = @transform_16, window_bounds = array<i64: 1, 32>}, {pipeline_mode = #tpu.pipeline_mode<synchronous>, transform_indices = @transform_17, window_bounds = array<i64: 32, 32>}, {pipeline_mode = #tpu.pipeline_mode<synchronous>, transform_indices = @transform_18, window_bounds = array<i64: 1, 32>}, {pipeline_mode = #tpu.pipeline_mode<synchronous>, transform_indices = @transform_19, window_bounds = array<i64: 2, 32>}]} {
    %c0 = arith.constant 0 : index
    %c0_0 = arith.constant 0 : index
    %c0_1 = arith.constant 0 : index
    %0 = vector.load %arg1[%c0, %c0_0, %c0_1] : memref<2x8x32xf32, #tpu.memory_space<vmem>>, vector<2x8x32xf32>
    %1 = vector.shape_cast %0 : vector<2x8x32xf32> to vector<16x32xf32>
    %c0_2 = arith.constant 0 : index
    %c0_3 = arith.constant 0 : index
    %2 = vector.load %arg2[%c0_2, %c0_3] : memref<16x16xf32, #tpu.memory_space<vmem>>, vector<16x16xf32>
    %c0_4 = arith.constant 0 : index
    %c0_5 = arith.constant 0 : index
    %3 = vector.load %arg3[%c0_4, %c0_5] : memref<2x16xf32, #tpu.memory_space<vmem>>, vector<2x16xf32>
    %4 = arith.mulf %1, %1 : vector<16x32xf32>
    %cst = arith.constant dense<0.000000e+00> : vector<16xf32>
    %5 = vector.multi_reduction <add>, %4, %cst [1] : vector<16x32xf32> to vector<16xf32>
    %6 = vector.shape_cast %5 : vector<16xf32> to vector<16x1xf32>
    %7 = math.sqrt %6 : vector<16x1xf32>
    %cst_6 = arith.constant 9.99999996E-13 : f32
    %8 = vector.broadcast %cst_6 : f32 to vector<16x1xf32>
    %9 = arith.maximumf %7, %8 : vector<16x1xf32>
    %10 = vector.broadcast %9 : vector<16x1xf32> to vector<16x32xf32>
    %11 = arith.divf %1, %10 : vector<16x32xf32>
    %c0_7 = arith.constant 0 : index
    %c0_8 = arith.constant 0 : index
    %c0_9 = arith.constant 0 : index
    %12 = vector.load %arg4[%c0_7, %c0_8, %c0_9] : memref<2x32x96xbf16, #tpu.memory_space<vmem>>, vector<1x32x96xbf16>
    %13 = vector.shape_cast %12 : vector<1x32x96xbf16> to vector<32x96xbf16>
    %c0_10 = arith.constant 0 : index
    %c0_11 = arith.constant 0 : index
    %c0_12 = arith.constant 0 : index
    %14 = vector.load %arg6[%c0_10, %c0_11, %c0_12] : memref<2x32x32xbf16, #tpu.memory_space<vmem>>, vector<1x32x32xbf16>
    %15 = vector.shape_cast %14 : vector<1x32x32xbf16> to vector<32x32xbf16>
    %16 = arith.truncf %11 : vector<16x32xf32> to vector<16x32xbf16>
    %cst_13 = arith.constant dense<0.000000e+00> : vector<16x96xf32>
    %17 = tpu.matmul %16, %13, %cst_13 {dimension_numbers = #tpu.dot_dimension_numbers<[1], [0], [0], [1], [0, 0, 1, 1], [], []>} : vector<16x32xbf16>, vector<32x96xbf16>, vector<16x96xf32> -> vector<16x96xf32>
    %c0_14 = arith.constant 0 : index
    %c0_15 = arith.constant 0 : index
    %c0_16 = arith.constant 0 : index
    %18 = vector.load %arg5[%c0_14, %c0_15, %c0_16] : memref<2x1x96xf32, #tpu.memory_space<vmem>>, vector<1x1x96xf32>
    %19 = vector.shape_cast %18 : vector<1x1x96xf32> to vector<1x96xf32>
    %20 = vector.broadcast %19 : vector<1x96xf32> to vector<16x96xf32>
    %21 = arith.addf %17, %20 : vector<16x96xf32>
    %cst_17 = arith.constant 0.000000e+00 : f32
    %22 = vector.broadcast %cst_17 : f32 to vector<16x32xf32>
    %23 = vector.extract_strided_slice %21 {offsets = [0, 0], sizes = [16, 8], strides = [1, 1]} : vector<16x96xf32> to vector<16x8xf32>
    %24 = vector.extract_strided_slice %21 {offsets = [0, 32], sizes = [16, 8], strides = [1, 1]} : vector<16x96xf32> to vector<16x8xf32>
    %25 = vector.extract_strided_slice %21 {offsets = [0, 64], sizes = [16, 8], strides = [1, 1]} : vector<16x96xf32> to vector<16x8xf32>
    %cst_18 = arith.constant dense<0.000000e+00> : vector<16x16xf32>
    %26 = tpu.matmul %23, %24, %cst_18 {dimension_numbers = #tpu.dot_dimension_numbers<[1], [1], [0], [0], [0, 0, 1, 0], [], []>} : vector<16x8xf32>, vector<16x8xf32>, vector<16x16xf32> -> vector<16x16xf32>
    %cst_19 = arith.constant 0.353553385 : f32
    %27 = vector.broadcast %cst_19 : f32 to vector<16x16xf32>
    %28 = arith.mulf %26, %27 : vector<16x16xf32>
    %29 = arith.addf %28, %2 : vector<16x16xf32>
    %cst_20 = arith.constant dense<0xFF800000> : vector<16xf32>
    %30 = vector.multi_reduction <maximumf>, %29, %cst_20 [1] : vector<16x16xf32> to vector<16xf32>
    %31 = vector.shape_cast %30 : vector<16xf32> to vector<16x1xf32>
    %32 = vector.broadcast %31 : vector<16x1xf32> to vector<16x16xf32>
    %33 = arith.subf %29, %32 : vector<16x16xf32>
    %34 = math.exp %33 : vector<16x16xf32>
    %cst_21 = arith.constant dense<0.000000e+00> : vector<16xf32>
    %35 = vector.multi_reduction <add>, %34, %cst_21 [1] : vector<16x16xf32> to vector<16xf32>
    %36 = vector.shape_cast %35 : vector<16xf32> to vector<16x1xf32>
    %37 = vector.broadcast %36 : vector<16x1xf32> to vector<16x16xf32>
    %38 = arith.divf %34, %37 : vector<16x16xf32>
    %cst_22 = arith.constant dense<0.000000e+00> : vector<16x8xf32>
    %39 = tpu.matmul %38, %25, %cst_22 {dimension_numbers = #tpu.dot_dimension_numbers<[1], [0], [0], [1], [0, 0, 1, 1], [], []>} : vector<16x16xf32>, vector<16x8xf32>, vector<16x8xf32> -> vector<16x8xf32>
    %40 = arith.truncf %39 : vector<16x8xf32> to vector<16x8xbf16>
    %41 = vector.extract_strided_slice %15 {offsets = [0, 0], sizes = [8, 32], strides = [1, 1]} : vector<32x32xbf16> to vector<8x32xbf16>
    %cst_23 = arith.constant dense<0.000000e+00> : vector<16x32xf32>
    %42 = tpu.matmul %40, %41, %cst_23 {dimension_numbers = #tpu.dot_dimension_numbers<[1], [0], [0], [1], [0, 0, 1, 1], [], []>} : vector<16x8xbf16>, vector<8x32xbf16>, vector<16x32xf32> -> vector<16x32xf32>
    %43 = arith.addf %22, %42 : vector<16x32xf32>
    %44 = vector.extract_strided_slice %21 {offsets = [0, 8], sizes = [16, 8], strides = [1, 1]} : vector<16x96xf32> to vector<16x8xf32>
    %45 = vector.extract_strided_slice %21 {offsets = [0, 40], sizes = [16, 8], strides = [1, 1]} : vector<16x96xf32> to vector<16x8xf32>
    %46 = vector.extract_strided_slice %21 {offsets = [0, 72], sizes = [16, 8], strides = [1, 1]} : vector<16x96xf32> to vector<16x8xf32>
    %cst_24 = arith.constant dense<0.000000e+00> : vector<16x16xf32>
    %47 = tpu.matmul %44, %45, %cst_24 {dimension_numbers = #tpu.dot_dimension_numbers<[1], [1], [0], [0], [0, 0, 1, 0], [], []>} : vector<16x8xf32>, vector<16x8xf32>, vector<16x16xf32> -> vector<16x16xf32>
    %cst_25 = arith.constant 0.353553385 : f32
    %48 = vector.broadcast %cst_25 : f32 to vector<16x16xf32>
    %49 = arith.mulf %47, %48 : vector<16x16xf32>
    %50 = arith.addf %49, %2 : vector<16x16xf32>
    %cst_26 = arith.constant dense<0xFF800000> : vector<16xf32>
    %51 = vector.multi_reduction <maximumf>, %50, %cst_26 [1] : vector<16x16xf32> to vector<16xf32>
    %52 = vector.shape_cast %51 : vector<16xf32> to vector<16x1xf32>
    %53 = vector.broadcast %52 : vector<16x1xf32> to vector<16x16xf32>
    %54 = arith.subf %50, %53 : vector<16x16xf32>
    %55 = math.exp %54 : vector<16x16xf32>
    %cst_27 = arith.constant dense<0.000000e+00> : vector<16xf32>
    %56 = vector.multi_reduction <add>, %55, %cst_27 [1] : vector<16x16xf32> to vector<16xf32>
    %57 = vector.shape_cast %56 : vector<16xf32> to vector<16x1xf32>
    %58 = vector.broadcast %57 : vector<16x1xf32> to vector<16x16xf32>
    %59 = arith.divf %55, %58 : vector<16x16xf32>
    %cst_28 = arith.constant dense<0.000000e+00> : vector<16x8xf32>
    %60 = tpu.matmul %59, %46, %cst_28 {dimension_numbers = #tpu.dot_dimension_numbers<[1], [0], [0], [1], [0, 0, 1, 1], [], []>} : vector<16x16xf32>, vector<16x8xf32>, vector<16x8xf32> -> vector<16x8xf32>
    %61 = arith.truncf %60 : vector<16x8xf32> to vector<16x8xbf16>
    %62 = vector.extract_strided_slice %15 {offsets = [8, 0], sizes = [8, 32], strides = [1, 1]} : vector<32x32xbf16> to vector<8x32xbf16>
    %cst_29 = arith.constant dense<0.000000e+00> : vector<16x32xf32>
    %63 = tpu.matmul %61, %62, %cst_29 {dimension_numbers = #tpu.dot_dimension_numbers<[1], [0], [0], [1], [0, 0, 1, 1], [], []>} : vector<16x8xbf16>, vector<8x32xbf16>, vector<16x32xf32> -> vector<16x32xf32>
    %64 = arith.addf %43, %63 : vector<16x32xf32>
    %65 = vector.extract_strided_slice %21 {offsets = [0, 16], sizes = [16, 8], strides = [1, 1]} : vector<16x96xf32> to vector<16x8xf32>
    %66 = vector.extract_strided_slice %21 {offsets = [0, 48], sizes = [16, 8], strides = [1, 1]} : vector<16x96xf32> to vector<16x8xf32>
    %67 = vector.extract_strided_slice %21 {offsets = [0, 80], sizes = [16, 8], strides = [1, 1]} : vector<16x96xf32> to vector<16x8xf32>
    %cst_30 = arith.constant dense<0.000000e+00> : vector<16x16xf32>
    %68 = tpu.matmul %65, %66, %cst_30 {dimension_numbers = #tpu.dot_dimension_numbers<[1], [1], [0], [0], [0, 0, 1, 0], [], []>} : vector<16x8xf32>, vector<16x8xf32>, vector<16x16xf32> -> vector<16x16xf32>
    %cst_31 = arith.constant 0.353553385 : f32
    %69 = vector.broadcast %cst_31 : f32 to vector<16x16xf32>
    %70 = arith.mulf %68, %69 : vector<16x16xf32>
    %71 = arith.addf %70, %2 : vector<16x16xf32>
    %cst_32 = arith.constant dense<0xFF800000> : vector<16xf32>
    %72 = vector.multi_reduction <maximumf>, %71, %cst_32 [1] : vector<16x16xf32> to vector<16xf32>
    %73 = vector.shape_cast %72 : vector<16xf32> to vector<16x1xf32>
    %74 = vector.broadcast %73 : vector<16x1xf32> to vector<16x16xf32>
    %75 = arith.subf %71, %74 : vector<16x16xf32>
    %76 = math.exp %75 : vector<16x16xf32>
    %cst_33 = arith.constant dense<0.000000e+00> : vector<16xf32>
    %77 = vector.multi_reduction <add>, %76, %cst_33 [1] : vector<16x16xf32> to vector<16xf32>
    %78 = vector.shape_cast %77 : vector<16xf32> to vector<16x1xf32>
    %79 = vector.broadcast %78 : vector<16x1xf32> to vector<16x16xf32>
    %80 = arith.divf %76, %79 : vector<16x16xf32>
    %cst_34 = arith.constant dense<0.000000e+00> : vector<16x8xf32>
    %81 = tpu.matmul %80, %67, %cst_34 {dimension_numbers = #tpu.dot_dimension_numbers<[1], [0], [0], [1], [0, 0, 1, 1], [], []>} : vector<16x16xf32>, vector<16x8xf32>, vector<16x8xf32> -> vector<16x8xf32>
    %82 = arith.truncf %81 : vector<16x8xf32> to vector<16x8xbf16>
    %83 = vector.extract_strided_slice %15 {offsets = [16, 0], sizes = [8, 32], strides = [1, 1]} : vector<32x32xbf16> to vector<8x32xbf16>
    %cst_35 = arith.constant dense<0.000000e+00> : vector<16x32xf32>
    %84 = tpu.matmul %82, %83, %cst_35 {dimension_numbers = #tpu.dot_dimension_numbers<[1], [0], [0], [1], [0, 0, 1, 1], [], []>} : vector<16x8xbf16>, vector<8x32xbf16>, vector<16x32xf32> -> vector<16x32xf32>
    %85 = arith.addf %64, %84 : vector<16x32xf32>
    %86 = vector.extract_strided_slice %21 {offsets = [0, 24], sizes = [16, 8], strides = [1, 1]} : vector<16x96xf32> to vector<16x8xf32>
    %87 = vector.extract_strided_slice %21 {offsets = [0, 56], sizes = [16, 8], strides = [1, 1]} : vector<16x96xf32> to vector<16x8xf32>
    %88 = vector.extract_strided_slice %21 {offsets = [0, 88], sizes = [16, 8], strides = [1, 1]} : vector<16x96xf32> to vector<16x8xf32>
    %cst_36 = arith.constant dense<0.000000e+00> : vector<16x16xf32>
    %89 = tpu.matmul %86, %87, %cst_36 {dimension_numbers = #tpu.dot_dimension_numbers<[1], [1], [0], [0], [0, 0, 1, 0], [], []>} : vector<16x8xf32>, vector<16x8xf32>, vector<16x16xf32> -> vector<16x16xf32>
    %cst_37 = arith.constant 0.353553385 : f32
    %90 = vector.broadcast %cst_37 : f32 to vector<16x16xf32>
    %91 = arith.mulf %89, %90 : vector<16x16xf32>
    %92 = arith.addf %91, %2 : vector<16x16xf32>
    %cst_38 = arith.constant dense<0xFF800000> : vector<16xf32>
    %93 = vector.multi_reduction <maximumf>, %92, %cst_38 [1] : vector<16x16xf32> to vector<16xf32>
    %94 = vector.shape_cast %93 : vector<16xf32> to vector<16x1xf32>
    %95 = vector.broadcast %94 : vector<16x1xf32> to vector<16x16xf32>
    %96 = arith.subf %92, %95 : vector<16x16xf32>
    %97 = math.exp %96 : vector<16x16xf32>
    %cst_39 = arith.constant dense<0.000000e+00> : vector<16xf32>
    %98 = vector.multi_reduction <add>, %97, %cst_39 [1] : vector<16x16xf32> to vector<16xf32>
    %99 = vector.shape_cast %98 : vector<16xf32> to vector<16x1xf32>
    %100 = vector.broadcast %99 : vector<16x1xf32> to vector<16x16xf32>
    %101 = arith.divf %97, %100 : vector<16x16xf32>
    %cst_40 = arith.constant dense<0.000000e+00> : vector<16x8xf32>
    %102 = tpu.matmul %101, %88, %cst_40 {dimension_numbers = #tpu.dot_dimension_numbers<[1], [0], [0], [1], [0, 0, 1, 1], [], []>} : vector<16x16xf32>, vector<16x8xf32>, vector<16x8xf32> -> vector<16x8xf32>
    %103 = arith.truncf %102 : vector<16x8xf32> to vector<16x8xbf16>
    %104 = vector.extract_strided_slice %15 {offsets = [24, 0], sizes = [8, 32], strides = [1, 1]} : vector<32x32xbf16> to vector<8x32xbf16>
    %cst_41 = arith.constant dense<0.000000e+00> : vector<16x32xf32>
    %105 = tpu.matmul %103, %104, %cst_41 {dimension_numbers = #tpu.dot_dimension_numbers<[1], [0], [0], [1], [0, 0, 1, 1], [], []>} : vector<16x8xbf16>, vector<8x32xbf16>, vector<16x32xf32> -> vector<16x32xf32>
    %106 = arith.addf %85, %105 : vector<16x32xf32>
    %c0_42 = arith.constant 0 : index
    %c0_43 = arith.constant 0 : index
    %c0_44 = arith.constant 0 : index
    %107 = vector.load %arg7[%c0_42, %c0_43, %c0_44] : memref<2x1x32xf32, #tpu.memory_space<vmem>>, vector<1x1x32xf32>
    %108 = vector.shape_cast %107 : vector<1x1x32xf32> to vector<1x32xf32>
    %109 = vector.broadcast %108 : vector<1x32xf32> to vector<16x32xf32>
    %110 = arith.addf %106, %109 : vector<16x32xf32>
    %111 = arith.addf %11, %110 : vector<16x32xf32>
    %c0_45 = arith.constant 0 : index
    %c0_46 = arith.constant 0 : index
    %c0_47 = arith.constant 0 : index
    %112 = vector.load %arg8[%c0_45, %c0_46, %c0_47] : memref<2x1x32xf32, #tpu.memory_space<vmem>>, vector<1x1x32xf32>
    %113 = vector.shape_cast %112 : vector<1x1x32xf32> to vector<1x32xf32>
    %c0_48 = arith.constant 0 : index
    %c0_49 = arith.constant 0 : index
    %c0_50 = arith.constant 0 : index
    %114 = vector.load %arg9[%c0_48, %c0_49, %c0_50] : memref<2x1x32xf32, #tpu.memory_space<vmem>>, vector<1x1x32xf32>
    %115 = vector.shape_cast %114 : vector<1x1x32xf32> to vector<1x32xf32>
    %cst_51 = arith.constant dense<0.000000e+00> : vector<16xf32>
    %116 = vector.multi_reduction <add>, %111, %cst_51 [1] : vector<16x32xf32> to vector<16xf32>
    %117 = vector.shape_cast %116 : vector<16xf32> to vector<16x1xf32>
    %cst_52 = arith.constant 3.200000e+01 : f32
    %118 = vector.broadcast %cst_52 : f32 to vector<16x1xf32>
    %119 = arith.divf %117, %118 : vector<16x1xf32>
    %120 = vector.broadcast %119 : vector<16x1xf32> to vector<16x32xf32>
    %121 = arith.subf %111, %120 : vector<16x32xf32>
    %122 = arith.mulf %121, %121 : vector<16x32xf32>
    %cst_53 = arith.constant dense<0.000000e+00> : vector<16xf32>
    %123 = vector.multi_reduction <add>, %122, %cst_53 [1] : vector<16x32xf32> to vector<16xf32>
    %124 = vector.shape_cast %123 : vector<16xf32> to vector<16x1xf32>
    %cst_54 = arith.constant 3.200000e+01 : f32
    %125 = vector.broadcast %cst_54 : f32 to vector<16x1xf32>
    %126 = arith.divf %124, %125 : vector<16x1xf32>
    %127 = vector.broadcast %119 : vector<16x1xf32> to vector<16x32xf32>
    %128 = arith.subf %111, %127 : vector<16x32xf32>
    %cst_55 = arith.constant 9.99999974E-6 : f32
    %129 = vector.broadcast %cst_55 : f32 to vector<16x1xf32>
    %130 = arith.addf %126, %129 : vector<16x1xf32>
    %131 = math.rsqrt %130 : vector<16x1xf32>
    %132 = vector.broadcast %131 : vector<16x1xf32> to vector<16x32xf32>
    %133 = arith.mulf %128, %132 : vector<16x32xf32>
    %134 = vector.broadcast %113 : vector<1x32xf32> to vector<16x32xf32>
    %135 = arith.mulf %133, %134 : vector<16x32xf32>
    %136 = vector.broadcast %115 : vector<1x32xf32> to vector<16x32xf32>
    %137 = arith.addf %135, %136 : vector<16x32xf32>
    %138 = arith.truncf %137 : vector<16x32xf32> to vector<16x32xbf16>
    %c0_56 = arith.constant 0 : index
    %c0_57 = arith.constant 0 : index
    %c0_58 = arith.constant 0 : index
    %139 = vector.load %arg10[%c0_56, %c0_57, %c0_58] : memref<2x32x2048xbf16, #tpu.memory_space<vmem>>, vector<1x32x2048xbf16>
    %140 = vector.shape_cast %139 : vector<1x32x2048xbf16> to vector<32x2048xbf16>
    %cst_59 = arith.constant dense<0.000000e+00> : vector<16x2048xf32>
    %141 = tpu.matmul %138, %140, %cst_59 {dimension_numbers = #tpu.dot_dimension_numbers<[1], [0], [0], [1], [0, 0, 1, 1], [], []>} : vector<16x32xbf16>, vector<32x2048xbf16>, vector<16x2048xf32> -> vector<16x2048xf32>
    %c0_60 = arith.constant 0 : index
    %c0_61 = arith.constant 0 : index
    %c0_62 = arith.constant 0 : index
    %142 = vector.load %arg11[%c0_60, %c0_61, %c0_62] : memref<2x1x2048xf32, #tpu.memory_space<vmem>>, vector<1x1x2048xf32>
    %143 = vector.shape_cast %142 : vector<1x1x2048xf32> to vector<1x2048xf32>
    %144 = vector.broadcast %143 : vector<1x2048xf32> to vector<16x2048xf32>
    %145 = arith.addf %141, %144 : vector<16x2048xf32>
    %cst_63 = arith.constant 0.000000e+00 : f32
    %146 = vector.broadcast %cst_63 : f32 to vector<16x2048xf32>
    %147 = arith.maximumf %145, %146 : vector<16x2048xf32>
    %148 = arith.truncf %147 : vector<16x2048xf32> to vector<16x2048xbf16>
    %c0_64 = arith.constant 0 : index
    %c0_65 = arith.constant 0 : index
    %c0_66 = arith.constant 0 : index
    %149 = vector.load %arg12[%c0_64, %c0_65, %c0_66] : memref<2x2048x32xbf16, #tpu.memory_space<vmem>>, vector<1x2048x32xbf16>
    %150 = vector.shape_cast %149 : vector<1x2048x32xbf16> to vector<2048x32xbf16>
    %cst_67 = arith.constant dense<0.000000e+00> : vector<16x32xf32>
    %151 = tpu.matmul %148, %150, %cst_67 {dimension_numbers = #tpu.dot_dimension_numbers<[1], [0], [0], [1], [0, 0, 1, 1], [], []>} : vector<16x2048xbf16>, vector<2048x32xbf16>, vector<16x32xf32> -> vector<16x32xf32>
    %c0_68 = arith.constant 0 : index
    %c0_69 = arith.constant 0 : index
    %c0_70 = arith.constant 0 : index
    %152 = vector.load %arg13[%c0_68, %c0_69, %c0_70] : memref<2x1x32xf32, #tpu.memory_space<vmem>>, vector<1x1x32xf32>
    %153 = vector.shape_cast %152 : vector<1x1x32xf32> to vector<1x32xf32>
    %154 = vector.broadcast %153 : vector<1x32xf32> to vector<16x32xf32>
    %155 = arith.addf %151, %154 : vector<16x32xf32>
    %156 = arith.addf %137, %155 : vector<16x32xf32>
    %c0_71 = arith.constant 0 : index
    %c0_72 = arith.constant 0 : index
    %c0_73 = arith.constant 0 : index
    %157 = vector.load %arg14[%c0_71, %c0_72, %c0_73] : memref<2x1x32xf32, #tpu.memory_space<vmem>>, vector<1x1x32xf32>
    %158 = vector.shape_cast %157 : vector<1x1x32xf32> to vector<1x32xf32>
    %c0_74 = arith.constant 0 : index
    %c0_75 = arith.constant 0 : index
    %c0_76 = arith.constant 0 : index
    %159 = vector.load %arg15[%c0_74, %c0_75, %c0_76] : memref<2x1x32xf32, #tpu.memory_space<vmem>>, vector<1x1x32xf32>
    %160 = vector.shape_cast %159 : vector<1x1x32xf32> to vector<1x32xf32>
    %cst_77 = arith.constant dense<0.000000e+00> : vector<16xf32>
    %161 = vector.multi_reduction <add>, %156, %cst_77 [1] : vector<16x32xf32> to vector<16xf32>
    %162 = vector.shape_cast %161 : vector<16xf32> to vector<16x1xf32>
    %cst_78 = arith.constant 3.200000e+01 : f32
    %163 = vector.broadcast %cst_78 : f32 to vector<16x1xf32>
    %164 = arith.divf %162, %163 : vector<16x1xf32>
    %165 = vector.broadcast %164 : vector<16x1xf32> to vector<16x32xf32>
    %166 = arith.subf %156, %165 : vector<16x32xf32>
    %167 = arith.mulf %166, %166 : vector<16x32xf32>
    %cst_79 = arith.constant dense<0.000000e+00> : vector<16xf32>
    %168 = vector.multi_reduction <add>, %167, %cst_79 [1] : vector<16x32xf32> to vector<16xf32>
    %169 = vector.shape_cast %168 : vector<16xf32> to vector<16x1xf32>
    %cst_80 = arith.constant 3.200000e+01 : f32
    %170 = vector.broadcast %cst_80 : f32 to vector<16x1xf32>
    %171 = arith.divf %169, %170 : vector<16x1xf32>
    %172 = vector.broadcast %164 : vector<16x1xf32> to vector<16x32xf32>
    %173 = arith.subf %156, %172 : vector<16x32xf32>
    %cst_81 = arith.constant 9.99999974E-6 : f32
    %174 = vector.broadcast %cst_81 : f32 to vector<16x1xf32>
    %175 = arith.addf %171, %174 : vector<16x1xf32>
    %176 = math.rsqrt %175 : vector<16x1xf32>
    %177 = vector.broadcast %176 : vector<16x1xf32> to vector<16x32xf32>
    %178 = arith.mulf %173, %177 : vector<16x32xf32>
    %179 = vector.broadcast %158 : vector<1x32xf32> to vector<16x32xf32>
    %180 = arith.mulf %178, %179 : vector<16x32xf32>
    %181 = vector.broadcast %160 : vector<1x32xf32> to vector<16x32xf32>
    %182 = arith.addf %180, %181 : vector<16x32xf32>
    %c1 = arith.constant 1 : index
    %c0_82 = arith.constant 0 : index
    %c0_83 = arith.constant 0 : index
    %183 = vector.load %arg4[%c1, %c0_82, %c0_83] : memref<2x32x96xbf16, #tpu.memory_space<vmem>>, vector<1x32x96xbf16>
    %184 = vector.shape_cast %183 : vector<1x32x96xbf16> to vector<32x96xbf16>
    %c1_84 = arith.constant 1 : index
    %c0_85 = arith.constant 0 : index
    %c0_86 = arith.constant 0 : index
    %185 = vector.load %arg6[%c1_84, %c0_85, %c0_86] : memref<2x32x32xbf16, #tpu.memory_space<vmem>>, vector<1x32x32xbf16>
    %186 = vector.shape_cast %185 : vector<1x32x32xbf16> to vector<32x32xbf16>
    %187 = arith.truncf %182 : vector<16x32xf32> to vector<16x32xbf16>
    %cst_87 = arith.constant dense<0.000000e+00> : vector<16x96xf32>
    %188 = tpu.matmul %187, %184, %cst_87 {dimension_numbers = #tpu.dot_dimension_numbers<[1], [0], [0], [1], [0, 0, 1, 1], [], []>} : vector<16x32xbf16>, vector<32x96xbf16>, vector<16x96xf32> -> vector<16x96xf32>
    %c1_88 = arith.constant 1 : index
    %c0_89 = arith.constant 0 : index
    %c0_90 = arith.constant 0 : index
    %189 = vector.load %arg5[%c1_88, %c0_89, %c0_90] : memref<2x1x96xf32, #tpu.memory_space<vmem>>, vector<1x1x96xf32>
    %190 = vector.shape_cast %189 : vector<1x1x96xf32> to vector<1x96xf32>
    %191 = vector.broadcast %190 : vector<1x96xf32> to vector<16x96xf32>
    %192 = arith.addf %188, %191 : vector<16x96xf32>
    %cst_91 = arith.constant 0.000000e+00 : f32
    %193 = vector.broadcast %cst_91 : f32 to vector<16x32xf32>
    %194 = vector.extract_strided_slice %192 {offsets = [0, 0], sizes = [16, 8], strides = [1, 1]} : vector<16x96xf32> to vector<16x8xf32>
    %195 = vector.extract_strided_slice %192 {offsets = [0, 32], sizes = [16, 8], strides = [1, 1]} : vector<16x96xf32> to vector<16x8xf32>
    %196 = vector.extract_strided_slice %192 {offsets = [0, 64], sizes = [16, 8], strides = [1, 1]} : vector<16x96xf32> to vector<16x8xf32>
    %cst_92 = arith.constant dense<0.000000e+00> : vector<16x16xf32>
    %197 = tpu.matmul %194, %195, %cst_92 {dimension_numbers = #tpu.dot_dimension_numbers<[1], [1], [0], [0], [0, 0, 1, 0], [], []>} : vector<16x8xf32>, vector<16x8xf32>, vector<16x16xf32> -> vector<16x16xf32>
    %cst_93 = arith.constant 0.353553385 : f32
    %198 = vector.broadcast %cst_93 : f32 to vector<16x16xf32>
    %199 = arith.mulf %197, %198 : vector<16x16xf32>
    %200 = arith.addf %199, %2 : vector<16x16xf32>
    %cst_94 = arith.constant dense<0xFF800000> : vector<16xf32>
    %201 = vector.multi_reduction <maximumf>, %200, %cst_94 [1] : vector<16x16xf32> to vector<16xf32>
    %202 = vector.shape_cast %201 : vector<16xf32> to vector<16x1xf32>
    %203 = vector.broadcast %202 : vector<16x1xf32> to vector<16x16xf32>
    %204 = arith.subf %200, %203 : vector<16x16xf32>
    %205 = math.exp %204 : vector<16x16xf32>
    %cst_95 = arith.constant dense<0.000000e+00> : vector<16xf32>
    %206 = vector.multi_reduction <add>, %205, %cst_95 [1] : vector<16x16xf32> to vector<16xf32>
    %207 = vector.shape_cast %206 : vector<16xf32> to vector<16x1xf32>
    %208 = vector.broadcast %207 : vector<16x1xf32> to vector<16x16xf32>
    %209 = arith.divf %205, %208 : vector<16x16xf32>
    %cst_96 = arith.constant dense<0.000000e+00> : vector<16x8xf32>
    %210 = tpu.matmul %209, %196, %cst_96 {dimension_numbers = #tpu.dot_dimension_numbers<[1], [0], [0], [1], [0, 0, 1, 1], [], []>} : vector<16x16xf32>, vector<16x8xf32>, vector<16x8xf32> -> vector<16x8xf32>
    %211 = arith.truncf %210 : vector<16x8xf32> to vector<16x8xbf16>
    %212 = vector.extract_strided_slice %186 {offsets = [0, 0], sizes = [8, 32], strides = [1, 1]} : vector<32x32xbf16> to vector<8x32xbf16>
    %cst_97 = arith.constant dense<0.000000e+00> : vector<16x32xf32>
    %213 = tpu.matmul %211, %212, %cst_97 {dimension_numbers = #tpu.dot_dimension_numbers<[1], [0], [0], [1], [0, 0, 1, 1], [], []>} : vector<16x8xbf16>, vector<8x32xbf16>, vector<16x32xf32> -> vector<16x32xf32>
    %214 = arith.addf %193, %213 : vector<16x32xf32>
    %215 = vector.extract_strided_slice %192 {offsets = [0, 8], sizes = [16, 8], strides = [1, 1]} : vector<16x96xf32> to vector<16x8xf32>
    %216 = vector.extract_strided_slice %192 {offsets = [0, 40], sizes = [16, 8], strides = [1, 1]} : vector<16x96xf32> to vector<16x8xf32>
    %217 = vector.extract_strided_slice %192 {offsets = [0, 72], sizes = [16, 8], strides = [1, 1]} : vector<16x96xf32> to vector<16x8xf32>
    %cst_98 = arith.constant dense<0.000000e+00> : vector<16x16xf32>
    %218 = tpu.matmul %215, %216, %cst_98 {dimension_numbers = #tpu.dot_dimension_numbers<[1], [1], [0], [0], [0, 0, 1, 0], [], []>} : vector<16x8xf32>, vector<16x8xf32>, vector<16x16xf32> -> vector<16x16xf32>
    %cst_99 = arith.constant 0.353553385 : f32
    %219 = vector.broadcast %cst_99 : f32 to vector<16x16xf32>
    %220 = arith.mulf %218, %219 : vector<16x16xf32>
    %221 = arith.addf %220, %2 : vector<16x16xf32>
    %cst_100 = arith.constant dense<0xFF800000> : vector<16xf32>
    %222 = vector.multi_reduction <maximumf>, %221, %cst_100 [1] : vector<16x16xf32> to vector<16xf32>
    %223 = vector.shape_cast %222 : vector<16xf32> to vector<16x1xf32>
    %224 = vector.broadcast %223 : vector<16x1xf32> to vector<16x16xf32>
    %225 = arith.subf %221, %224 : vector<16x16xf32>
    %226 = math.exp %225 : vector<16x16xf32>
    %cst_101 = arith.constant dense<0.000000e+00> : vector<16xf32>
    %227 = vector.multi_reduction <add>, %226, %cst_101 [1] : vector<16x16xf32> to vector<16xf32>
    %228 = vector.shape_cast %227 : vector<16xf32> to vector<16x1xf32>
    %229 = vector.broadcast %228 : vector<16x1xf32> to vector<16x16xf32>
    %230 = arith.divf %226, %229 : vector<16x16xf32>
    %cst_102 = arith.constant dense<0.000000e+00> : vector<16x8xf32>
    %231 = tpu.matmul %230, %217, %cst_102 {dimension_numbers = #tpu.dot_dimension_numbers<[1], [0], [0], [1], [0, 0, 1, 1], [], []>} : vector<16x16xf32>, vector<16x8xf32>, vector<16x8xf32> -> vector<16x8xf32>
    %232 = arith.truncf %231 : vector<16x8xf32> to vector<16x8xbf16>
    %233 = vector.extract_strided_slice %186 {offsets = [8, 0], sizes = [8, 32], strides = [1, 1]} : vector<32x32xbf16> to vector<8x32xbf16>
    %cst_103 = arith.constant dense<0.000000e+00> : vector<16x32xf32>
    %234 = tpu.matmul %232, %233, %cst_103 {dimension_numbers = #tpu.dot_dimension_numbers<[1], [0], [0], [1], [0, 0, 1, 1], [], []>} : vector<16x8xbf16>, vector<8x32xbf16>, vector<16x32xf32> -> vector<16x32xf32>
    %235 = arith.addf %214, %234 : vector<16x32xf32>
    %236 = vector.extract_strided_slice %192 {offsets = [0, 16], sizes = [16, 8], strides = [1, 1]} : vector<16x96xf32> to vector<16x8xf32>
    %237 = vector.extract_strided_slice %192 {offsets = [0, 48], sizes = [16, 8], strides = [1, 1]} : vector<16x96xf32> to vector<16x8xf32>
    %238 = vector.extract_strided_slice %192 {offsets = [0, 80], sizes = [16, 8], strides = [1, 1]} : vector<16x96xf32> to vector<16x8xf32>
    %cst_104 = arith.constant dense<0.000000e+00> : vector<16x16xf32>
    %239 = tpu.matmul %236, %237, %cst_104 {dimension_numbers = #tpu.dot_dimension_numbers<[1], [1], [0], [0], [0, 0, 1, 0], [], []>} : vector<16x8xf32>, vector<16x8xf32>, vector<16x16xf32> -> vector<16x16xf32>
    %cst_105 = arith.constant 0.353553385 : f32
    %240 = vector.broadcast %cst_105 : f32 to vector<16x16xf32>
    %241 = arith.mulf %239, %240 : vector<16x16xf32>
    %242 = arith.addf %241, %2 : vector<16x16xf32>
    %cst_106 = arith.constant dense<0xFF800000> : vector<16xf32>
    %243 = vector.multi_reduction <maximumf>, %242, %cst_106 [1] : vector<16x16xf32> to vector<16xf32>
    %244 = vector.shape_cast %243 : vector<16xf32> to vector<16x1xf32>
    %245 = vector.broadcast %244 : vector<16x1xf32> to vector<16x16xf32>
    %246 = arith.subf %242, %245 : vector<16x16xf32>
    %247 = math.exp %246 : vector<16x16xf32>
    %cst_107 = arith.constant dense<0.000000e+00> : vector<16xf32>
    %248 = vector.multi_reduction <add>, %247, %cst_107 [1] : vector<16x16xf32> to vector<16xf32>
    %249 = vector.shape_cast %248 : vector<16xf32> to vector<16x1xf32>
    %250 = vector.broadcast %249 : vector<16x1xf32> to vector<16x16xf32>
    %251 = arith.divf %247, %250 : vector<16x16xf32>
    %cst_108 = arith.constant dense<0.000000e+00> : vector<16x8xf32>
    %252 = tpu.matmul %251, %238, %cst_108 {dimension_numbers = #tpu.dot_dimension_numbers<[1], [0], [0], [1], [0, 0, 1, 1], [], []>} : vector<16x16xf32>, vector<16x8xf32>, vector<16x8xf32> -> vector<16x8xf32>
    %253 = arith.truncf %252 : vector<16x8xf32> to vector<16x8xbf16>
    %254 = vector.extract_strided_slice %186 {offsets = [16, 0], sizes = [8, 32], strides = [1, 1]} : vector<32x32xbf16> to vector<8x32xbf16>
    %cst_109 = arith.constant dense<0.000000e+00> : vector<16x32xf32>
    %255 = tpu.matmul %253, %254, %cst_109 {dimension_numbers = #tpu.dot_dimension_numbers<[1], [0], [0], [1], [0, 0, 1, 1], [], []>} : vector<16x8xbf16>, vector<8x32xbf16>, vector<16x32xf32> -> vector<16x32xf32>
    %256 = arith.addf %235, %255 : vector<16x32xf32>
    %257 = vector.extract_strided_slice %192 {offsets = [0, 24], sizes = [16, 8], strides = [1, 1]} : vector<16x96xf32> to vector<16x8xf32>
    %258 = vector.extract_strided_slice %192 {offsets = [0, 56], sizes = [16, 8], strides = [1, 1]} : vector<16x96xf32> to vector<16x8xf32>
    %259 = vector.extract_strided_slice %192 {offsets = [0, 88], sizes = [16, 8], strides = [1, 1]} : vector<16x96xf32> to vector<16x8xf32>
    %cst_110 = arith.constant dense<0.000000e+00> : vector<16x16xf32>
    %260 = tpu.matmul %257, %258, %cst_110 {dimension_numbers = #tpu.dot_dimension_numbers<[1], [1], [0], [0], [0, 0, 1, 0], [], []>} : vector<16x8xf32>, vector<16x8xf32>, vector<16x16xf32> -> vector<16x16xf32>
    %cst_111 = arith.constant 0.353553385 : f32
    %261 = vector.broadcast %cst_111 : f32 to vector<16x16xf32>
    %262 = arith.mulf %260, %261 : vector<16x16xf32>
    %263 = arith.addf %262, %2 : vector<16x16xf32>
    %cst_112 = arith.constant dense<0xFF800000> : vector<16xf32>
    %264 = vector.multi_reduction <maximumf>, %263, %cst_112 [1] : vector<16x16xf32> to vector<16xf32>
    %265 = vector.shape_cast %264 : vector<16xf32> to vector<16x1xf32>
    %266 = vector.broadcast %265 : vector<16x1xf32> to vector<16x16xf32>
    %267 = arith.subf %263, %266 : vector<16x16xf32>
    %268 = math.exp %267 : vector<16x16xf32>
    %cst_113 = arith.constant dense<0.000000e+00> : vector<16xf32>
    %269 = vector.multi_reduction <add>, %268, %cst_113 [1] : vector<16x16xf32> to vector<16xf32>
    %270 = vector.shape_cast %269 : vector<16xf32> to vector<16x1xf32>
    %271 = vector.broadcast %270 : vector<16x1xf32> to vector<16x16xf32>
    %272 = arith.divf %268, %271 : vector<16x16xf32>
    %cst_114 = arith.constant dense<0.000000e+00> : vector<16x8xf32>
    %273 = tpu.matmul %272, %259, %cst_114 {dimension_numbers = #tpu.dot_dimension_numbers<[1], [0], [0], [1], [0, 0, 1, 1], [], []>} : vector<16x16xf32>, vector<16x8xf32>, vector<16x8xf32> -> vector<16x8xf32>
    %274 = arith.truncf %273 : vector<16x8xf32> to vector<16x8xbf16>
    %275 = vector.extract_strided_slice %186 {offsets = [24, 0], sizes = [8, 32], strides = [1, 1]} : vector<32x32xbf16> to vector<8x32xbf16>
    %cst_115 = arith.constant dense<0.000000e+00> : vector<16x32xf32>
    %276 = tpu.matmul %274, %275, %cst_115 {dimension_numbers = #tpu.dot_dimension_numbers<[1], [0], [0], [1], [0, 0, 1, 1], [], []>} : vector<16x8xbf16>, vector<8x32xbf16>, vector<16x32xf32> -> vector<16x32xf32>
    %277 = arith.addf %256, %276 : vector<16x32xf32>
    %c1_116 = arith.constant 1 : index
    %c0_117 = arith.constant 0 : index
    %c0_118 = arith.constant 0 : index
    %278 = vector.load %arg7[%c1_116, %c0_117, %c0_118] : memref<2x1x32xf32, #tpu.memory_space<vmem>>, vector<1x1x32xf32>
    %279 = vector.shape_cast %278 : vector<1x1x32xf32> to vector<1x32xf32>
    %280 = vector.broadcast %279 : vector<1x32xf32> to vector<16x32xf32>
    %281 = arith.addf %277, %280 : vector<16x32xf32>
    %282 = arith.addf %182, %281 : vector<16x32xf32>
    %c1_119 = arith.constant 1 : index
    %c0_120 = arith.constant 0 : index
    %c0_121 = arith.constant 0 : index
    %283 = vector.load %arg8[%c1_119, %c0_120, %c0_121] : memref<2x1x32xf32, #tpu.memory_space<vmem>>, vector<1x1x32xf32>
    %284 = vector.shape_cast %283 : vector<1x1x32xf32> to vector<1x32xf32>
    %c1_122 = arith.constant 1 : index
    %c0_123 = arith.constant 0 : index
    %c0_124 = arith.constant 0 : index
    %285 = vector.load %arg9[%c1_122, %c0_123, %c0_124] : memref<2x1x32xf32, #tpu.memory_space<vmem>>, vector<1x1x32xf32>
    %286 = vector.shape_cast %285 : vector<1x1x32xf32> to vector<1x32xf32>
    %cst_125 = arith.constant dense<0.000000e+00> : vector<16xf32>
    %287 = vector.multi_reduction <add>, %282, %cst_125 [1] : vector<16x32xf32> to vector<16xf32>
    %288 = vector.shape_cast %287 : vector<16xf32> to vector<16x1xf32>
    %cst_126 = arith.constant 3.200000e+01 : f32
    %289 = vector.broadcast %cst_126 : f32 to vector<16x1xf32>
    %290 = arith.divf %288, %289 : vector<16x1xf32>
    %291 = vector.broadcast %290 : vector<16x1xf32> to vector<16x32xf32>
    %292 = arith.subf %282, %291 : vector<16x32xf32>
    %293 = arith.mulf %292, %292 : vector<16x32xf32>
    %cst_127 = arith.constant dense<0.000000e+00> : vector<16xf32>
    %294 = vector.multi_reduction <add>, %293, %cst_127 [1] : vector<16x32xf32> to vector<16xf32>
    %295 = vector.shape_cast %294 : vector<16xf32> to vector<16x1xf32>
    %cst_128 = arith.constant 3.200000e+01 : f32
    %296 = vector.broadcast %cst_128 : f32 to vector<16x1xf32>
    %297 = arith.divf %295, %296 : vector<16x1xf32>
    %298 = vector.broadcast %290 : vector<16x1xf32> to vector<16x32xf32>
    %299 = arith.subf %282, %298 : vector<16x32xf32>
    %cst_129 = arith.constant 9.99999974E-6 : f32
    %300 = vector.broadcast %cst_129 : f32 to vector<16x1xf32>
    %301 = arith.addf %297, %300 : vector<16x1xf32>
    %302 = math.rsqrt %301 : vector<16x1xf32>
    %303 = vector.broadcast %302 : vector<16x1xf32> to vector<16x32xf32>
    %304 = arith.mulf %299, %303 : vector<16x32xf32>
    %305 = vector.broadcast %284 : vector<1x32xf32> to vector<16x32xf32>
    %306 = arith.mulf %304, %305 : vector<16x32xf32>
    %307 = vector.broadcast %286 : vector<1x32xf32> to vector<16x32xf32>
    %308 = arith.addf %306, %307 : vector<16x32xf32>
    %309 = arith.truncf %308 : vector<16x32xf32> to vector<16x32xbf16>
    %c1_130 = arith.constant 1 : index
    %c0_131 = arith.constant 0 : index
    %c0_132 = arith.constant 0 : index
    %310 = vector.load %arg10[%c1_130, %c0_131, %c0_132] : memref<2x32x2048xbf16, #tpu.memory_space<vmem>>, vector<1x32x2048xbf16>
    %311 = vector.shape_cast %310 : vector<1x32x2048xbf16> to vector<32x2048xbf16>
    %cst_133 = arith.constant dense<0.000000e+00> : vector<16x2048xf32>
    %312 = tpu.matmul %309, %311, %cst_133 {dimension_numbers = #tpu.dot_dimension_numbers<[1], [0], [0], [1], [0, 0, 1, 1], [], []>} : vector<16x32xbf16>, vector<32x2048xbf16>, vector<16x2048xf32> -> vector<16x2048xf32>
    %c1_134 = arith.constant 1 : index
    %c0_135 = arith.constant 0 : index
    %c0_136 = arith.constant 0 : index
    %313 = vector.load %arg11[%c1_134, %c0_135, %c0_136] : memref<2x1x2048xf32, #tpu.memory_space<vmem>>, vector<1x1x2048xf32>
    %314 = vector.shape_cast %313 : vector<1x1x2048xf32> to vector<1x2048xf32>
    %315 = vector.broadcast %314 : vector<1x2048xf32> to vector<16x2048xf32>
    %316 = arith.addf %312, %315 : vector<16x2048xf32>
    %cst_137 = arith.constant 0.000000e+00 : f32
    %317 = vector.broadcast %cst_137 : f32 to vector<16x2048xf32>
    %318 = arith.maximumf %316, %317 : vector<16x2048xf32>
    %319 = arith.truncf %318 : vector<16x2048xf32> to vector<16x2048xbf16>
    %c1_138 = arith.constant 1 : index
    %c0_139 = arith.constant 0 : index
    %c0_140 = arith.constant 0 : index
    %320 = vector.load %arg12[%c1_138, %c0_139, %c0_140] : memref<2x2048x32xbf16, #tpu.memory_space<vmem>>, vector<1x2048x32xbf16>
    %321 = vector.shape_cast %320 : vector<1x2048x32xbf16> to vector<2048x32xbf16>
    %cst_141 = arith.constant dense<0.000000e+00> : vector<16x32xf32>
    %322 = tpu.matmul %319, %321, %cst_141 {dimension_numbers = #tpu.dot_dimension_numbers<[1], [0], [0], [1], [0, 0, 1, 1], [], []>} : vector<16x2048xbf16>, vector<2048x32xbf16>, vector<16x32xf32> -> vector<16x32xf32>
    %c1_142 = arith.constant 1 : index
    %c0_143 = arith.constant 0 : index
    %c0_144 = arith.constant 0 : index
    %323 = vector.load %arg13[%c1_142, %c0_143, %c0_144] : memref<2x1x32xf32, #tpu.memory_space<vmem>>, vector<1x1x32xf32>
    %324 = vector.shape_cast %323 : vector<1x1x32xf32> to vector<1x32xf32>
    %325 = vector.broadcast %324 : vector<1x32xf32> to vector<16x32xf32>
    %326 = arith.addf %322, %325 : vector<16x32xf32>
    %327 = arith.addf %308, %326 : vector<16x32xf32>
    %c1_145 = arith.constant 1 : index
    %c0_146 = arith.constant 0 : index
    %c0_147 = arith.constant 0 : index
    %328 = vector.load %arg14[%c1_145, %c0_146, %c0_147] : memref<2x1x32xf32, #tpu.memory_space<vmem>>, vector<1x1x32xf32>
    %329 = vector.shape_cast %328 : vector<1x1x32xf32> to vector<1x32xf32>
    %c1_148 = arith.constant 1 : index
    %c0_149 = arith.constant 0 : index
    %c0_150 = arith.constant 0 : index
    %330 = vector.load %arg15[%c1_148, %c0_149, %c0_150] : memref<2x1x32xf32, #tpu.memory_space<vmem>>, vector<1x1x32xf32>
    %331 = vector.shape_cast %330 : vector<1x1x32xf32> to vector<1x32xf32>
    %cst_151 = arith.constant dense<0.000000e+00> : vector<16xf32>
    %332 = vector.multi_reduction <add>, %327, %cst_151 [1] : vector<16x32xf32> to vector<16xf32>
    %333 = vector.shape_cast %332 : vector<16xf32> to vector<16x1xf32>
    %cst_152 = arith.constant 3.200000e+01 : f32
    %334 = vector.broadcast %cst_152 : f32 to vector<16x1xf32>
    %335 = arith.divf %333, %334 : vector<16x1xf32>
    %336 = vector.broadcast %335 : vector<16x1xf32> to vector<16x32xf32>
    %337 = arith.subf %327, %336 : vector<16x32xf32>
    %338 = arith.mulf %337, %337 : vector<16x32xf32>
    %cst_153 = arith.constant dense<0.000000e+00> : vector<16xf32>
    %339 = vector.multi_reduction <add>, %338, %cst_153 [1] : vector<16x32xf32> to vector<16xf32>
    %340 = vector.shape_cast %339 : vector<16xf32> to vector<16x1xf32>
    %cst_154 = arith.constant 3.200000e+01 : f32
    %341 = vector.broadcast %cst_154 : f32 to vector<16x1xf32>
    %342 = arith.divf %340, %341 : vector<16x1xf32>
    %343 = vector.broadcast %335 : vector<16x1xf32> to vector<16x32xf32>
    %344 = arith.subf %327, %343 : vector<16x32xf32>
    %cst_155 = arith.constant 9.99999974E-6 : f32
    %345 = vector.broadcast %cst_155 : f32 to vector<16x1xf32>
    %346 = arith.addf %342, %345 : vector<16x1xf32>
    %347 = math.rsqrt %346 : vector<16x1xf32>
    %348 = vector.broadcast %347 : vector<16x1xf32> to vector<16x32xf32>
    %349 = arith.mulf %344, %348 : vector<16x32xf32>
    %350 = vector.broadcast %329 : vector<1x32xf32> to vector<16x32xf32>
    %351 = arith.mulf %349, %350 : vector<16x32xf32>
    %352 = vector.broadcast %331 : vector<1x32xf32> to vector<16x32xf32>
    %353 = arith.addf %351, %352 : vector<16x32xf32>
    %cst_156 = arith.constant dense<0.000000e+00> : vector<2x32xf32>
    %354 = tpu.matmul %3, %353, %cst_156 {dimension_numbers = #tpu.dot_dimension_numbers<[1], [0], [0], [1], [0, 0, 1, 1], [], []>} : vector<2x16xf32>, vector<16x32xf32>, vector<2x32xf32> -> vector<2x32xf32>
    %cst_157 = arith.constant dense<0.000000e+00> : vector<2xf32>
    %355 = vector.multi_reduction <add>, %3, %cst_157 [1] : vector<2x16xf32> to vector<2xf32>
    %356 = vector.shape_cast %355 : vector<2xf32> to vector<2x1xf32>
    %cst_158 = arith.constant 1.000000e+00 : f32
    %357 = vector.broadcast %cst_158 : f32 to vector<2x1xf32>
    %358 = arith.maximumf %356, %357 : vector<2x1xf32>
    %359 = vector.broadcast %358 : vector<2x1xf32> to vector<2x32xf32>
    %360 = arith.divf %354, %359 : vector<2x32xf32>
    %361 = arith.truncf %360 : vector<2x32xf32> to vector<2x32xbf16>
    %c0_159 = arith.constant 0 : index
    %c0_160 = arith.constant 0 : index
    %362 = vector.load %arg16[%c0_159, %c0_160] : memref<32x32xbf16, #tpu.memory_space<vmem>>, vector<32x32xbf16>
    %cst_161 = arith.constant dense<0.000000e+00> : vector<2x32xf32>
    %363 = tpu.matmul %361, %362, %cst_161 {dimension_numbers = #tpu.dot_dimension_numbers<[1], [0], [0], [1], [0, 0, 1, 1], [], []>} : vector<2x32xbf16>, vector<32x32xbf16>, vector<2x32xf32> -> vector<2x32xf32>
    %c0_162 = arith.constant 0 : index
    %c0_163 = arith.constant 0 : index
    %364 = vector.load %arg17[%c0_162, %c0_163] : memref<1x32xf32, #tpu.memory_space<vmem>>, vector<1x32xf32>
    %365 = vector.broadcast %364 : vector<1x32xf32> to vector<2x32xf32>
    %366 = arith.addf %363, %365 : vector<2x32xf32>
    %cst_164 = arith.constant 0.000000e+00 : f32
    %367 = vector.broadcast %cst_164 : f32 to vector<2x32xf32>
    %368 = arith.maximumf %366, %367 : vector<2x32xf32>
    %369 = arith.truncf %368 : vector<2x32xf32> to vector<2x32xbf16>
    %c0_165 = arith.constant 0 : index
    %c0_166 = arith.constant 0 : index
    %370 = vector.load %arg18[%c0_165, %c0_166] : memref<32x32xbf16, #tpu.memory_space<vmem>>, vector<32x32xbf16>
    %cst_167 = arith.constant dense<0.000000e+00> : vector<2x32xf32>
    %371 = tpu.matmul %369, %370, %cst_167 {dimension_numbers = #tpu.dot_dimension_numbers<[1], [0], [0], [1], [0, 0, 1, 1], [], []>} : vector<2x32xbf16>, vector<32x32xbf16>, vector<2x32xf32> -> vector<2x32xf32>
    %c0_168 = arith.constant 0 : index
    %c0_169 = arith.constant 0 : index
    %372 = vector.load %arg19[%c0_168, %c0_169] : memref<1x32xf32, #tpu.memory_space<vmem>>, vector<1x32xf32>
    %373 = vector.broadcast %372 : vector<1x32xf32> to vector<2x32xf32>
    %374 = arith.addf %371, %373 : vector<2x32xf32>
    %c0_170 = arith.constant 0 : index
    %c0_171 = arith.constant 0 : index
    %375 = vector.load %arg20[%c0_170, %c0_171] : memref<2x32xf32, #tpu.memory_space<vmem>>, vector<2x32xf32>
    tpu.vector_store %arg20[%c0_170, %c0_171], %374 {strides = array<i32>} : memref<2x32xf32, #tpu.memory_space<vmem>>, vector<2x32xf32>,
    return
  }
  func.func @transform_0(%arg0: i32) -> (i32, i32, i32) {
    %c0_i32 = arith.constant 0 : i32
    %c0_i32_0 = arith.constant 0 : i32
    %c0_i32_1 = arith.constant 0 : i32
    %c0_i32_2 = arith.constant 0 : i32
    return %c0_i32, %c0_i32_0, %c0_i32_1 : i32, i32, i32
  }
  func.func @transform_1(%arg0: i32) -> (i32, i32) {
    %c0_i32 = arith.constant 0 : i32
    %c0_i32_0 = arith.constant 0 : i32
    %c0_i32_1 = arith.constant 0 : i32
    return %c0_i32, %c0_i32_0 : i32, i32
  }
  func.func @transform_2(%arg0: i32) -> (i32, i32) {
    %c0_i32 = arith.constant 0 : i32
    %c0_i32_0 = arith.constant 0 : i32
    %c0_i32_1 = arith.constant 0 : i32
    return %c0_i32, %c0_i32_0 : i32, i32
  }
  func.func @transform_3(%arg0: i32) -> (i32, i32, i32) {
    %c0_i32 = arith.constant 0 : i32
    %c0_i32_0 = arith.constant 0 : i32
    %c0_i32_1 = arith.constant 0 : i32
    %c0_i32_2 = arith.constant 0 : i32
    return %c0_i32, %c0_i32_0, %c0_i32_1 : i32, i32, i32
  }
  func.func @transform_4(%arg0: i32) -> (i32, i32, i32) {
    %c0_i32 = arith.constant 0 : i32
    %c0_i32_0 = arith.constant 0 : i32
    %c0_i32_1 = arith.constant 0 : i32
    %c0_i32_2 = arith.constant 0 : i32
    return %c0_i32, %c0_i32_0, %c0_i32_1 : i32, i32, i32
  }
  func.func @transform_5(%arg0: i32) -> (i32, i32, i32) {
    %c0_i32 = arith.constant 0 : i32
    %c0_i32_0 = arith.constant 0 : i32
    %c0_i32_1 = arith.constant 0 : i32
    %c0_i32_2 = arith.constant 0 : i32
    return %c0_i32, %c0_i32_0, %c0_i32_1 : i32, i32, i32
  }
  func.func @transform_6(%arg0: i32) -> (i32, i32, i32) {
    %c0_i32 = arith.constant 0 : i32
    %c0_i32_0 = arith.constant 0 : i32
    %c0_i32_1 = arith.constant 0 : i32
    %c0_i32_2 = arith.constant 0 : i32
    return %c0_i32, %c0_i32_0, %c0_i32_1 : i32, i32, i32
  }
  func.func @transform_7(%arg0: i32) -> (i32, i32, i32) {
    %c0_i32 = arith.constant 0 : i32
    %c0_i32_0 = arith.constant 0 : i32
    %c0_i32_1 = arith.constant 0 : i32
    %c0_i32_2 = arith.constant 0 : i32
    return %c0_i32, %c0_i32_0, %c0_i32_1 : i32, i32, i32
  }
  func.func @transform_8(%arg0: i32) -> (i32, i32, i32) {
    %c0_i32 = arith.constant 0 : i32
    %c0_i32_0 = arith.constant 0 : i32
    %c0_i32_1 = arith.constant 0 : i32
    %c0_i32_2 = arith.constant 0 : i32
    return %c0_i32, %c0_i32_0, %c0_i32_1 : i32, i32, i32
  }
  func.func @transform_9(%arg0: i32) -> (i32, i32, i32) {
    %c0_i32 = arith.constant 0 : i32
    %c0_i32_0 = arith.constant 0 : i32
    %c0_i32_1 = arith.constant 0 : i32
    %c0_i32_2 = arith.constant 0 : i32
    return %c0_i32, %c0_i32_0, %c0_i32_1 : i32, i32, i32
  }
  func.func @transform_10(%arg0: i32) -> (i32, i32, i32) {
    %c0_i32 = arith.constant 0 : i32
    %c0_i32_0 = arith.constant 0 : i32
    %c0_i32_1 = arith.constant 0 : i32
    %c0_i32_2 = arith.constant 0 : i32
    return %c0_i32, %c0_i32_0, %c0_i32_1 : i32, i32, i32
  }
  func.func @transform_11(%arg0: i32) -> (i32, i32, i32) {
    %c0_i32 = arith.constant 0 : i32
    %c0_i32_0 = arith.constant 0 : i32
    %c0_i32_1 = arith.constant 0 : i32
    %c0_i32_2 = arith.constant 0 : i32
    return %c0_i32, %c0_i32_0, %c0_i32_1 : i32, i32, i32
  }
  func.func @transform_12(%arg0: i32) -> (i32, i32, i32) {
    %c0_i32 = arith.constant 0 : i32
    %c0_i32_0 = arith.constant 0 : i32
    %c0_i32_1 = arith.constant 0 : i32
    %c0_i32_2 = arith.constant 0 : i32
    return %c0_i32, %c0_i32_0, %c0_i32_1 : i32, i32, i32
  }
  func.func @transform_13(%arg0: i32) -> (i32, i32, i32) {
    %c0_i32 = arith.constant 0 : i32
    %c0_i32_0 = arith.constant 0 : i32
    %c0_i32_1 = arith.constant 0 : i32
    %c0_i32_2 = arith.constant 0 : i32
    return %c0_i32, %c0_i32_0, %c0_i32_1 : i32, i32, i32
  }
  func.func @transform_14(%arg0: i32) -> (i32, i32, i32) {
    %c0_i32 = arith.constant 0 : i32
    %c0_i32_0 = arith.constant 0 : i32
    %c0_i32_1 = arith.constant 0 : i32
    %c0_i32_2 = arith.constant 0 : i32
    return %c0_i32, %c0_i32_0, %c0_i32_1 : i32, i32, i32
  }
  func.func @transform_15(%arg0: i32) -> (i32, i32) {
    %c0_i32 = arith.constant 0 : i32
    %c0_i32_0 = arith.constant 0 : i32
    %c0_i32_1 = arith.constant 0 : i32
    return %c0_i32, %c0_i32_0 : i32, i32
  }
  func.func @transform_16(%arg0: i32) -> (i32, i32) {
    %c0_i32 = arith.constant 0 : i32
    %c0_i32_0 = arith.constant 0 : i32
    %c0_i32_1 = arith.constant 0 : i32
    return %c0_i32, %c0_i32_0 : i32, i32
  }
  func.func @transform_17(%arg0: i32) -> (i32, i32) {
    %c0_i32 = arith.constant 0 : i32
    %c0_i32_0 = arith.constant 0 : i32
    %c0_i32_1 = arith.constant 0 : i32
    return %c0_i32, %c0_i32_0 : i32, i32
  }
  func.func @transform_18(%arg0: i32) -> (i32, i32) {
    %c0_i32 = arith.constant 0 : i32
    %c0_i32_0 = arith.constant 0 : i32
    %c0_i32_1 = arith.constant 0 : i32
    return %c0_i32, %c0_i32_0 : i32, i32
  }
  func.func @transform_19(%arg0: i32) -> (i32, i32) {
    %c0_i32 = arith.constant 0 : i32
    %c0_i32_0 = arith.constant 0 : i32
    %c0_i32_1 = arith.constant 0 : i32
    return %c0_i32, %c0_i32_0 : i32, i32
  }
}

</mosaic_0001>

<bundles_post_ra>
// kernel: tpu_custom_call.1
= control target key start
LH: loop header
LB: loop body
LE: loop exit
PB: predicated region body
PF: predicated region fallthrough
CT: control target
= control target key end

     0   :  { %s10436_s0 = inlined_call_operand.vmem [shape: f32[2,8,32], index: 0, kind: input, shape index: {}]   ;;  %s10437_s1 = inlined_call_operand.vmem [shape: f32[16,16], index: 1, kind: input, shape index: {}]   ;;  %s10438_s2 = inlined_call_operand.vmem [shape: f32[2,16], index: 2, kind: input, shape index: {}]   ;;  %s10439_s3 = inlined_call_operand.vmem [shape: bf16[2,32,96], index: 3, kind: input, shape index: {}]   ;;  %s10440_s4 = inlined_call_operand.vmem [shape: f32[2,1,96], index: 4, kind: input, shape index: {}]   ;;  %s10441_s5 = inlined_call_operand.vmem [shape: bf16[2,32,32], index: 5, kind: input, shape index: {}]   ;;  %s10442_s6 = inlined_call_operand.vmem [shape: f32[2,1,32], index: 6, kind: input, shape index: {}]   ;;  %s10443_s7 = inlined_call_operand.vmem [shape: f32[2,1,32], index: 7, kind: input, shape index: {}]   ;;  %s10444_s8 = inlined_call_operand.vmem [shape: f32[2,1,32], index: 8, kind: input, shape index: {}]   ;;  %s10445_s9 = inlined_call_operand.vmem [shape: bf16[2,32,2048], index: 9, kind: input, shape index: {}]   ;;  %s10446_s10 = inlined_call_operand.vmem [shape: f32[2,1,2048], index: 10, kind: input, shape index: {}]   ;;  %s10447_s11 = inlined_call_operand.vmem [shape: bf16[2,2048,32], index: 11, kind: input, shape index: {}]   ;;  %s10448_s12 = inlined_call_operand.vmem [shape: f32[2,1,32], index: 12, kind: input, shape index: {}]   ;;  %s10449_s13 = inlined_call_operand.vmem [shape: f32[2,1,32], index: 13, kind: input, shape index: {}]   ;;  %s10450_s14 = inlined_call_operand.vmem [shape: f32[2,1,32], index: 14, kind: input, shape index: {}]   ;;  %s10451_s15 = inlined_call_operand.vmem [shape: bf16[32,32], index: 15, kind: input, shape index: {}]   ;;  %s10452_s16 = inlined_call_operand.vmem [shape: f32[1,32], index: 16, kind: input, shape index: {}]   ;;  %s10453_s17 = inlined_call_operand.vmem [shape: bf16[32,32], index: 17, kind: input, shape index: {}]   ;;  %s10454_s18 = inlined_call_operand.vmem [shape: f32[1,32], index: 18, kind: input, shape index: {}]   ;;  %s10455_s19 = inlined_call_operand.hbm [shape: f32[2,32], index: 19, kind: output, shape index: {}]  }
   0x1   :  { %10469 = sst [smem:[#allocation5_spill]] %s10436_s0 }
   0x2   :  { %10470 = sst [smem:[#allocation6_spill]] %s10437_s1 }
   0x3   :  { %10471 = sst [smem:[#allocation7_spill]] %s10438_s2 }
   0x4   :  { %10472 = sst [smem:[#allocation8_spill]] %s10439_s3 }
   0x5   :  { %s10473_s20 = sld [smem:[#allocation5_spill]]  ;;  %vm71_vm0 = vcmask 261120   ;;  %s10474_s23 = sld [smem:[#allocation8_spill]]  ;;  %v8706_v8 = vmov 0.0   ;;  %vm8707_vm1 = vmmov 0  }
   0x6   :  { %7946 = vmatprep.subr.bf16.mxu0 %v8706_v8  ;;  %7950 = vmatprep.mubr.msk.bf16.mxu0 %vm8707_vm1, %v8706_v8 }
   0xb   :  { %v64_v0 = vld [vmem:[%s10473_s20] sm:$0xff]  ;;  %v65_v1 = vld [vmem:[%s10473_s20 + $0x8] sm:$0xff] }
   0xc   :  { %v69_v2 = vmul.f32 %v64_v0, %v64_v0  ;;  %v70_v3 = vmul.f32 %v65_v1, %v65_v1  ;;  %v8324_v6 = vld [vmem:[%s10474_s23] sm:$0xff]   ;;  %v8325_v7 = vld [vmem:[%s10474_s23 + $0x8] sm:$0xff]  }
   0xd   :  { %7947 = vmatpush3.bf16.msra.mxu0 %v8324_v6  ;;  %v8678_v25 = vld [vmem:[%s10473_s20] sm:$0xff]  ;;  %v8679_v27 = vld [vmem:[%s10473_s20 + $0x8] sm:$0xff] }
   0xe   :  { %v72_v4 = vsel %vm71_vm0, %v69_v2, 0.0  ;;  %v75_v5 = vsel %vm71_vm0, %v70_v3, 0.0  ;;  %7948 = vmatprep.subr.bf16.mxu0 %v8706_v8 }
   0xf   :  { %73 = vadd.xlane.f32.xlu0 %v72_v4 }
  0x11   :  { %7949 = vmatpush3.bf16.msra.mxu0 %v8325_v7 }
  0x13   :  { %76 = vadd.xlane.f32.xlu0 %v75_v5 }
  0x9c   :  { %v74_v9 = vpop.xlane.xlu0 %73 }
  0x9d   :  { %8588 = vrsqrt.f32 %v74_v9  ;;  %vm80_vm2 = vcmp.eq.f32.partialorder %v74_v9, inf  ;;  %v83_v11 = vand.u32 2147483648, %v74_v9  ;;  %vm82_vm3 = vcmp.eq.f32.partialorder %v74_v9, 0.0 }
  0xa0   :  { %v77_v10 = vpop.xlane.xlu0 %76 }
  0xa1   :  { %8590 = vrsqrt.f32 %v77_v10  ;;  %v90_v12 = vand.u32 2147483648, %v77_v10  ;;  %vm87_vm4 = vcmp.eq.f32.partialorder %v77_v10, inf  ;;  %vm89_vm5 = vcmp.eq.f32.partialorder %v77_v10, 0.0 }
  0xa7   :  { %v8589_v13 = vpop.eup %8588 }
  0xa8   :  { %v79_v14 = vmul.f32 %v8589_v13, %v74_v9 }
  0xaa   :  { %v81_v15 = vsel %vm80_vm2, %v74_v9, %v79_v14 }
  0xab   :  { %v8591_v16 = vpop.eup %8590  ;;  %v84_v17 = vsel %vm82_vm3, %v83_v11, %v81_v15 }
  0xac   :  { %v92_v18 = vmax.f32 %v84_v17, 1e-12  ;;  %v86_v19 = vmul.f32 %v8591_v16, %v77_v10 }
  0xae   :  { %v88_v20 = vsel %vm87_vm4, %v77_v10, %v86_v19  ;;  %8592 = vrcp.f32 %v92_v18 }
  0xaf   :  { %v91_v21 = vsel %vm89_vm5, %v90_v12, %v88_v20 }
  0xb0   :  { %v93_v22 = vmax.f32 %v91_v21, 1e-12 }
  0xb2   :  { %8594 = vrcp.f32 %v93_v22 }
  0xb8   :  { %v8593_v23 = vpop.eup %8592 }
  0xb9   :  { %v8843_v26 = vmul.f32 %v8678_v25, %v8593_v23 }
  0xbc   :  { %v8595_v24 = vpop.eup %8594 }
  0xbd   :  { %v8848_v28 = vmul.f32 %v8679_v27, %v8595_v24 }
  0xbf   :  { %v106_v29 = vpack.c.bf16 %v8848_v28, %v8843_v26 }
  0xc0   :  { %24 = vsyncpa [#allocation3], 0  ;;  %v6773_v30 = vld [vmem:[%s10440_s4] ss:$0 sm:$0xff]  ;;  %vm176_vm6 = vcmask 64512   ;;  %s8708_s30 = smov 120  }
  0xc1   :  { %7951 = vmatmul.mubr.msk.bf16.vlgmr.msra.gmra.mrb[0].mxu0 %vm71_vm0, %v106_v29  ;;  %s8709_s20 = smov 96   ;;  %s8710_s21 = smov 88   ;;  %vm8877_vm7 = vmpackc.low %vm176_vm6, %vm176_vm6  ;;  %vm264_vm8 = vcmask 130048   ;;  %vm583_vm9 = vcmask 1043456   ;;  %vm6615_vm10 = vcmask 123904   ;;  %vm6757_vm11 = vcmask 254976  }
  0xc2   :  { %s10477_s2 = sld [smem:[#allocation6_spill]]  ;;  %s10467_s3 = smov 64  }
  0xc3   :  { %s10468_s26 = smov 56   ;;  %s10464_s27 = smov 112  }
  0xc4   :  { %s10466_s28 = smov 80   ;;  %s10463_s24 = smov 48  }
  0xc5   :  { %s10460_s25 = smov 72   ;;  %s10461_s29 = smov 104  }
  0xc6   :  { %s10459_s22 = smov 40   ;;  %s10483_s0 = smov 104  }
  0xc7   :  { %s10484_s1 = smov 72  }
  0xc8   :  { %v8898_v50 = vld [vmem:[%s10477_s2 + $0x8] sm:$0xff]  ;;  %v8903_v53 = vld [vmem:[%s10477_s2] sm:$0xff] }
 0x194   :  { %v163_v31 = vpop.f32.mrb[0].mxu0 }
 0x195   :  { %v8856_v32 = vadd.f32 %v6773_v30, %v163_v31  ;;  %v7952_v33 = vpop.f32.mrb[1].mxu0 }
 0x196   :  { %v166_v34 = vpop.f32.mrb[2].mxu0 }
 0x197   :  { %v8858_v35 = vadd.f32 %v6773_v30, %v166_v34  ;;  %375 = vrot.lane.b32.xlu0 %v8856_v32, %s8708_s30  ;;  %v7953_v36 = vpop.f32.mrb[3].mxu0  ;;  %7958 = vmatprep.mubr.msk.f32.mxu1 %vm176_vm6, %v8856_v32 }
 0x199   :  { %v8866_v37 = vpack.i.bf16 %v8858_v35, %v8856_v32 }
 0x19b   :  { %8245 = vrot.lane.b32.xlu1 %v8866_v37, %s8709_s20 }
 0x19f   :  { %8250 = vrot.lane.b32.xlu1 %v8866_v37, %s8710_s21 }
 0x1a3   :  { %377 = vrot.lane.b32.xlu1 %v8858_v35, %s8708_s30 }
 0x209   :  { %v376_v38 = vpop.permute.xlu0 %375 }
 0x20a   :  { %7972 = vmatprep.mubr.msk.f32.mxu0 %vm176_vm6, %v376_v38 }
 0x20d   :  { %v8246_v39 = vpop.permute.xlu1 %8245 }
 0x20e   :  { %v8248_v40 = vunpack.i.h.bf16 %v8246_v39  ;;  %v8247_v41 = vunpack.i.l.bf16 %v8246_v39 }
 0x210   :  { %v8145_v43 = vpack.c.bf16 %v8248_v40, %v8247_v41 }
 0x211   :  { %v8251_v44 = vpop.permute.xlu1 %8250 }
 0x212   :  { %v8253_v45 = vunpack.i.h.bf16 %v8251_v44  ;;  %v8252_v46 = vunpack.i.l.bf16 %v8251_v44  ;;  %8147 = vmatprep.subr.msk.bf16.mxu1 %vm8877_vm7, %v8145_v43 }
 0x213   :  { %8150 = vmatpush3.bf16.xpose.msk.msra.mxu1 %vm8877_vm7, %v8145_v43 }
 0x214   :  { %v8155_v47 = vpack.c.bf16 %v8253_v45, %v8252_v46 }
 0x215   :  { %v378_v48 = vpop.permute.xlu1 %377 }
 0x216   :  { %8157 = vmatprep.subr.msk.bf16.mxu0 %vm8877_vm7, %v8155_v47 }
 0x217   :  { %8160 = vmatpush3.bf16.xpose.msk.msra.mxu0 %vm8877_vm7, %v8155_v47 }
 0x218   :  { %7982 = vmatprep.subr.bf16.mxu0 %v8706_v8 }
 0x21a   :  { %7959 = vmatmul.mubr.msk.f32.vlgmr.msra.gmra.mrb[0].mxu1 %vm176_vm6, %v8858_v35 }
 0x21e   :  { %7973 = vmatmul.mubr.msk.f32.vlgmr.msra.gmra.mrb[4].mxu0 %vm176_vm6, %v378_v48 }
 0x21f   :  { %7984 = vmatprep.mubr.msk.bf16.mxu0 %vm8707_vm1, %v8706_v8 }
 0x2ed   :  { %v7960_v49 = vpop.f32.mrb[0].mxu1 }
 0x2ee   :  { %v261_v51 = vmul.f32 0.35355338, %v7960_v49  ;;  %v251_v52 = vpop.f32.mrb[1].mxu1  ;;  %v102_v49 = vld [vmem:[%s10441_s5] sm:$0xf] }
 0x2ef   :  { %v260_v54 = vmul.f32 0.35355338, %v251_v52 }
 0x2f0   :  { %v263_v55 = vadd.f32 %v261_v51, %v8898_v50 }
 0x2f1   :  { %v7974_v56 = vpop.f32.mrb[4].mxu0  ;;  %v262_v57 = vadd.f32 %v260_v54, %v8903_v53 }
 0x2f2   :  { %v457_v58 = vpop.f32.mrb[5].mxu0  ;;  %v268_v59 = vsel %vm264_vm8, %v263_v55, -inf  ;;  %v467_v60 = vmul.f32 0.35355338, %v7974_v56  ;;  %v632_v56 = vsel %vm583_vm9, %v102_v49, 0 }
 0x2f3   :  { %v466_v61 = vmul.f32 0.35355338, %v457_v58  ;;  %269 = vmax.xlane.f32.xlu0 %v268_v59  ;;  %v265_v62 = vsel %vm264_vm8, %v262_v57, -inf  ;;  %v103_v58 = vld [vmem:[%s10441_s5 + $0x4] sm:$0xf] }
 0x2f4   :  { %266 = vmax.xlane.f32.xlu1 %v265_v62  ;;  %v469_v1 = vadd.f32 %v467_v60, %v8898_v50  ;;  %v585_v59 = vsel %vm583_vm9, %v103_v58, 0 }
 0x2f5   :  { %v468_v63 = vadd.f32 %v466_v61, %v8903_v53  ;;  %7983 = vmatpush3.bf16.msra.mxu0 %v585_v59 }
 0x2f6   :  { %v473_v2 = vsel %vm264_vm8, %v469_v1, -inf  ;;  %8008 = vmatprep.subr.bf16.mxu0 %v8706_v8 }
 0x2f7   :  { %v470_v0 = vsel %vm264_vm8, %v468_v63, -inf }
 0x2f8   :  { %471 = vmax.xlane.f32.xlu0 %v470_v0 }
 0x2fc   :  { %474 = vmax.xlane.f32.xlu0 %v473_v2 }
 0x380   :  { %v270_v3 = vpop.xlane.xlu0 %269 }
 0x381   :  { %v272_v4 = vsub.f32 %v263_v55, %v270_v3  ;;  %v267_v5 = vpop.xlane.xlu1 %266 }
 0x382   :  { %v271_v6 = vsub.f32 %v262_v57, %v267_v5 }
 0x383   :  { %v275_v7 = vmul.f32 1.442695, %v272_v4 }
 0x384   :  { %v273_v9 = vmul.f32 1.442695, %v271_v6 }
 0x385   :  { %8596 = vpow2.f32 %v275_v7  ;;  %v472_v10 = vpop.xlane.xlu0 %471 }
 0x386   :  { %v476_v11 = vsub.f32 %v468_v63, %v472_v10  ;;  %8598 = vpow2.f32 %v273_v9 }
 0x388   :  { %v478_v12 = vmul.f32 1.442695, %v476_v11 }
 0x389   :  { %v475_v13 = vpop.xlane.xlu0 %474 }
 0x38a   :  { %8600 = vpow2.f32 %v478_v12  ;;  %v477_v14 = vsub.f32 %v469_v1, %v475_v13 }
 0x38c   :  { %v480_v15 = vmul.f32 1.442695, %v477_v14 }
 0x38e   :  { %8602 = vpow2.f32 %v480_v15 }
 0x38f   :  { %v8597_v16 = vpop.eup %8596 }
 0x390   :  { %v280_v17 = vsel %vm264_vm8, %v8597_v16, 0.0  ;;  %v8599_v18 = vpop.eup %8598 }
 0x391   :  { %281 = vadd.xlane.f32.xlu1 %v280_v17  ;;  %v277_v20 = vsel %vm264_vm8, %v8599_v18, 0.0 }
 0x394   :  { %v8601_v19 = vpop.eup %8600 }
 0x395   :  { %278 = vadd.xlane.f32.xlu1 %v277_v20  ;;  %v482_v21 = vsel %vm264_vm8, %v8601_v19, 0.0 }
 0x396   :  { %483 = vadd.xlane.f32.xlu0 %v482_v21 }
 0x398   :  { %v8603_v22 = vpop.eup %8602 }
 0x399   :  { %v485_v23 = vsel %vm264_vm8, %v8603_v22, 0.0 }
 0x39a   :  { %486 = vadd.xlane.f32.xlu0 %v485_v23 }
 0x3a6   :  { %8255 = vrot.lane.b32.xlu1 %v8866_v37, %s10467_s3 }
 0x3aa   :  { %8260 = vrot.lane.b32.xlu1 %v8866_v37, %s10468_s26  ;;  %s10479_s26 = smov 64  }
 0x3ae   :  { %675 = vrot.lane.b32.xlu1 %v8856_v32, %s10464_s27 }
 0x3b0   :  { %8265 = vrot.lane.b32.xlu0 %v8866_v37, %s10466_s28 }
 0x3b2   :  { %677 = vrot.lane.b32.xlu1 %v8858_v35, %s10464_s27 }
 0x41e   :  { %v282_v24 = vpop.xlane.xlu1 %281 }
 0x41f   :  { %8604 = vrcp.f32 %v282_v24 }
 0x422   :  { %v279_v25 = vpop.xlane.xlu1 %278 }
 0x423   :  { %8606 = vrcp.f32 %v279_v25  ;;  %v484_v27 = vpop.xlane.xlu0 %483 }
 0x424   :  { %8608 = vrcp.f32 %v484_v27 }
 0x426   :  { %v8256_v29 = vpop.permute.xlu1 %8255 }
 0x427   :  { %v8258_v30 = vunpack.i.h.bf16 %v8256_v29  ;;  %v8257_v31 = vunpack.i.l.bf16 %v8256_v29  ;;  %v487_v33 = vpop.xlane.xlu0 %486 }
 0x428   :  { %8610 = vrcp.f32 %v487_v33 }
 0x429   :  { %v8151_v34 = vpack.c.bf16 %v8258_v30, %v8257_v31  ;;  %v8605_v40 = vpop.eup %8604 }
 0x42a   :  { %v8261_v36 = vpop.permute.xlu1 %8260  ;;  %v286_v47 = vmul.f32 %v8605_v40, %v8597_v16 }
 0x42b   :  { %v8263_v38 = vunpack.i.h.bf16 %v8261_v36  ;;  %v8262_v39 = vunpack.i.l.bf16 %v8261_v36  ;;  %8152 = vmatprep.subr.bf16.mxu1 %v8151_v34  ;;  %v8266_v45 = vpop.permute.xlu0 %8265 }
 0x42c   :  { %8154 = vmatpush3.bf16.msra.mxu1 %v8151_v34  ;;  %v8268_v51 = vunpack.i.h.bf16 %v8266_v45  ;;  %v8267_v52 = vunpack.i.l.bf16 %v8266_v45 }
 0x42d   :  { %v8607_v41 = vpop.eup %8606  ;;  %v8161_v43 = vpack.c.bf16 %v8263_v38, %v8262_v39 }
 0x42e   :  { %v8609_v44 = vpop.eup %8608  ;;  %v284_v46 = vmul.f32 %v8607_v41, %v8599_v18  ;;  %v8165_v57 = vpack.c.bf16 %v8268_v51, %v8267_v52  ;;  %v676_v63 = vpop.permute.xlu1 %675 }
 0x42f   :  { %8162 = vmatprep.subr.bf16.mxu1 %v8161_v43  ;;  %v489_v48 = vmul.f32 %v8609_v44, %v8601_v19 }
 0x430   :  { %7965 = vmatprep.mubr.msk.f32.mxu1 %vm264_vm8, %v284_v46 }
 0x431   :  { %7966 = vmatmul.mubr.msk.f32.vlgmr.msra.gmra.mrb[2].mxu1 %vm264_vm8, %v286_v47 }
 0x432   :  { %v8611_v54 = vpop.eup %8610  ;;  %8164 = vmatpush3.bf16.msra.mxu1 %v8161_v43  ;;  %7979 = vmatprep.mubr.msk.f32.mxu1 %vm264_vm8, %v489_v48  ;;  %v678_v3 = vpop.permute.xlu1 %677 }
 0x433   :  { %v491_v55 = vmul.f32 %v8611_v54, %v8603_v22  ;;  %7988 = vmatprep.subr.bf16.mxu1 %v8706_v8 }
 0x435   :  { %7980 = vmatmul.mubr.msk.f32.vlgmr.msra.gmra.mrb[4].mxu1 %vm264_vm8, %v491_v55  ;;  %v104_v55 = vld [vmem:[%s10441_s5 + $0x8] sm:$0xf] }
 0x436   :  { %7989 = vmatpush3.bf16.msra.mxu1 %v632_v56  ;;  %7990 = vmatprep.mubr.msk.bf16.mxu1 %vm8707_vm1, %v8706_v8  ;;  %v884_v56 = vsel %vm583_vm9, %v104_v55, 0 }
 0x437   :  { %8167 = vmatprep.subr.msk.bf16.mxu1 %vm8877_vm7, %v8165_v57 }
 0x504   :  { %v7967_v60 = vpop.f32.mrb[2].mxu1 }
 0x505   :  { %v365_v61 = vpop.f32.mrb[3].mxu1 }
 0x506   :  { %v374_v62 = vpack.c.bf16 %v7967_v60, %v365_v61 }
 0x508   :  { %v7981_v0 = vpop.f32.mrb[4].mxu1  ;;  %7991 = vmatmul.mubr.msk.bf16.vlgmr.msra.gmra.mrb[8].mxu1 %vm176_vm6, %v374_v62 }
 0x509   :  { %8170 = vmatpush3.bf16.xpose.msk.msra.mxu1 %vm8877_vm7, %v8165_v57  ;;  %v570_v1 = vpop.f32.mrb[5].mxu1  ;;  %7998 = vmatprep.mubr.msk.f32.mxu1 %vm176_vm6, %v676_v63 }
 0x50a   :  { %v579_v2 = vpack.c.bf16 %v7981_v0, %v570_v1 }
 0x50c   :  { %7985 = vmatmul.mubr.msk.bf16.vlgmr.msra.gmra.mrb[8].mxu0 %vm176_vm6, %v579_v2 }
 0x50d   :  { %8010 = vmatprep.mubr.msk.bf16.mxu0 %vm8707_vm1, %v8706_v8  ;;  %8009 = vmatpush3.bf16.msra.mxu0 %v884_v56 }
 0x510   :  { %7999 = vmatmul.mubr.msk.f32.vlgmr.msra.gmra.mrb[6].mxu1 %vm176_vm6, %v678_v3 }
 0x5db   :  { %v668_v4 = vpop.f32.mrb[8].mxu1 }
 0x5dc   :  { %v7992_v5 = vpop.f32.mrb[9].mxu1 }
 0x5dd   :  { %v671_v6 = vpop.f32.mrb[10].mxu1 }
 0x5de   :  { %v7993_v7 = vpop.f32.mrb[11].mxu1 }
 0x5df   :  { %v621_v9 = vpop.f32.mrb[8].mxu0 }
 0x5e0   :  { %v8953_v10 = vadd.f32 %v668_v4, %v621_v9  ;;  %v7986_v11 = vpop.f32.mrb[9].mxu0 }
 0x5e1   :  { %v624_v12 = vpop.f32.mrb[10].mxu0 }
 0x5e2   :  { %v8955_v13 = vadd.f32 %v671_v6, %v624_v12  ;;  %v7987_v14 = vpop.f32.mrb[11].mxu0 }
 0x5e3   :  { %v8000_v15 = vpop.f32.mrb[6].mxu1 }
 0x5e4   :  { %v767_v16 = vmul.f32 0.35355338, %v8000_v15  ;;  %v757_v17 = vpop.f32.mrb[7].mxu1 }
 0x5e5   :  { %v766_v18 = vmul.f32 0.35355338, %v757_v17 }
 0x5e6   :  { %v769_v19 = vadd.f32 %v767_v16, %v8898_v50 }
 0x5e7   :  { %v768_v20 = vadd.f32 %v766_v18, %v8903_v53 }
 0x5e8   :  { %v773_v21 = vsel %vm264_vm8, %v769_v19, -inf }
 0x5e9   :  { %774 = vmax.xlane.f32.xlu0 %v773_v21  ;;  %v770_v22 = vsel %vm264_vm8, %v768_v20, -inf }
 0x5ea   :  { %771 = vmax.xlane.f32.xlu1 %v770_v22 }
 0x5fb   :  { %8270 = vrot.lane.b32.xlu1 %v8866_v37, %s10463_s24  ;;  %s10480_s24 = smov 80  }
 0x5ff   :  { %8275 = vrot.lane.b32.xlu0 %v8866_v37, %s10460_s25  ;;  %929 = vrot.lane.b32.xlu1 %v8856_v32, %s10461_s29 }
 0x676   :  { %v775_v23 = vpop.xlane.xlu0 %774 }
 0x677   :  { %v777_v24 = vsub.f32 %v769_v19, %v775_v23  ;;  %v772_v25 = vpop.xlane.xlu1 %771 }
 0x678   :  { %v776_v27 = vsub.f32 %v768_v20, %v772_v25 }
 0x679   :  { %v780_v29 = vmul.f32 1.442695, %v777_v24 }
 0x67a   :  { %v778_v30 = vmul.f32 1.442695, %v776_v27  ;;  %v8276_v31 = vpop.permute.xlu0 %8275 }
 0x67b   :  { %8612 = vpow2.f32 %v780_v29  ;;  %v8271_v33 = vpop.permute.xlu1 %8270  ;;  %v8278_v34 = vunpack.i.h.bf16 %v8276_v31  ;;  %v8277_v36 = vunpack.i.l.bf16 %v8276_v31 }
 0x67c   :  { %v8273_v38 = vunpack.i.h.bf16 %v8271_v33  ;;  %v8272_v39 = vunpack.i.l.bf16 %v8271_v33  ;;  %8614 = vpow2.f32 %v778_v30 }
 0x67d   :  { %v8175_v41 = vpack.c.bf16 %v8278_v34, %v8277_v36 }
 0x67e   :  { %v8171_v40 = vpack.c.bf16 %v8273_v38, %v8272_v39  ;;  %v6805_v39 = vld [vmem:[%s10442_s6] ss:$0 sm:$0xff] }
 0x67f   :  { %v930_v46 = vpop.permute.xlu1 %929 }
 0x680   :  { %8172 = vmatprep.subr.bf16.mxu1 %v8171_v40 }
 0x681   :  { %8174 = vmatpush3.bf16.msra.mxu1 %v8171_v40 }
 0x682   :  { %8177 = vmatprep.subr.msk.bf16.mxu1 %vm8877_vm7, %v8175_v41 }
 0x685   :  { %v8613_v32 = vpop.eup %8612 }
 0x686   :  { %v785_v43 = vsel %vm264_vm8, %v8613_v32, 0.0  ;;  %v8615_v44 = vpop.eup %8614 }
 0x687   :  { %786 = vadd.xlane.f32.xlu1 %v785_v43  ;;  %v782_v45 = vsel %vm264_vm8, %v8615_v44, 0.0 }
 0x68b   :  { %783 = vadd.xlane.f32.xlu1 %v782_v45 }
 0x69c   :  { %931 = vrot.lane.b32.xlu1 %v8858_v35, %s10461_s29  ;;  %s10481_s29 = smov 112  }
 0x714   :  { %v787_v47 = vpop.xlane.xlu1 %786 }
 0x715   :  { %8616 = vrcp.f32 %v787_v47 }
 0x718   :  { %v784_v48 = vpop.xlane.xlu1 %783 }
 0x719   :  { %8618 = vrcp.f32 %v784_v48 }
 0x71c   :  { %v932_v35 = vpop.permute.xlu1 %931 }
 0x71f   :  { %v8617_v49 = vpop.eup %8616 }
 0x720   :  { %v791_v54 = vmul.f32 %v8617_v49, %v8613_v32 }
 0x723   :  { %v8619_v51 = vpop.eup %8618 }
 0x724   :  { %v789_v52 = vmul.f32 %v8619_v51, %v8615_v44 }
 0x726   :  { %8005 = vmatprep.mubr.msk.f32.mxu1 %vm264_vm8, %v789_v52 }
 0x727   :  { %8006 = vmatmul.mubr.msk.f32.vlgmr.msra.gmra.mrb[12].mxu1 %vm264_vm8, %v791_v54 }
 0x728   :  { %8180 = vmatpush3.bf16.xpose.msk.msra.mxu1 %vm8877_vm7, %v8175_v41  ;;  %8018 = vmatprep.mubr.msk.f32.mxu1 %vm176_vm6, %v930_v46 }
 0x729   :  { %8028 = vmatprep.subr.bf16.mxu1 %v8706_v8 }
 0x72f   :  { %8019 = vmatmul.mubr.msk.f32.vlgmr.msra.gmra.mrb[14].mxu1 %vm176_vm6, %v932_v35 }
 0x730   :  { %8030 = vmatprep.mubr.msk.bf16.mxu1 %vm8707_vm1, %v8706_v8 }
 0x7fa   :  { %v8007_v57 = vpop.f32.mrb[12].mxu1 }
 0x7fb   :  { %v870_v58 = vpop.f32.mrb[13].mxu1 }
 0x7fc   :  { %v879_v59 = vpack.c.bf16 %v8007_v57, %v870_v58 }
 0x7fe   :  { %8011 = vmatmul.mubr.msk.bf16.vlgmr.msra.gmra.mrb[12].mxu0 %vm176_vm6, %v879_v59 }
 0x802   :  { %v8020_v60 = vpop.f32.mrb[14].mxu1 }
 0x803   :  { %v1021_v61 = vmul.f32 0.35355338, %v8020_v60  ;;  %v1011_v62 = vpop.f32.mrb[15].mxu1 }
 0x804   :  { %v1020_v63 = vmul.f32 0.35355338, %v1011_v62  ;;  %v1241_v62 = vld [vmem:[%s10445_s9 + $0x8] sm:$0xff] }
 0x805   :  { %v1023_v0 = vadd.f32 %v1021_v61, %v8898_v50  ;;  %v1248_v61 = vld [vmem:[%s10445_s9 + $0x40] sm:$0xff] }
 0x806   :  { %v1022_v1 = vadd.f32 %v1020_v63, %v8903_v53 }
 0x807   :  { %v1027_v2 = vsel %vm264_vm8, %v1023_v0, -inf }
 0x808   :  { %1028 = vmax.xlane.f32.xlu1 %v1027_v2  ;;  %v1024_v3 = vsel %vm264_vm8, %v1022_v1, -inf }
 0x809   :  { %1025 = vmax.xlane.f32.xlu0 %v1024_v3 }
 0x819   :  { %8280 = vrot.lane.b32.xlu1 %v8866_v37, %s10459_s22 }
 0x895   :  { %v1029_v4 = vpop.xlane.xlu1 %1028 }
 0x896   :  { %v1031_v5 = vsub.f32 %v1023_v0, %v1029_v4  ;;  %v1026_v6 = vpop.xlane.xlu0 %1025  ;;  %v1249_v0 = vld [vmem:[%s10445_s9 + $0x48] sm:$0xff]  ;;  %v1256_v4 = vld [vmem:[%s10445_s9 + $0x80] sm:$0xff] }
 0x897   :  { %v1030_v7 = vsub.f32 %v1022_v1, %v1026_v6  ;;  %v6810_v2 = vcombine.low %v1241_v62, %v1249_v0  ;;  %v6811_v3 = vcombine.high %v1241_v62, %v1249_v0  ;;  %v1257_v6 = vld [vmem:[%s10445_s9 + $0x88] sm:$0xff]  ;;  %v1246_v62 = vld [vmem:[%s10445_s9 + $0x30] sm:$0xff]  ;;  %v1247_v0 = vld [vmem:[%s10445_s9 + $0x38] sm:$0xff] }
 0x898   :  { %v1034_v9 = vmul.f32 1.442695, %v1031_v5  ;;  %v1264_v5 = vld [vmem:[%s10445_s9 + $0xc0] sm:$0xff] }
 0x899   :  { %v1032_v11 = vmul.f32 1.442695, %v1030_v7  ;;  %v8281_v12 = vpop.permute.xlu1 %8280  ;;  %v6825_v7 = vcombine.high %v1256_v4, %v1264_v5 }
 0x89a   :  { %v8283_v50 = vunpack.i.h.bf16 %v8281_v12  ;;  %v8282_v14 = vunpack.i.l.bf16 %v8281_v12 }
 0x89b   :  { %8620 = vpow2.f32 %v1032_v11  ;;  %v6824_v11 = vcombine.low %v1256_v4, %v1264_v5 }
 0x89c   :  { %v8181_v53 = vpack.c.bf16 %v8283_v50, %v8282_v14  ;;  %8622 = vpow2.f32 %v1034_v9  ;;  %v1265_v9 = vld [vmem:[%s10445_s9 + $0xc8] sm:$0xff]  ;;  %v1242_v14 = vld [vmem:[%s10445_s9 + $0x10] sm:$0xff] }
 0x89d   :  { %v6826_v12 = vcombine.low %v1257_v6, %v1265_v9  ;;  %v6827_v50 = vcombine.high %v1257_v6, %v1265_v9  ;;  %v1262_v6 = vld [vmem:[%s10445_s9 + $0xb0] sm:$0xff]  ;;  %v1263_v9 = vld [vmem:[%s10445_s9 + $0xb8] sm:$0xff] }
 0x89e   :  { %8182 = vmatprep.subr.bf16.mxu0 %v8181_v53 }
 0x89f   :  { %8184 = vmatpush3.bf16.msra.mxu0 %v8181_v53  ;;  %v1250_v53 = vld [vmem:[%s10445_s9 + $0x50] sm:$0xff] }
 0x8a5   :  { %v8621_v15 = vpop.eup %8620 }
 0x8a6   :  { %v1036_v16 = vsel %vm264_vm8, %v8621_v15, 0.0  ;;  %v8623_v17 = vpop.eup %8622 }
 0x8a7   :  { %1037 = vadd.xlane.f32.xlu0 %v1036_v16  ;;  %v1039_v37 = vsel %vm264_vm8, %v8623_v17, 0.0  ;;  %v6813_v16 = vcombine.high %v1242_v14, %v1250_v53 }
 0x8ab   :  { %1040 = vadd.xlane.f32.xlu0 %v1039_v37  ;;  %v8719_v37 = vmov 0  }
 0x8d1   :  { %v920_v18 = vpop.f32.mrb[12].mxu0 }
 0x8d2   :  { %v927_v19 = vadd.f32 %v920_v18, %v8953_v10  ;;  %v8012_v20 = vpop.f32.mrb[13].mxu0  ;;  %v105_v10 = vld [vmem:[%s10441_s5 + $0xc] sm:$0xf]  ;;  %v6812_v18 = vcombine.low %v1242_v14, %v1250_v53 }
 0x8d3   :  { %v923_v21 = vpop.f32.mrb[14].mxu0  ;;  %v1138_v33 = vsel %vm583_vm9, %v105_v10, 0 }
 0x8d4   :  { %v928_v22 = vadd.f32 %v923_v21, %v8955_v13  ;;  %v8013_v23 = vpop.f32.mrb[15].mxu0  ;;  %8029 = vmatpush3.bf16.msra.mxu1 %v1138_v33 }
 0x8d5   :  { %1562 = vmatprep.subr.bf16.mxu1 %v6811_v3 }
 0x934   :  { %v1038_v24 = vpop.xlane.xlu0 %1037 }
 0x935   :  { %8624 = vrcp.f32 %v1038_v24 }
 0x938   :  { %v1041_v25 = vpop.xlane.xlu0 %1040 }
 0x939   :  { %8626 = vrcp.f32 %v1041_v25 }
 0x93f   :  { %v8625_v27 = vpop.eup %8624 }
 0x940   :  { %v1043_v29 = vmul.f32 %v8625_v27, %v8621_v15  ;;  %v1243_v15 = vld [vmem:[%s10445_s9 + $0x18] sm:$0xff] }
 0x942   :  { %8025 = vmatprep.mubr.msk.f32.mxu0 %vm264_vm8, %v1043_v29 }
 0x943   :  { %v8627_v30 = vpop.eup %8626 }
 0x944   :  { %v1045_v31 = vmul.f32 %v8627_v30, %v8623_v17  ;;  %v1251_v17 = vld [vmem:[%s10445_s9 + $0x58] sm:$0xff] }
 0x945   :  { %v6815_v20 = vcombine.high %v1243_v15, %v1251_v17 }
 0x946   :  { %8026 = vmatmul.mubr.msk.f32.vlgmr.msra.gmra.mrb[6].mxu0 %vm264_vm8, %v1045_v31  ;;  %v6806_v31 = vld [vmem:[%s10443_s7] ss:$0 sm:$0xff] }
 0x947   :  { %1551 = vmatprep.mubr.bf16.mxu0 %v8719_v37 }
 0xa19   :  { %v8027_v13 = vpop.f32.mrb[6].mxu0 }
 0xa1a   :  { %v1124_v34 = vpop.f32.mrb[7].mxu0 }
 0xa1b   :  { %v1133_v36 = vpack.c.bf16 %v8027_v13, %v1124_v34  ;;  %v6807_v34 = vld [vmem:[%s10444_s8] ss:$0 sm:$0xff] }
 0xa1d   :  { %8031 = vmatmul.mubr.msk.bf16.vlgmr.msra.gmra.mrb[16].mxu1 %vm176_vm6, %v1133_v36 }
 0xa1e   :  { %1563 = vmatpush1.bf16.msra.mxu1 %v6810_v2  ;;  %1594 = vmatprep.mubr.bf16.mxu1 %v8719_v37 }
 0xa1f   :  { %1564 = vmatprep.subr.bf16.mxu1 %v6827_v50 }
 0xa22   :  { %1565 = vmatpush1.bf16.msra.mxu1 %v6826_v12 }
 0xa23   :  { %1648 = vmatprep.subr.bf16.mxu1 %v6815_v20  ;;  %v8329_v20 = vld [vmem:[%s10447_s11 + $0x80] sm:$0xff]  }
 0xaf0   :  { %v1174_v38 = vpop.f32.mrb[16].mxu1 }
 0xaf1   :  { %v1181_v40 = vadd.f32 %v1174_v38, %v927_v19  ;;  %v8032_v41 = vpop.f32.mrb[17].mxu1  ;;  %v6814_v19 = vcombine.low %v1243_v15, %v1251_v17  ;;  %v1258_v38 = vld [vmem:[%s10445_s9 + $0x90] sm:$0xff]  ;;  %v8326_v17 = vld [vmem:[%s10447_s11 + $0x40] sm:$0xff]  }
 0xaf2   :  { %v1177_v32 = vpop.f32.mrb[18].mxu1  ;;  %v1267_v41 = vld [vmem:[%s10445_s9 + $0xd8] sm:$0xff] }
 0xaf3   :  { %v1190_v43 = vadd.f32 %v6805_v39, %v1181_v40  ;;  %v1182_v44 = vadd.f32 %v1177_v32, %v928_v22  ;;  %v8033_v45 = vpop.f32.mrb[19].mxu1  ;;  %v1259_v40 = vld [vmem:[%s10445_s9 + $0x98] sm:$0xff] }
 0xaf5   :  { %v1191_v46 = vadd.f32 %v6805_v39, %v1182_v44  ;;  %v1192_v47 = vadd.f32 %v1190_v43, %v8843_v26  ;;  %v1266_v39 = vld [vmem:[%s10445_s9 + $0xd0] sm:$0xff] }
 0xaf6   :  { %v6829_v45 = vcombine.high %v1258_v38, %v1266_v39 }
 0xaf7   :  { %v1196_v48 = vsel %vm71_vm0, %v1192_v47, 0.0  ;;  %v1193_v49 = vadd.f32 %v1191_v46, %v8848_v28  ;;  %v1240_v28 = vld [vmem:[%s10445_s9] sm:$0xff]  ;;  %v6831_v46 = vcombine.high %v1259_v40, %v1267_v41 }
 0xaf8   :  { %1197 = vadd.xlane.f32.xlu0 %v1196_v48  ;;  %v6809_v63 = vcombine.high %v1240_v28, %v1248_v61  ;;  %v6808_v1 = vcombine.low %v1240_v28, %v1248_v61  ;;  %v1252_v48 = vld [vmem:[%s10445_s9 + $0x60] sm:$0xff] }
 0xaf9   :  { %v1199_v51 = vsel %vm71_vm0, %v1193_v49, 0.0 }
 0xafa   :  { %1519 = vmatprep.subr.bf16.mxu0 %v6809_v63  ;;  %v1254_v63 = vld [vmem:[%s10445_s9 + $0x70] sm:$0xff] }
 0xafb   :  { %1520 = vmatpush1.bf16.msra.mxu0 %v6808_v1  ;;  %v1255_v1 = vld [vmem:[%s10445_s9 + $0x78] sm:$0xff]  ;;  %v6821_v4 = vcombine.high %v1246_v62, %v1254_v63  ;;  %v6820_v12 = vcombine.low %v1246_v62, %v1254_v63 }
 0xafc   :  { %1200 = vadd.xlane.f32.xlu0 %v1199_v51  ;;  %1521 = vmatprep.subr.bf16.mxu0 %v6825_v7  ;;  %v1253_v51 = vld [vmem:[%s10445_s9 + $0x68] sm:$0xff]  ;;  %v6823_v5 = vcombine.high %v1247_v0, %v1255_v1  ;;  %v1270_v7 = vld [vmem:[%s10445_s9 + $0xf0] sm:$0xff]  ;;  %v6822_v50 = vcombine.low %v1247_v0, %v1255_v1 }
 0xafd   :  { %v6837_v14 = vcombine.high %v1262_v6, %v1270_v7  ;;  %v6836_v15 = vcombine.low %v1262_v6, %v1270_v7 }
 0xaff   :  { %1522 = vmatpush1.bf16.msra.mxu0 %v6824_v11  ;;  %v1271_v11 = vld [vmem:[%s10445_s9 + $0xf8] sm:$0xff] }
 0xb00   :  { %1605 = vmatprep.subr.bf16.mxu0 %v6813_v16  ;;  %v6839_v53 = vcombine.high %v1263_v9, %v1271_v11  ;;  %v6838_v16 = vcombine.low %v1263_v9, %v1271_v11 }
 0xb85   :  { %v1198_v52 = vpop.xlane.xlu0 %1197 }
 0xb86   :  { %v1203_v54 = vmul.f32 0.03125, %v1198_v52  ;;  %v6828_v52 = vcombine.low %v1258_v38, %v1266_v39  ;;  %v8344_v38 = vld [vmem:[%s10447_s11 + $0x20] sm:$0xff]  }
 0xb87   :  { %v8345_v39 = vld [vmem:[%s10447_s11 + $0xa0] sm:$0xff]  }
 0xb88   :  { %v1205_v35 = vsub.f32 %v1192_v47, %v1203_v54  ;;  %v1244_v47 = vld [vmem:[%s10445_s9 + $0x20] sm:$0xff]  ;;  %v6830_v54 = vcombine.low %v1259_v40, %v1267_v41  ;;  %v8346_v40 = vld [vmem:[%s10447_s11 + $0x68] sm:$0xff]  }
 0xb89   :  { %v1201_v55 = vpop.xlane.xlu0 %1200  ;;  %v8347_v41 = vld [vmem:[%s10447_s11 + $0xe8] sm:$0xff]  }
 0xb8a   :  { %v1204_v56 = vmul.f32 0.03125, %v1201_v55  ;;  %v1207_v57 = vmul.f32 %v1205_v35, %v1205_v35 }
 0xb8c   :  { %v1206_v58 = vsub.f32 %v1193_v49, %v1204_v56  ;;  %v1209_v59 = vsel %vm71_vm0, %v1207_v57, 0.0  ;;  %v1245_v49 = vld [vmem:[%s10445_s9 + $0x28] sm:$0xff]  ;;  %v1260_v56 = vld [vmem:[%s10445_s9 + $0xa0] sm:$0xff] }
 0xb8d   :  { %1210 = vadd.xlane.f32.xlu0 %v1209_v59  ;;  %v6819_v55 = vcombine.high %v1245_v49, %v1253_v51  ;;  %v1268_v57 = vld [vmem:[%s10445_s9 + $0xe0] sm:$0xff]  ;;  %v1269_v59 = vld [vmem:[%s10445_s9 + $0xe8] sm:$0xff] }
 0xb8e   :  { %v1208_v60 = vmul.f32 %v1206_v58, %v1206_v58  ;;  %v6833_v28 = vcombine.high %v1260_v56, %v1268_v57  ;;  %v6832_v2 = vcombine.low %v1260_v56, %v1268_v57  ;;  %v8359_v56 = vld [vmem:[%s10447_s11 + $0x1c0] sm:$0xff]   ;;  %v1276_v57 = vlaneseq }
 0xb90   :  { %v1212_v26 = vsel %vm71_vm0, %v1208_v60, 0.0  ;;  %v6816_v60 = vcombine.low %v1244_v47, %v1252_v48 }
 0xb91   :  { %1213 = vadd.xlane.f32.xlu0 %v1212_v26  ;;  %v6818_v26 = vcombine.low %v1245_v49, %v1253_v51  ;;  %v8353_v49 = vld [vmem:[%s10447_s11 + $0xb0] sm:$0xff]   ;;  %v8354_v51 = vld [vmem:[%s10447_s11 + $0x78] sm:$0xff]  }
 0xc1a   :  { %v1211_v21 = vpop.xlane.xlu0 %1210 }
 0xc1b   :  { %v1215_v22 = vmul.f32 0.03125, %v1211_v21  ;;  %v8330_v21 = vld [vmem:[%s10447_s11 + $0x48] sm:$0xff]  }
 0xc1d   :  { %v1217_v23 = vadd.f32 1e-05, %v1215_v22  ;;  %v8331_v22 = vld [vmem:[%s10447_s11 + $0xc8] sm:$0xff]  }
 0xc1e   :  { %v1214_v24 = vpop.xlane.xlu0 %1213 }
 0xc1f   :  { %8628 = vrsqrt.f32 %v1217_v23  ;;  %v1216_v25 = vmul.f32 0.03125, %v1214_v24  ;;  %v8332_v23 = vld [vmem:[%s10447_s11 + $0x8] sm:$0xff]  }
 0xc20   :  { %v8333_v24 = vld [vmem:[%s10447_s11 + $0x88] sm:$0xff]  }
 0xc21   :  { %v1218_v27 = vadd.f32 1e-05, %v1216_v25  ;;  %v8334_v25 = vld [vmem:[%s10447_s11 + $0x50] sm:$0xff]  }
 0xc23   :  { %8630 = vrsqrt.f32 %v1218_v27  ;;  %v8335_v27 = vld [vmem:[%s10447_s11 + $0xd0] sm:$0xff]  }
 0xc29   :  { %v8629_v29 = vpop.eup %8628 }
 0xc2a   :  { %v1221_v30 = vmul.f32 %v8629_v29, %v1205_v35  ;;  %v6817_v35 = vcombine.high %v1244_v47, %v1252_v48  ;;  %v8336_v29 = vld [vmem:[%s10447_s11 + $0x10] sm:$0xff]  }
 0xc2b   :  { %v8351_v47 = vld [vmem:[%s10447_s11 + $0xf0] sm:$0xff]  }
 0xc2c   :  { %v1229_v33 = vmul.f32 %v6806_v31, %v1221_v30  ;;  %v8337_v30 = vld [vmem:[%s10447_s11 + $0x90] sm:$0xff]  }
 0xc2d   :  { %v8631_v10 = vpop.eup %8630  ;;  %v8352_v48 = vld [vmem:[%s10447_s11 + $0x30] sm:$0xff]  }
 0xc2e   :  { %v1222_v13 = vmul.f32 %v8631_v10, %v1206_v58  ;;  %v9069_v32 = vadd.f32 %v6807_v34, %v1229_v33  ;;  %v1261_v58 = vld [vmem:[%s10445_s9 + $0xa8] sm:$0xff]  ;;  %v8339_v10 = vld [vmem:[%s10447_s11 + $0xd8] sm:$0xff]  }
 0xc2f   :  { %v6835_v61 = vcombine.high %v1261_v58, %v1269_v59  ;;  %v6834_v3 = vcombine.low %v1261_v58, %v1269_v59  ;;  %v8340_v33 = vld [vmem:[%s10447_s11 + $0x18] sm:$0xff]   ;;  %v1277_v58 = vshrl.u32 %v1276_v57, 7 }
 0xc30   :  { %v1230_v36 = vmul.f32 %v6806_v31, %v1222_v13  ;;  %v8338_v31 = vld [vmem:[%s10447_s11 + $0x58] sm:$0xff]  }
 0xc31   :  { %v8341_v13 = vld [vmem:[%s10447_s11 + $0x98] sm:$0xff]   ;;  %v9249_v59 = vsub.s32 0, %v1277_v58  ;;  %v9268_v6 = vsub.s32 5, %v1277_v58  ;;  %v9270_v7 = vsub.s32 7, %v1277_v58 }
 0xc32   :  { %v9071_v43 = vadd.f32 %v6807_v34, %v1230_v36  ;;  %v8342_v34 = vld [vmem:[%s10447_s11 + $0x60] sm:$0xff]  }
 0xc33   :  { %v8343_v36 = vld [vmem:[%s10447_s11 + $0xe0] sm:$0xff]  }
 0xc34   :  { %v9075_v44 = vpack.c.bf16 %v9071_v43, %v9069_v32 }
 0xc36   :  { %6840 = vmatmul.mubr.msk.bf16.vlgmr.msra.gmra.mrb[16].mxu0 %vm71_vm0, %v9075_v44  ;;  %6841 = vmatmul.mubr.msk.bf16.vlgmr.msra.gmra.mrb[20].mxu1 %vm71_vm0, %v9075_v44 }
 0xc37   :  { %1606 = vmatpush1.bf16.msra.mxu0 %v6812_v18  ;;  %1649 = vmatpush1.bf16.msra.mxu1 %v6814_v19  ;;  %v8327_v18 = vld [vmem:[%s10447_s11 + $0xc0] sm:$0xff]  }
 0xc38   :  { %1607 = vmatprep.subr.bf16.mxu0 %v6829_v45  ;;  %1650 = vmatprep.subr.bf16.mxu1 %v6831_v46  ;;  %v8328_v19 = vld [vmem:[%s10447_s11] sm:$0xff]   ;;  %v8349_v45 = vld [vmem:[%s10447_s11 + $0xa8] sm:$0xff]   ;;  %v8350_v46 = vld [vmem:[%s10447_s11 + $0x70] sm:$0xff]  }
 0xc39   :  { %1637 = vmatprep.mubr.bf16.mxu0 %v8719_v37  ;;  %1680 = vmatprep.mubr.bf16.mxu1 %v8719_v37 }
 0xc3b   :  { %1608 = vmatpush1.bf16.msra.mxu0 %v6828_v52  ;;  %1651 = vmatpush1.bf16.msra.mxu1 %v6830_v54  ;;  %v8355_v52 = vld [vmem:[%s10447_s11 + $0xf8] sm:$0xff]  }
 0xc3c   :  { %1691 = vmatprep.subr.bf16.mxu0 %v6817_v35  ;;  %1734 = vmatprep.subr.bf16.mxu1 %v6819_v55  ;;  %v8356_v54 = vld [vmem:[%s10447_s11 + $0x38] sm:$0xff]   ;;  %v8358_v55 = vld [vmem:[%s10447_s11 + $0x140] sm:$0xff]  }
 0xc3d   :  { %v8357_v35 = vld [vmem:[%s10447_s11 + $0xb8] sm:$0xff]  }
 0xc3e   :  { %6842 = vmatmul.mubr.msk.bf16.vlgmr.msra.gmra.mrb[20].mxu0 %vm71_vm0, %v9075_v44  ;;  %6843 = vmatmul.mubr.msk.bf16.vlgmr.msra.gmra.mrb[24].mxu1 %vm71_vm0, %v9075_v44 }
 0xc3f   :  { %1692 = vmatpush1.bf16.msra.mxu0 %v6816_v60  ;;  %1735 = vmatpush1.bf16.msra.mxu1 %v6818_v26  ;;  %v9251_v60 = vsub.s32 2, %v1277_v58  ;;  %v1272_v26 = vld [vmem:[%s10446_s10] sm:$0xff] }
 0xc40   :  { %1693 = vmatprep.subr.bf16.mxu0 %v6833_v28  ;;  %1736 = vmatprep.subr.bf16.mxu1 %v6835_v61  ;;  %v9256_v28 = vsub.s32 1, %v1277_v58  ;;  %v9258_v61 = vsub.s32 3, %v1277_v58  ;;  %v1279_v62 = vrot.slane %v1272_v26, %v9249_v59 }
 0xc41   :  { %1723 = vmatprep.mubr.bf16.mxu0 %v8719_v37  ;;  %1766 = vmatprep.mubr.bf16.mxu1 %v8719_v37  ;;  %v1287_v63 = vrot.slane %v1272_v26, %v9251_v60 }
 0xc42   :  { %v1283_v0 = vrot.slane %v1272_v26, %v9256_v28  ;;  %v1291_v1 = vrot.slane %v1272_v26, %v9258_v61 }
 0xc43   :  { %1694 = vmatpush1.bf16.msra.mxu0 %v6832_v2  ;;  %1737 = vmatpush1.bf16.msra.mxu1 %v6834_v3  ;;  %v9264_v2 = vsub.s32 4, %v1277_v58  ;;  %v9266_v3 = vsub.s32 6, %v1277_v58 }
 0xc44   :  { %1777 = vmatprep.subr.bf16.mxu0 %v6821_v4  ;;  %1820 = vmatprep.subr.bf16.mxu1 %v6823_v5 }
 0xc46   :  { %6844 = vmatmul.mubr.msk.bf16.vlgmr.msra.gmra.mrb[24].mxu0 %vm71_vm0, %v9075_v44  ;;  %6845 = vmatmul.mubr.msk.bf16.vlgmr.msra.gmra.mrb[28].mxu1 %vm71_vm0, %v9075_v44 }
 0xc47   :  { %1778 = vmatpush1.bf16.msra.mxu0 %v6820_v12  ;;  %1821 = vmatpush1.bf16.msra.mxu1 %v6822_v50 }
 0xc48   :  { %1779 = vmatprep.subr.bf16.mxu0 %v6837_v14  ;;  %1822 = vmatprep.subr.bf16.mxu1 %v6839_v53 }
 0xc49   :  { %1809 = vmatprep.mubr.bf16.mxu0 %v8719_v37  ;;  %1852 = vmatprep.mubr.bf16.mxu1 %v8719_v37 }
 0xc4b   :  { %1780 = vmatpush1.bf16.msra.mxu0 %v6836_v15  ;;  %1823 = vmatpush1.bf16.msra.mxu1 %v6838_v16 }
 0xc4c   :  { %7542 = vmatprep.subr.bf16.mxu0 %v8326_v17  ;;  %7564 = vmatprep.subr.bf16.mxu1 %v8327_v18 }
 0xc4e   :  { %6846 = vmatmul.mubr.msk.bf16.vlgmr.msra.gmra.mrb[28].mxu0 %vm71_vm0, %v9075_v44  ;;  %6847 = vmatmul.mubr.msk.bf16.vlgmr.msra.gmra.mrb[32].mxu1 %vm71_vm0, %v9075_v44  ;;  %v8348_v44 = vld [vmem:[%s10447_s11 + $0x28] sm:$0xff]  }
 0xc4f   :  { %7543 = vmatpush3.bf16.msra.mxu0 %v8328_v19  ;;  %7565 = vmatpush3.bf16.msra.mxu1 %v8329_v20 }
 0xc50   :  { %7544 = vmatprep.subr.bf16.mxu0 %v8330_v21  ;;  %7566 = vmatprep.subr.bf16.mxu1 %v8331_v22  ;;  %v1295_v21 = vrot.slane %v1272_v26, %v9264_v2  ;;  %v1303_v22 = vrot.slane %v1272_v26, %v9266_v3 }
 0xc53   :  { %7545 = vmatpush3.bf16.msra.mxu0 %v8332_v23  ;;  %7567 = vmatpush3.bf16.msra.mxu1 %v8333_v24 }
 0xc54   :  { %7546 = vmatprep.subr.bf16.mxu0 %v8334_v25  ;;  %7568 = vmatprep.subr.bf16.mxu1 %v8335_v27  ;;  %v1299_v25 = vrot.slane %v1272_v26, %v9268_v6  ;;  %v1307_v27 = vrot.slane %v1272_v26, %v9270_v7 }
 0xc57   :  { %7547 = vmatpush3.bf16.msra.mxu0 %v8336_v29  ;;  %7569 = vmatpush3.bf16.msra.mxu1 %v8337_v30 }
 0xc58   :  { %7548 = vmatprep.subr.bf16.mxu0 %v8338_v31  ;;  %7570 = vmatprep.subr.bf16.mxu1 %v8339_v10 }
 0xc5b   :  { %7549 = vmatpush3.bf16.msra.mxu0 %v8340_v33  ;;  %7571 = vmatpush3.bf16.msra.mxu1 %v8341_v13 }
 0xc5c   :  { %7550 = vmatprep.subr.bf16.mxu0 %v8342_v34  ;;  %7572 = vmatprep.subr.bf16.mxu1 %v8343_v36 }
 0xc5f   :  { %7551 = vmatpush3.bf16.msra.mxu0 %v8344_v38  ;;  %7573 = vmatpush3.bf16.msra.mxu1 %v8345_v39  ;;  %v9279_v38 = vld [vmem:[%s10446_s10 + $0x8] sm:$0xff] }
 0xc60   :  { %7552 = vmatprep.subr.bf16.mxu0 %v8346_v40  ;;  %7574 = vmatprep.subr.bf16.mxu1 %v8347_v41 }
 0xc63   :  { %7553 = vmatpush3.bf16.msra.mxu0 %v8348_v44  ;;  %7575 = vmatpush3.bf16.msra.mxu1 %v8349_v45 }
 0xc64   :  { %7554 = vmatprep.subr.bf16.mxu0 %v8350_v46  ;;  %7576 = vmatprep.subr.bf16.mxu1 %v8351_v47  ;;  %v8360_v47 = vld [vmem:[%s10447_s11 + $0x100] sm:$0xff]  }
 0xc67   :  { %7555 = vmatpush3.bf16.msra.mxu0 %v8352_v48  ;;  %7577 = vmatpush3.bf16.msra.mxu1 %v8353_v49  ;;  %v8361_v48 = vld [vmem:[%s10447_s11 + $0x180] sm:$0xff]  }
 0xc68   :  { %7556 = vmatprep.subr.bf16.mxu0 %v8354_v51  ;;  %7578 = vmatprep.subr.bf16.mxu1 %v8355_v52 }
 0xc6b   :  { %7557 = vmatpush3.bf16.msra.mxu0 %v8356_v54  ;;  %7579 = vmatpush3.bf16.msra.mxu1 %v8357_v35  ;;  %v8362_v35 = vld [vmem:[%s10447_s11 + $0x148] sm:$0xff]  }
 0xc6c   :  { %7586 = vmatprep.subr.bf16.mxu0 %v8358_v55  ;;  %7608 = vmatprep.subr.bf16.mxu1 %v8359_v56  ;;  %v8363_v55 = vld [vmem:[%s10447_s11 + $0x1c8] sm:$0xff]   ;;  %v1311_v56 = vrot.slane %v9279_v38, %v9249_v59 }
 0xd09   :  { %v1553_v4 = vpop.f32.mrb[16].mxu0  ;;  %v1596_v5 = vpop.f32.mrb[20].mxu1 }
 0xd0a   :  { %v1554_v9 = vadd.f32 %v1553_v4, %v1279_v62  ;;  %v1597_v11 = vadd.f32 %v1596_v5, %v1287_v63  ;;  %v1555_v12 = vpop.f32.mrb[17].mxu0  ;;  %v1598_v50 = vpop.f32.mrb[21].mxu1 }
 0xd0b   :  { %v1556_v14 = vadd.f32 %v1555_v12, %v1283_v0  ;;  %v1599_v53 = vadd.f32 %v1598_v50, %v1291_v1  ;;  %v1557_v15 = vpop.f32.mrb[18].mxu0  ;;  %v1600_v16 = vpop.f32.mrb[22].mxu1  ;;  %v8364_v50 = vld [vmem:[%s10447_s11 + $0x108] sm:$0xff]  }
 0xd0c   :  { %v1558_v17 = vadd.f32 %v1557_v15, %v1279_v62  ;;  %v1601_v18 = vadd.f32 %v1600_v16, %v1287_v63  ;;  %v1559_v19 = vpop.f32.mrb[19].mxu0  ;;  %v1602_v20 = vpop.f32.mrb[23].mxu1  ;;  %v1863_v29 = vmax.f32 %v1554_v9, 0.0  ;;  %v1865_v30 = vmax.f32 %v1597_v11, 0.0 }
 0xd0d   :  { %v1560_v23 = vadd.f32 %v1559_v19, %v1283_v0  ;;  %v1603_v24 = vadd.f32 %v1602_v20, %v1291_v1  ;;  %v1864_v33 = vmax.f32 %v1556_v14, 0.0  ;;  %v1866_v13 = vmax.f32 %v1599_v53, 0.0  ;;  %v8365_v14 = vld [vmem:[%s10447_s11 + $0x188] sm:$0xff]   ;;  %v8366_v19 = vld [vmem:[%s10447_s11 + $0x150] sm:$0xff]  }
 0xd0e   :  { %v1879_v31 = vmax.f32 %v1558_v17, 0.0  ;;  %v1881_v10 = vmax.f32 %v1601_v18, 0.0  ;;  %v1319_v63 = vrot.slane %v9279_v38, %v9251_v60  ;;  %v1315_v9 = vrot.slane %v9279_v38, %v9256_v28  ;;  %v8367_v20 = vld [vmem:[%s10447_s11 + $0x1d0] sm:$0xff]  }
 0xd0f   :  { %v1880_v34 = vmax.f32 %v1560_v23, 0.0  ;;  %v1882_v36 = vmax.f32 %v1603_v24, 0.0  ;;  %v1323_v53 = vrot.slane %v9279_v38, %v9258_v61 }
 0xd10   :  { %v1895_v39 = vpack.c.bf16 %v1879_v31, %v1863_v29  ;;  %v1897_v40 = vpack.c.bf16 %v1881_v10, %v1865_v30 }
 0xd11   :  { %v1896_v41 = vpack.c.bf16 %v1880_v34, %v1864_v33  ;;  %v1898_v44 = vpack.c.bf16 %v1882_v36, %v1866_v13  ;;  %v1639_v45 = vpop.f32.mrb[20].mxu0  ;;  %v1682_v46 = vpop.f32.mrb[24].mxu1  ;;  %v8368_v33 = vld [vmem:[%s10447_s11 + $0x110] sm:$0xff]  }
 0xd12   :  { %v1640_v49 = vadd.f32 %v1639_v45, %v1295_v21  ;;  %v1683_v51 = vadd.f32 %v1682_v46, %v1303_v22  ;;  %v1641_v52 = vpop.f32.mrb[21].mxu0  ;;  %v1684_v54 = vpop.f32.mrb[25].mxu1  ;;  %v8369_v13 = vld [vmem:[%s10447_s11 + $0x190] sm:$0xff]  }
 0xd13   :  { %v1642_v57 = vadd.f32 %v1641_v52, %v1299_v25  ;;  %v1685_v58 = vadd.f32 %v1684_v54, %v1307_v27  ;;  %v1643_v26 = vpop.f32.mrb[22].mxu0  ;;  %v1686_v62 = vpop.f32.mrb[26].mxu1  ;;  %2974 = vmatprep.mubr.bf16.mxu0 %v1896_v41  ;;  %3015 = vmatprep.mubr.bf16.mxu1 %v1898_v44  ;;  %v8370_v41 = vld [vmem:[%s10447_s11 + $0x158] sm:$0xff]  }
 0xd14   :  { %v1644_v0 = vadd.f32 %v1643_v26, %v1295_v21  ;;  %v1687_v1 = vadd.f32 %v1686_v62, %v1303_v22  ;;  %v1645_v4 = vpop.f32.mrb[23].mxu0  ;;  %v1688_v5 = vpop.f32.mrb[27].mxu1  ;;  %2975 = vmatmul.mubr.bf16.vlgmr.msra.gmra.mrb[32].mxu0 %v1895_v39  ;;  %3016 = vmatmul.mubr.bf16.vlgmr.msra.gmra.mrb[36].mxu1 %v1897_v40  ;;  %v1867_v15 = vmax.f32 %v1640_v49, 0.0  ;;  %v1869_v16 = vmax.f32 %v1683_v51, 0.0  ;;  %v8371_v44 = vld [vmem:[%s10447_s11 + $0x1d8] sm:$0xff]  }
 0xd15   :  { %v1646_v11 = vadd.f32 %v1645_v4, %v1299_v25  ;;  %v1689_v12 = vadd.f32 %v1688_v5, %v1307_v27  ;;  %7587 = vmatpush3.bf16.msra.mxu0 %v8360_v47  ;;  %7609 = vmatpush3.bf16.msra.mxu1 %v8361_v48  ;;  %v1868_v21 = vmax.f32 %v1642_v57, 0.0  ;;  %v1870_v22 = vmax.f32 %v1685_v58, 0.0  ;;  %v8372_v62 = vld [vmem:[%s10447_s11 + $0x118] sm:$0xff]  }
 0xd16   :  { %v1883_v17 = vmax.f32 %v1644_v0, 0.0  ;;  %v1885_v18 = vmax.f32 %v1687_v1, 0.0  ;;  %7588 = vmatprep.subr.bf16.mxu0 %v8362_v35  ;;  %7610 = vmatprep.subr.bf16.mxu1 %v8363_v55  ;;  %v1327_v49 = vrot.slane %v9279_v38, %v9264_v2  ;;  %v1335_v55 = vrot.slane %v9279_v38, %v9266_v3 }
 0xd17   :  { %v1884_v23 = vmax.f32 %v1646_v11, 0.0  ;;  %v1886_v24 = vmax.f32 %v1689_v12, 0.0  ;;  %v1331_v57 = vrot.slane %v9279_v38, %v9268_v6  ;;  %v8375_v11 = vld [vmem:[%s10447_s11 + $0x1e0] sm:$0xff]  }
 0xd18   :  { %v9313_v25 = vpack.c.bf16 %v1883_v17, %v1867_v15  ;;  %v9315_v27 = vpack.c.bf16 %v1885_v18, %v1869_v16 }
 0xd19   :  { %v1900_v29 = vpack.c.bf16 %v1884_v23, %v1868_v21  ;;  %v1902_v30 = vpack.c.bf16 %v1886_v24, %v1870_v22  ;;  %7589 = vmatpush3.bf16.msra.mxu0 %v8364_v50  ;;  %7611 = vmatpush3.bf16.msra.mxu1 %v8365_v14  ;;  %v1725_v31 = vpop.f32.mrb[24].mxu0  ;;  %v1768_v10 = vpop.f32.mrb[28].mxu1  ;;  %v8377_v21 = vld [vmem:[%s10447_s11 + $0x1a0] sm:$0xff]  }
 0xd1a   :  { %v1726_v34 = vadd.f32 %v1725_v31, %v1311_v56  ;;  %v1769_v36 = vadd.f32 %v1768_v10, %v1319_v63  ;;  %v1727_v39 = vpop.f32.mrb[25].mxu0  ;;  %v1770_v40 = vpop.f32.mrb[29].mxu1  ;;  %7590 = vmatprep.subr.bf16.mxu0 %v8366_v19  ;;  %7612 = vmatprep.subr.bf16.mxu1 %v8367_v20  ;;  %v8376_v20 = vld [vmem:[%s10447_s11 + $0x120] sm:$0xff]   ;;  %v8379_v31 = vld [vmem:[%s10447_s11 + $0x1e8] sm:$0xff]  }
 0xd1b   :  { %v1728_v45 = vadd.f32 %v1727_v39, %v1315_v9  ;;  %v1771_v46 = vadd.f32 %v1770_v40, %v1323_v53  ;;  %v1729_v47 = vpop.f32.mrb[26].mxu0  ;;  %v1772_v48 = vpop.f32.mrb[30].mxu1  ;;  %3056 = vmatprep.mubr.bf16.mxu0 %v1900_v29  ;;  %3097 = vmatprep.mubr.bf16.mxu1 %v1902_v30  ;;  %v8378_v30 = vld [vmem:[%s10447_s11 + $0x168] sm:$0xff]  }
 0xd1c   :  { %v1730_v51 = vadd.f32 %v1729_v47, %v1311_v56  ;;  %v1773_v52 = vadd.f32 %v1772_v48, %v1319_v63  ;;  %v1731_v54 = vpop.f32.mrb[27].mxu0  ;;  %v1774_v35 = vpop.f32.mrb[31].mxu1  ;;  %v8373_v56 = vld [vmem:[%s10447_s11 + $0x198] sm:$0xff]   ;;  %v1339_v63 = vrot.slane %v9279_v38, %v9270_v7  ;;  %v1871_v0 = vmax.f32 %v1726_v34, 0.0  ;;  %v8381_v47 = vld [vmem:[%s10447_s11 + $0x1a8] sm:$0xff]  }
 0xd1d   :  { %v1732_v58 = vadd.f32 %v1731_v54, %v1315_v9  ;;  %v1775_v26 = vadd.f32 %v1774_v35, %v1323_v53  ;;  %7591 = vmatpush3.bf16.msra.mxu0 %v8368_v33  ;;  %7613 = vmatpush3.bf16.msra.mxu1 %v8369_v13  ;;  %v1873_v1 = vmax.f32 %v1769_v36, 0.0  ;;  %v8374_v9 = vld [vmem:[%s10447_s11 + $0x160] sm:$0xff]   ;;  %v1872_v12 = vmax.f32 %v1728_v45, 0.0  ;;  %v8383_v35 = vld [vmem:[%s10447_s11 + $0x1f0] sm:$0xff]  }
 0xd1e   :  { %v1887_v4 = vmax.f32 %v1730_v51, 0.0  ;;  %v1889_v5 = vmax.f32 %v1773_v52, 0.0  ;;  %7592 = vmatprep.subr.bf16.mxu0 %v8370_v41  ;;  %7614 = vmatprep.subr.bf16.mxu1 %v8371_v44  ;;  %v1874_v50 = vmax.f32 %v1771_v46, 0.0  ;;  %v8380_v46 = vld [vmem:[%s10447_s11 + $0x128] sm:$0xff]  }
 0xd1f   :  { %v1888_v14 = vmax.f32 %v1732_v58, 0.0  ;;  %v1890_v53 = vmax.f32 %v1775_v26, 0.0 }
 0xd20   :  { %v9349_v15 = vpack.c.bf16 %v1887_v4, %v1871_v0  ;;  %v9351_v38 = vpack.c.bf16 %v1889_v5, %v1873_v1  ;;  %v8384_v1 = vld [vmem:[%s10447_s11 + $0x130] sm:$0xff]   ;;  %v8386_v5 = vld [vmem:[%s10447_s11 + $0x178] sm:$0xff]  }
 0xd21   :  { %v9353_v16 = vpack.c.bf16 %v1888_v14, %v1872_v12  ;;  %v9355_v17 = vpack.c.bf16 %v1890_v53, %v1874_v50  ;;  %7593 = vmatpush3.bf16.msra.mxu0 %v8372_v62  ;;  %7615 = vmatpush3.bf16.msra.mxu1 %v8373_v56  ;;  %v1811_v18 = vpop.f32.mrb[28].mxu0  ;;  %v1854_v19 = vpop.f32.mrb[32].mxu1  ;;  %v8385_v4 = vld [vmem:[%s10447_s11 + $0x1b0] sm:$0xff]   ;;  %v8389_v12 = vld [vmem:[%s10447_s11 + $0x1b8] sm:$0xff]   ;;  %v8390_v50 = vld [vmem:[%s10447_s11 + $0x240] sm:$0xff]  }
 0xd22   :  { %v1812_v22 = vadd.f32 %v1811_v18, %v1327_v49  ;;  %v1855_v23 = vadd.f32 %v1854_v19, %v1335_v55  ;;  %v1813_v24 = vpop.f32.mrb[29].mxu0  ;;  %v1856_v29 = vpop.f32.mrb[33].mxu1  ;;  %7594 = vmatprep.subr.bf16.mxu0 %v8374_v9  ;;  %7616 = vmatprep.subr.bf16.mxu1 %v8375_v11  ;;  %v8387_v9 = vld [vmem:[%s10447_s11 + $0x1f8] sm:$0xff]   ;;  %v8391_v14 = vld [vmem:[%s10447_s11 + $0x2c0] sm:$0xff]   ;;  %v8394_v19 = vld [vmem:[%s10447_s11 + $0x248] sm:$0xff]  }
 0xd23   :  { %v1814_v10 = vadd.f32 %v1813_v24, %v1331_v57  ;;  %v1857_v33 = vadd.f32 %v1856_v29, %v1339_v63  ;;  %v1815_v13 = vpop.f32.mrb[30].mxu0  ;;  %v1858_v34 = vpop.f32.mrb[34].mxu1  ;;  %v8388_v11 = vld [vmem:[%s10447_s11 + $0x138] sm:$0xff]   ;;  %v8392_v53 = vld [vmem:[%s10447_s11 + $0x200] sm:$0xff]  }
 0xd24   :  { %v1816_v36 = vadd.f32 %v1815_v13, %v1327_v49  ;;  %v1859_v39 = vadd.f32 %v1858_v34, %v1335_v55  ;;  %v1817_v40 = vpop.f32.mrb[31].mxu0  ;;  %v1860_v41 = vpop.f32.mrb[35].mxu1  ;;  %v1875_v48 = vmax.f32 %v1812_v22, 0.0  ;;  %v1877_v51 = vmax.f32 %v1855_v23, 0.0  ;;  %v8382_v49 = vld [vmem:[%s10447_s11 + $0x170] sm:$0xff]   ;;  %v8393_v18 = vld [vmem:[%s10447_s11 + $0x280] sm:$0xff]  }
 0xd25   :  { %v1818_v44 = vadd.f32 %v1817_v40, %v1331_v57  ;;  %v1861_v45 = vadd.f32 %v1860_v41, %v1339_v63  ;;  %7595 = vmatpush3.bf16.msra.mxu0 %v8376_v20  ;;  %7617 = vmatpush3.bf16.msra.mxu1 %v8377_v21  ;;  %v1876_v55 = vmax.f32 %v1814_v10, 0.0  ;;  %v1878_v57 = vmax.f32 %v1857_v33, 0.0  ;;  %v8395_v20 = vld [vmem:[%s10447_s11 + $0x2c8] sm:$0xff]   ;;  %v8402_v23 = vld [vmem:[%s10447_s11 + $0x258] sm:$0xff]   ;;  %v8407_v10 = vld [vmem:[%s10447_s11 + $0x2e0] sm:$0xff]  }
 0xd26   :  { %v1891_v52 = vmax.f32 %v1816_v36, 0.0  ;;  %v1893_v54 = vmax.f32 %v1859_v39, 0.0  ;;  %7596 = vmatprep.subr.bf16.mxu0 %v8378_v30  ;;  %7618 = vmatprep.subr.bf16.mxu1 %v8379_v31  ;;  %v8396_v21 = vld [vmem:[%s10447_s11 + $0x208] sm:$0xff]   ;;  %v8403_v24 = vld [vmem:[%s10447_s11 + $0x2d8] sm:$0xff]   ;;  %v8406_v31 = vld [vmem:[%s10447_s11 + $0x260] sm:$0xff]  }
 0xd27   :  { %v1892_v58 = vmax.f32 %v1818_v44, 0.0  ;;  %v1894_v26 = vmax.f32 %v1861_v45, 0.0  ;;  %v8397_v22 = vld [vmem:[%s10447_s11 + $0x288] sm:$0xff]   ;;  %v8404_v29 = vld [vmem:[%s10447_s11 + $0x218] sm:$0xff]   ;;  %v8408_v33 = vld [vmem:[%s10447_s11 + $0x220] sm:$0xff]  }
 0xd28   :  { %v9381_v62 = vpack.c.bf16 %v1891_v52, %v1875_v48  ;;  %v9383_v56 = vpack.c.bf16 %v1893_v54, %v1877_v51  ;;  %v8405_v30 = vld [vmem:[%s10447_s11 + $0x298] sm:$0xff]   ;;  %v8409_v13 = vld [vmem:[%s10447_s11 + $0x2a0] sm:$0xff]   ;;  %v8410_v34 = vld [vmem:[%s10447_s11 + $0x268] sm:$0xff]  }
 0xd29   :  { %v9385_v63 = vpack.c.bf16 %v1892_v58, %v1876_v55  ;;  %v9387_v0 = vpack.c.bf16 %v1894_v26, %v1878_v57  ;;  %7597 = vmatpush3.bf16.msra.mxu0 %v8380_v46  ;;  %7619 = vmatpush3.bf16.msra.mxu1 %v8381_v47  ;;  %v8411_v36 = vld [vmem:[%s10447_s11 + $0x2e8] sm:$0xff]   ;;  %v8414_v41 = vld [vmem:[%s10447_s11 + $0x270] sm:$0xff]   ;;  %v8418_v47 = vld [vmem:[%s10447_s11 + $0x278] sm:$0xff]  }
 0xd2a   :  { %7598 = vmatprep.subr.bf16.mxu0 %v8382_v49  ;;  %7620 = vmatprep.subr.bf16.mxu1 %v8383_v35  ;;  %v8412_v39 = vld [vmem:[%s10447_s11 + $0x228] sm:$0xff]   ;;  %v8415_v44 = vld [vmem:[%s10447_s11 + $0x2f0] sm:$0xff]   ;;  %v8419_v48 = vld [vmem:[%s10447_s11 + $0x2f8] sm:$0xff]  }
 0xd2b   :  { %v8413_v40 = vld [vmem:[%s10447_s11 + $0x2a8] sm:$0xff]   ;;  %v8416_v45 = vld [vmem:[%s10447_s11 + $0x230] sm:$0xff]   ;;  %v8420_v51 = vld [vmem:[%s10447_s11 + $0x238] sm:$0xff]  }
 0xd2c   :  { %v8417_v46 = vld [vmem:[%s10447_s11 + $0x2b0] sm:$0xff]   ;;  %v8421_v52 = vld [vmem:[%s10447_s11 + $0x2b8] sm:$0xff]   ;;  %v8422_v54 = vld [vmem:[%s10447_s11 + $0x340] sm:$0xff]  }
 0xd2d   :  { %7599 = vmatpush3.bf16.msra.mxu0 %v8384_v1  ;;  %7621 = vmatpush3.bf16.msra.mxu1 %v8385_v4  ;;  %v8423_v49 = vld [vmem:[%s10447_s11 + $0x3c0] sm:$0xff]   ;;  %v8426_v57 = vld [vmem:[%s10447_s11 + $0x348] sm:$0xff]   ;;  %v8433_v4 = vld [vmem:[%s10447_s11 + $0x390] sm:$0xff]  }
 0xd2e   :  { %7600 = vmatprep.subr.bf16.mxu0 %v8386_v5  ;;  %7622 = vmatprep.subr.bf16.mxu1 %v8387_v9  ;;  %v8424_v35 = vld [vmem:[%s10447_s11 + $0x300] sm:$0xff]   ;;  %v8427_v58 = vld [vmem:[%s10447_s11 + $0x3c8] sm:$0xff]   ;;  %v8435_v5 = vld [vmem:[%s10447_s11 + $0x3d8] sm:$0xff]  }
 0xd2f   :  { %v8425_v55 = vld [vmem:[%s10447_s11 + $0x380] sm:$0xff]   ;;  %v8428_v26 = vld [vmem:[%s10447_s11 + $0x308] sm:$0xff]   ;;  %v8436_v9 = vld [vmem:[%s10447_s11 + $0x318] sm:$0xff]  }
 0xd30   :  { %v8429_v1 = vld [vmem:[%s10447_s11 + $0x388] sm:$0xff]  }
 0xd31   :  { %7601 = vmatpush3.bf16.msra.mxu0 %v8388_v11  ;;  %7623 = vmatpush3.bf16.msra.mxu1 %v8389_v12  ;;  %v8437_v11 = vld [vmem:[%s10447_s11 + $0x398] sm:$0xff]   ;;  %v8438_v12 = vld [vmem:[%s10447_s11 + $0x360] sm:$0xff]  }
 0xd32   :  { %7630 = vmatprep.subr.bf16.mxu0 %v8390_v50  ;;  %7652 = vmatprep.subr.bf16.mxu1 %v8391_v14  ;;  %v8439_v50 = vld [vmem:[%s10447_s11 + $0x3e0] sm:$0xff]  }
 0xd33   :  { %v8440_v14 = vld [vmem:[%s10447_s11 + $0x320] sm:$0xff]  }
 0xd34   :  { %3057 = vmatmul.mubr.bf16.vlgmr.msra.gmra.mrb[36].mxu0 %v9313_v25  ;;  %3098 = vmatmul.mubr.bf16.vlgmr.msra.gmra.mrb[40].mxu1 %v9315_v27  ;;  %v8398_v25 = vld [vmem:[%s10447_s11 + $0x250] sm:$0xff]  }
 0xd35   :  { %7631 = vmatpush3.bf16.msra.mxu0 %v8392_v53  ;;  %3138 = vmatprep.mubr.bf16.mxu0 %v9353_v16  ;;  %v8399_v27 = vld [vmem:[%s10447_s11 + $0x2d0] sm:$0xff]   ;;  %v8441_v53 = vld [vmem:[%s10447_s11 + $0x3a0] sm:$0xff]  }
 0xd36   :  { %7653 = vmatpush3.bf16.msra.mxu1 %v8393_v18  ;;  %3179 = vmatprep.mubr.bf16.mxu1 %v9355_v17  ;;  %v8400_v16 = vld [vmem:[%s10447_s11 + $0x210] sm:$0xff]   ;;  %v8442_v18 = vld [vmem:[%s10447_s11 + $0x368] sm:$0xff]  }
 0xd37   :  { %7632 = vmatprep.subr.bf16.mxu0 %v8394_v19  ;;  %7654 = vmatprep.subr.bf16.mxu1 %v8395_v20  ;;  %v8401_v17 = vld [vmem:[%s10447_s11 + $0x290] sm:$0xff]   ;;  %v8443_v19 = vld [vmem:[%s10447_s11 + $0x3e8] sm:$0xff]  }
 0xd38   :  { %v8444_v20 = vld [vmem:[%s10447_s11 + $0x328] sm:$0xff]  }
 0xd39   :  { %7633 = vmatpush3.bf16.msra.mxu0 %v8396_v21  ;;  %v8445_v21 = vld [vmem:[%s10447_s11 + $0x3a8] sm:$0xff]  }
 0xd3a   :  { %7655 = vmatpush3.bf16.msra.mxu1 %v8397_v22  ;;  %7634 = vmatprep.subr.bf16.mxu0 %v8398_v25  ;;  %v8446_v22 = vld [vmem:[%s10447_s11 + $0x370] sm:$0xff]  }
 0xd3b   :  { %7656 = vmatprep.subr.bf16.mxu1 %v8399_v27  ;;  %v8447_v25 = vld [vmem:[%s10447_s11 + $0x3f0] sm:$0xff]  }
 0xd3c   :  { %v8448_v27 = vld [vmem:[%s10447_s11 + $0x330] sm:$0xff]  }
 0xd3d   :  { %7635 = vmatpush3.bf16.msra.mxu0 %v8400_v16  ;;  %v8449_v16 = vld [vmem:[%s10447_s11 + $0x3b0] sm:$0xff]  }
 0xd3e   :  { %7657 = vmatpush3.bf16.msra.mxu1 %v8401_v17  ;;  %7636 = vmatprep.subr.bf16.mxu0 %v8402_v23  ;;  %v8450_v17 = vld [vmem:[%s10447_s11 + $0x378] sm:$0xff]  }
 0xd3f   :  { %7658 = vmatprep.subr.bf16.mxu1 %v8403_v24  ;;  %v8451_v23 = vld [vmem:[%s10447_s11 + $0x3f8] sm:$0xff]  }
 0xd40   :  { %v8452_v24 = vld [vmem:[%s10447_s11 + $0x338] sm:$0xff]  }
 0xd41   :  { %7637 = vmatpush3.bf16.msra.mxu0 %v8404_v29  ;;  %v8453_v29 = vld [vmem:[%s10447_s11 + $0x3b8] sm:$0xff]  }
 0xd42   :  { %7659 = vmatpush3.bf16.msra.mxu1 %v8405_v30  ;;  %7638 = vmatprep.subr.bf16.mxu0 %v8406_v31 }
 0xd43   :  { %7660 = vmatprep.subr.bf16.mxu1 %v8407_v10  ;;  %v6848_v10 = vld [vmem:[%s10448_s12] ss:$0 sm:$0xff] }
 0xd45   :  { %7639 = vmatpush3.bf16.msra.mxu0 %v8408_v33 }
 0xd46   :  { %7661 = vmatpush3.bf16.msra.mxu1 %v8409_v13  ;;  %7640 = vmatprep.subr.bf16.mxu0 %v8410_v34 }
 0xd47   :  { %7662 = vmatprep.subr.bf16.mxu1 %v8411_v36 }
 0xd49   :  { %7641 = vmatpush3.bf16.msra.mxu0 %v8412_v39 }
 0xd4a   :  { %7663 = vmatpush3.bf16.msra.mxu1 %v8413_v40  ;;  %7642 = vmatprep.subr.bf16.mxu0 %v8414_v41 }
 0xd4b   :  { %7664 = vmatprep.subr.bf16.mxu1 %v8415_v44 }
 0xd4d   :  { %7643 = vmatpush3.bf16.msra.mxu0 %v8416_v45 }
 0xd4e   :  { %7665 = vmatpush3.bf16.msra.mxu1 %v8417_v46  ;;  %7644 = vmatprep.subr.bf16.mxu0 %v8418_v47 }
 0xd4f   :  { %7666 = vmatprep.subr.bf16.mxu1 %v8419_v48 }
 0xd51   :  { %7645 = vmatpush3.bf16.msra.mxu0 %v8420_v51 }
 0xd52   :  { %7667 = vmatpush3.bf16.msra.mxu1 %v8421_v52  ;;  %7674 = vmatprep.subr.bf16.mxu0 %v8422_v54 }
 0xd53   :  { %7696 = vmatprep.subr.bf16.mxu1 %v8423_v49 }
 0xd54   :  { %3139 = vmatmul.mubr.bf16.vlgmr.msra.gmra.mrb[40].mxu0 %v9349_v15  ;;  %v8430_v15 = vld [vmem:[%s10447_s11 + $0x350] sm:$0xff]  }
 0xd55   :  { %3180 = vmatmul.mubr.bf16.vlgmr.msra.gmra.mrb[44].mxu1 %v9351_v38  ;;  %7675 = vmatpush3.bf16.msra.mxu0 %v8424_v35  ;;  %v8431_v38 = vld [vmem:[%s10447_s11 + $0x3d0] sm:$0xff]  }
 0xd56   :  { %3220 = vmatprep.mubr.bf16.mxu0 %v9385_v63  ;;  %7697 = vmatpush3.bf16.msra.mxu1 %v8425_v55  ;;  %v8432_v63 = vld [vmem:[%s10447_s11 + $0x310] sm:$0xff]  }
 0xd57   :  { %3261 = vmatprep.mubr.bf16.mxu1 %v9387_v0  ;;  %7676 = vmatprep.subr.bf16.mxu0 %v8426_v57  ;;  %v8434_v0 = vld [vmem:[%s10447_s11 + $0x358] sm:$0xff]  }
 0xd58   :  { %7698 = vmatprep.subr.bf16.mxu1 %v8427_v58 }
 0xd59   :  { %7677 = vmatpush3.bf16.msra.mxu0 %v8428_v26 }
 0xd5a   :  { %7699 = vmatpush3.bf16.msra.mxu1 %v8429_v1  ;;  %7678 = vmatprep.subr.bf16.mxu0 %v8430_v15 }
 0xd5b   :  { %7700 = vmatprep.subr.bf16.mxu1 %v8431_v38 }
 0xd5d   :  { %7679 = vmatpush3.bf16.msra.mxu0 %v8432_v63 }
 0xd5e   :  { %7701 = vmatpush3.bf16.msra.mxu1 %v8433_v4  ;;  %7680 = vmatprep.subr.bf16.mxu0 %v8434_v0 }
 0xd5f   :  { %7702 = vmatprep.subr.bf16.mxu1 %v8435_v5 }
 0xd61   :  { %7681 = vmatpush3.bf16.msra.mxu0 %v8436_v9 }
 0xd62   :  { %7703 = vmatpush3.bf16.msra.mxu1 %v8437_v11  ;;  %7682 = vmatprep.subr.bf16.mxu0 %v8438_v12 }
 0xd63   :  { %7704 = vmatprep.subr.bf16.mxu1 %v8439_v50 }
 0xd65   :  { %7683 = vmatpush3.bf16.msra.mxu0 %v8440_v14 }
 0xd66   :  { %7705 = vmatpush3.bf16.msra.mxu1 %v8441_v53  ;;  %7684 = vmatprep.subr.bf16.mxu0 %v8442_v18 }
 0xd67   :  { %7706 = vmatprep.subr.bf16.mxu1 %v8443_v19 }
 0xd69   :  { %7685 = vmatpush3.bf16.msra.mxu0 %v8444_v20 }
 0xd6a   :  { %7707 = vmatpush3.bf16.msra.mxu1 %v8445_v21  ;;  %7686 = vmatprep.subr.bf16.mxu0 %v8446_v22 }
 0xd6b   :  { %7708 = vmatprep.subr.bf16.mxu1 %v8447_v25 }
 0xd6d   :  { %7687 = vmatpush3.bf16.msra.mxu0 %v8448_v27 }
 0xd6e   :  { %7709 = vmatpush3.bf16.msra.mxu1 %v8449_v16  ;;  %7688 = vmatprep.subr.bf16.mxu0 %v8450_v17 }
 0xd6f   :  { %7710 = vmatprep.subr.bf16.mxu1 %v8451_v23 }
 0xd71   :  { %7689 = vmatpush3.bf16.msra.mxu0 %v8452_v24 }
 0xd72   :  { %7711 = vmatpush3.bf16.msra.mxu1 %v8453_v29  ;;  %8034 = vmatprep.subr.bf16.mxu0 %v8706_v8 }
 0xd74   :  { %3221 = vmatmul.mubr.bf16.vlgmr.msra.gmra.mrb[44].mxu0 %v9381_v62 }
 0xd75   :  { %3262 = vmatmul.mubr.bf16.vlgmr.msra.gmra.mrb[48].mxu1 %v9383_v56  ;;  %8038 = vmatprep.mubr.msk.bf16.mxu0 %vm8707_vm1, %v8706_v8 }
 0xde7   :  { %v7558_v30 = vpop.f32.mrb[32].mxu0  ;;  %v7580_v31 = vpop.f32.mrb[36].mxu1 }
 0xde8   :  { %v7559_v33 = vpop.f32.mrb[33].mxu0  ;;  %v7581_v13 = vpop.f32.mrb[37].mxu1 }
 0xde9   :  { %v7560_v34 = vadd.f32 %v7559_v33, %v7558_v30  ;;  %v7582_v36 = vadd.f32 %v7581_v13, %v7580_v31  ;;  %v7561_v39 = vpop.f32.mrb[34].mxu0  ;;  %v7583_v40 = vpop.f32.mrb[38].mxu1 }
 0xdea   :  { %v7562_v41 = vpop.f32.mrb[35].mxu0  ;;  %v7584_v44 = vpop.f32.mrb[39].mxu1 }
 0xdeb   :  { %v2977_v62 = vadd.f32 %v7560_v34, %v6848_v10  ;;  %v7563_v45 = vadd.f32 %v7562_v41, %v7561_v39  ;;  %v7585_v56 = vadd.f32 %v7584_v44, %v7583_v40 }
 0xded   :  { %v3018_v46 = vadd.f32 %v7582_v36, %v2977_v62  ;;  %v2980_v47 = vadd.f32 %v7563_v45, %v6848_v10 }
 0xdef   :  { %v3021_v48 = vadd.f32 %v7585_v56, %v2980_v47 }
 0xe07   :  { %v7602_v51 = vpop.f32.mrb[36].mxu0  ;;  %v7624_v52 = vpop.f32.mrb[40].mxu1 }
 0xe08   :  { %v7603_v54 = vpop.f32.mrb[37].mxu0  ;;  %v7625_v49 = vpop.f32.mrb[41].mxu1 }
 0xe09   :  { %v7604_v35 = vadd.f32 %v7603_v54, %v7602_v51  ;;  %v7626_v55 = vadd.f32 %v7625_v49, %v7624_v52  ;;  %v7605_v57 = vpop.f32.mrb[38].mxu0  ;;  %v7627_v58 = vpop.f32.mrb[42].mxu1 }
 0xe0a   :  { %v7606_v26 = vpop.f32.mrb[39].mxu0  ;;  %v7628_v1 = vpop.f32.mrb[43].mxu1 }
 0xe0b   :  { %v3059_v15 = vadd.f32 %v7604_v35, %v3018_v46  ;;  %v7607_v38 = vadd.f32 %v7606_v26, %v7605_v57  ;;  %v7629_v63 = vadd.f32 %v7628_v1, %v7627_v58 }
 0xe0d   :  { %v3100_v4 = vadd.f32 %v7626_v55, %v3059_v15  ;;  %v3062_v0 = vadd.f32 %v7607_v38, %v3021_v48  ;;  %v8455_v15 = vld [vmem:[%s10474_s23 + $0x18] sm:$0xff]  }
 0xe0f   :  { %v3103_v5 = vadd.f32 %v7629_v63, %v3062_v0 }
 0xe27   :  { %v7646_v9 = vpop.f32.mrb[40].mxu0 }
 0xe28   :  { %v7668_v11 = vpop.f32.mrb[44].mxu1  ;;  %v7647_v12 = vpop.f32.mrb[41].mxu0 }
 0xe29   :  { %v7648_v50 = vadd.f32 %v7647_v12, %v7646_v9  ;;  %v7669_v14 = vpop.f32.mrb[45].mxu1  ;;  %v7649_v53 = vpop.f32.mrb[42].mxu0 }
 0xe2a   :  { %v7670_v18 = vadd.f32 %v7669_v14, %v7668_v11  ;;  %v7671_v19 = vpop.f32.mrb[46].mxu1  ;;  %v7650_v20 = vpop.f32.mrb[43].mxu0 }
 0xe2b   :  { %v3141_v21 = vadd.f32 %v7648_v50, %v3100_v4  ;;  %v7651_v22 = vadd.f32 %v7650_v20, %v7649_v53  ;;  %v7672_v25 = vpop.f32.mrb[47].mxu1  ;;  %v6977_v50 = vld [vmem:[%s10449_s13] ss:$0 sm:$0xff] }
 0xe2c   :  { %v7673_v27 = vadd.f32 %v7672_v25, %v7671_v19  ;;  %v6978_v19 = vld [vmem:[%s10450_s14] ss:$0 sm:$0xff] }
 0xe2d   :  { %v3182_v16 = vadd.f32 %v7670_v18, %v3141_v21  ;;  %v3144_v17 = vadd.f32 %v7651_v22, %v3103_v5 }
 0xe2f   :  { %v3185_v23 = vadd.f32 %v7673_v27, %v3144_v17  ;;  %v6988_v27 = vld [vmem:[%s10440_s4 + $0x1] ss:$0 sm:$0xff] }
 0xe47   :  { %v7690_v24 = vpop.f32.mrb[44].mxu0 }
 0xe48   :  { %v7712_v29 = vpop.f32.mrb[48].mxu1  ;;  %v7691_v30 = vpop.f32.mrb[45].mxu0 }
 0xe49   :  { %v7692_v31 = vadd.f32 %v7691_v30, %v7690_v24  ;;  %v7713_v10 = vpop.f32.mrb[49].mxu1  ;;  %v7693_v33 = vpop.f32.mrb[46].mxu0 }
 0xe4a   :  { %v7714_v13 = vadd.f32 %v7713_v10, %v7712_v29  ;;  %v7715_v34 = vpop.f32.mrb[50].mxu1  ;;  %v7694_v36 = vpop.f32.mrb[47].mxu0 }
 0xe4b   :  { %v3223_v39 = vadd.f32 %v7692_v31, %v3182_v16  ;;  %v7695_v40 = vadd.f32 %v7694_v36, %v7693_v33  ;;  %v7716_v41 = vpop.f32.mrb[51].mxu1 }
 0xe4c   :  { %v7717_v44 = vadd.f32 %v7716_v41, %v7715_v34 }
 0xe4d   :  { %v3264_v62 = vadd.f32 %v7714_v13, %v3223_v39  ;;  %v3226_v45 = vadd.f32 %v7695_v40, %v3185_v23 }
 0xe4f   :  { %v3267_v56 = vadd.f32 %v7717_v44, %v3226_v45  ;;  %v3270_v46 = vadd.f32 %v3264_v62, %v9069_v32 }
 0xe51   :  { %v3274_v47 = vsel %vm71_vm0, %v3270_v46, 0.0  ;;  %v3271_v48 = vadd.f32 %v3267_v56, %v9071_v43  ;;  %v8454_v43 = vld [vmem:[%s10474_s23 + $0x10] sm:$0xff]   ;;  %s10482_s23 = smov 48  }
 0xe52   :  { %3275 = vadd.xlane.f32.xlu0 %v3274_v47  ;;  %8035 = vmatpush3.bf16.msra.mxu0 %v8454_v43 }
 0xe53   :  { %v3277_v51 = vsel %vm71_vm0, %v3271_v48, 0.0  ;;  %8036 = vmatprep.subr.bf16.mxu0 %v8706_v8 }
 0xe54   :  { %3278 = vadd.xlane.f32.xlu1 %v3277_v51 }
 0xe56   :  { %8037 = vmatpush3.bf16.msra.mxu0 %v8455_v15 }
 0xedf   :  { %v3276_v52 = vpop.xlane.xlu0 %3275 }
 0xee0   :  { %v3280_v54 = vmul.f32 0.03125, %v3276_v52 }
 0xee1   :  { %v3279_v49 = vpop.xlane.xlu1 %3278 }
 0xee2   :  { %v3282_v35 = vsub.f32 %v3270_v46, %v3280_v54  ;;  %v3281_v55 = vmul.f32 0.03125, %v3279_v49  ;;  %v9686_v54 = vld [vmem:[%s10477_s2] sm:$0xff] }
 0xee4   :  { %v3283_v57 = vsub.f32 %v3271_v48, %v3281_v55  ;;  %v3284_v58 = vmul.f32 %v3282_v35, %v3282_v35  ;;  %v9680_v48 = vld [vmem:[%s10477_s2 + $0x8] sm:$0xff]  ;;  %s10478_s2 = smov 56  }
 0xee6   :  { %v3286_v26 = vsel %vm71_vm0, %v3284_v58, 0.0  ;;  %v3285_v1 = vmul.f32 %v3283_v57, %v3283_v57 }
 0xee7   :  { %3287 = vadd.xlane.f32.xlu0 %v3286_v26 }
 0xee8   :  { %v3289_v32 = vsel %vm71_vm0, %v3285_v1, 0.0 }
 0xeeb   :  { %3290 = vadd.xlane.f32.xlu0 %v3289_v32 }
 0xf74   :  { %v3288_v38 = vpop.xlane.xlu0 %3287 }
 0xf75   :  { %v3292_v63 = vmul.f32 0.03125, %v3288_v38 }
 0xf77   :  { %v3294_v4 = vadd.f32 1e-05, %v3292_v63 }
 0xf78   :  { %v3291_v0 = vpop.xlane.xlu0 %3290 }
 0xf79   :  { %8632 = vrsqrt.f32 %v3294_v4  ;;  %v3293_v5 = vmul.f32 0.03125, %v3291_v0 }
 0xf7b   :  { %v3295_v9 = vadd.f32 1e-05, %v3293_v5 }
 0xf7d   :  { %8634 = vrsqrt.f32 %v3295_v9 }
 0xf83   :  { %v8633_v11 = vpop.eup %8632 }
 0xf84   :  { %v3298_v12 = vmul.f32 %v8633_v11, %v3282_v35 }
 0xf86   :  { %v3306_v53 = vmul.f32 %v6977_v50, %v3298_v12 }
 0xf87   :  { %v8635_v14 = vpop.eup %8634 }
 0xf88   :  { %v3299_v18 = vmul.f32 %v8635_v14, %v3283_v57  ;;  %v9634_v21 = vadd.f32 %v6978_v19, %v3306_v53 }
 0xf8a   :  { %v3307_v20 = vmul.f32 %v6977_v50, %v3299_v18 }
 0xf8c   :  { %v9636_v22 = vadd.f32 %v6978_v19, %v3307_v20 }
 0xf8e   :  { %v3326_v25 = vpack.c.bf16 %v9636_v22, %v9634_v21 }
 0xf90   :  { %8039 = vmatmul.mubr.msk.bf16.vlgmr.msra.gmra.mrb[48].mxu0 %vm71_vm0, %v3326_v25 }
0x1063   :  { %v3384_v16 = vpop.f32.mrb[48].mxu0 }
0x1064   :  { %v9644_v17 = vadd.f32 %v6988_v27, %v3384_v16  ;;  %v8040_v23 = vpop.f32.mrb[49].mxu0 }
0x1065   :  { %v3387_v24 = vpop.f32.mrb[50].mxu0 }
0x1066   :  { %v9646_v29 = vadd.f32 %v6988_v27, %v3387_v24  ;;  %3594 = vrot.lane.b32.xlu1 %v9644_v17, %s8708_s30  ;;  %v8041_v30 = vpop.f32.mrb[51].mxu0  ;;  %8046 = vmatprep.mubr.msk.f32.mxu1 %vm176_vm6, %v9644_v17 }
0x1068   :  { %v9654_v31 = vpack.i.bf16 %v9646_v29, %v9644_v17 }
0x106a   :  { %8285 = vrot.lane.b32.xlu0 %v9654_v31, %s8709_s20 }
0x106e   :  { %8290 = vrot.lane.b32.xlu0 %v9654_v31, %s8710_s21 }
0x1072   :  { %3596 = vrot.lane.b32.xlu0 %v9646_v29, %s8708_s30  ;;  %s10485_s30 = smov 40  }
0x10d8   :  { %v3595_v10 = vpop.permute.xlu1 %3594 }
0x10d9   :  { %8060 = vmatprep.mubr.msk.f32.mxu0 %vm176_vm6, %v3595_v10  ;;  %v6984_v10 = vld [vmem:[%s10441_s5 + $0x14] sm:$0xf] }
0x10dc   :  { %v8286_v33 = vpop.permute.xlu0 %8285 }
0x10dd   :  { %v8288_v13 = vunpack.i.h.bf16 %v8286_v33  ;;  %v8287_v34 = vunpack.i.l.bf16 %v8286_v33  ;;  %v3803_v33 = vsel %vm583_vm9, %v6984_v10, 0 }
0x10df   :  { %v8185_v36 = vpack.c.bf16 %v8288_v13, %v8287_v34 }
0x10e0   :  { %v8291_v39 = vpop.permute.xlu0 %8290 }
0x10e1   :  { %v8293_v40 = vunpack.i.h.bf16 %v8291_v39  ;;  %v8292_v41 = vunpack.i.l.bf16 %v8291_v39  ;;  %8187 = vmatprep.subr.msk.bf16.mxu1 %vm8877_vm7, %v8185_v36 }
0x10e2   :  { %8190 = vmatpush3.bf16.xpose.msk.msra.mxu1 %vm8877_vm7, %v8185_v36 }
0x10e3   :  { %v8195_v44 = vpack.c.bf16 %v8293_v40, %v8292_v41 }
0x10e4   :  { %v3597_v62 = vpop.permute.xlu0 %3596 }
0x10e5   :  { %8197 = vmatprep.subr.msk.bf16.mxu0 %vm8877_vm7, %v8195_v44 }
0x10e6   :  { %8200 = vmatpush3.bf16.xpose.msk.msra.mxu0 %vm8877_vm7, %v8195_v44 }
0x10e7   :  { %8070 = vmatprep.subr.bf16.mxu0 %v8706_v8 }
0x10e9   :  { %8047 = vmatmul.mubr.msk.f32.vlgmr.msra.gmra.mrb[52].mxu1 %vm176_vm6, %v9646_v29 }
0x10ed   :  { %8061 = vmatmul.mubr.msk.f32.vlgmr.msra.gmra.mrb[52].mxu0 %vm176_vm6, %v3597_v62 }
0x10ee   :  { %8072 = vmatprep.mubr.msk.bf16.mxu0 %vm8707_vm1, %v8706_v8  ;;  %8071 = vmatpush3.bf16.msra.mxu0 %v3803_v33 }
0x11bc   :  { %v8048_v45 = vpop.f32.mrb[52].mxu1 }
0x11bd   :  { %v3481_v56 = vmul.f32 0.35355338, %v8048_v45  ;;  %v3471_v46 = vpop.f32.mrb[53].mxu1 }
0x11be   :  { %v3480_v47 = vmul.f32 0.35355338, %v3471_v46 }
0x11bf   :  { %v3483_v51 = vadd.f32 %v9680_v48, %v3481_v56 }
0x11c0   :  { %v8062_v52 = vpop.f32.mrb[52].mxu0  ;;  %v3482_v49 = vadd.f32 %v9686_v54, %v3480_v47 }
0x11c1   :  { %v3676_v35 = vpop.f32.mrb[53].mxu0  ;;  %v3487_v55 = vsel %vm264_vm8, %v3483_v51, -inf  ;;  %v3686_v57 = vmul.f32 0.35355338, %v8062_v52 }
0x11c2   :  { %v3685_v58 = vmul.f32 0.35355338, %v3676_v35  ;;  %3488 = vmax.xlane.f32.xlu1 %v3487_v55  ;;  %v3484_v26 = vsel %vm264_vm8, %v3482_v49, -inf }
0x11c3   :  { %3485 = vmax.xlane.f32.xlu0 %v3484_v26  ;;  %v3688_v43 = vadd.f32 %v9680_v48, %v3686_v57 }
0x11c4   :  { %v3687_v1 = vadd.f32 %v9686_v54, %v3685_v58 }
0x11c5   :  { %v3692_v15 = vsel %vm264_vm8, %v3688_v43, -inf }
0x11c6   :  { %v3689_v32 = vsel %vm264_vm8, %v3687_v1, -inf }
0x11c7   :  { %3690 = vmax.xlane.f32.xlu0 %v3689_v32 }
0x11cb   :  { %3693 = vmax.xlane.f32.xlu0 %v3692_v15 }
0x124f   :  { %v3489_v38 = vpop.xlane.xlu1 %3488 }
0x1250   :  { %v3491_v63 = vsub.f32 %v3483_v51, %v3489_v38  ;;  %v3486_v4 = vpop.xlane.xlu0 %3485  ;;  %v6983_v38 = vld [vmem:[%s10441_s5 + $0x10] sm:$0xf] }
0x1251   :  { %v3490_v0 = vsub.f32 %v3482_v49, %v3486_v4 }
0x1252   :  { %v3494_v5 = vmul.f32 1.442695, %v3491_v63  ;;  %v3850_v63 = vsel %vm583_vm9, %v6983_v38, 0 }
0x1253   :  { %v3492_v9 = vmul.f32 1.442695, %v3490_v0 }
0x1254   :  { %8636 = vpow2.f32 %v3494_v5  ;;  %v3691_v11 = vpop.xlane.xlu0 %3690 }
0x1255   :  { %v3695_v12 = vsub.f32 %v3687_v1, %v3691_v11  ;;  %8638 = vpow2.f32 %v3492_v9 }
0x1257   :  { %v3697_v50 = vmul.f32 1.442695, %v3695_v12 }
0x1258   :  { %v3694_v14 = vpop.xlane.xlu0 %3693 }
0x1259   :  { %v3696_v53 = vsub.f32 %v3688_v43, %v3694_v14  ;;  %8640 = vpow2.f32 %v3697_v50 }
0x125b   :  { %v3699_v18 = vmul.f32 1.442695, %v3696_v53 }
0x125d   :  { %8642 = vpow2.f32 %v3699_v18 }
0x125e   :  { %v8637_v19 = vpop.eup %8636 }
0x125f   :  { %v3499_v20 = vsel %vm264_vm8, %v8637_v19, 0.0  ;;  %v8639_v25 = vpop.eup %8638 }
0x1260   :  { %3500 = vadd.xlane.f32.xlu0 %v3499_v20  ;;  %v3496_v27 = vsel %vm264_vm8, %v8639_v25, 0.0 }
0x1263   :  { %v8641_v16 = vpop.eup %8640 }
0x1264   :  { %3497 = vadd.xlane.f32.xlu0 %v3496_v27  ;;  %v3701_v24 = vsel %vm264_vm8, %v8641_v16, 0.0 }
0x1267   :  { %v8643_v23 = vpop.eup %8642 }
0x1268   :  { %3702 = vadd.xlane.f32.xlu0 %v3701_v24  ;;  %v3704_v30 = vsel %vm264_vm8, %v8643_v23, 0.0 }
0x1269   :  { %3705 = vadd.xlane.f32.xlu1 %v3704_v30 }
0x127a   :  { %8300 = vrot.lane.b32.xlu1 %v9654_v31, %s10478_s2 }
0x127e   :  { %8295 = vrot.lane.b32.xlu0 %v9654_v31, %s10479_s26  ;;  %8305 = vrot.lane.b32.xlu1 %v9654_v31, %s10480_s24 }
0x1282   :  { %3895 = vrot.lane.b32.xlu0 %v9646_v29, %s10481_s29  ;;  %3893 = vrot.lane.b32.xlu1 %v9644_v17, %s10481_s29  ;;  %s8721_s29 = smov [#allocation2]  }
0x12ed   :  { %v3501_v13 = vpop.xlane.xlu0 %3500 }
0x12f1   :  { %v3498_v34 = vpop.xlane.xlu0 %3497 }
0x12f2   :  { %8644 = vrcp.f32 %v3498_v34 }
0x12f3   :  { %8646 = vrcp.f32 %v3501_v13 }
0x12f5   :  { %v3703_v36 = vpop.xlane.xlu0 %3702 }
0x12f6   :  { %8648 = vrcp.f32 %v3703_v36  ;;  %v3706_v39 = vpop.xlane.xlu1 %3705 }
0x12f7   :  { %8650 = vrcp.f32 %v3706_v39 }
0x12f9   :  { %v8296_v40 = vpop.permute.xlu0 %8295 }
0x12fa   :  { %v8298_v41 = vunpack.i.h.bf16 %v8296_v40  ;;  %v8297_v44 = vunpack.i.l.bf16 %v8296_v40  ;;  %v8301_v62 = vpop.permute.xlu1 %8300 }
0x12fb   :  { %v8303_v45 = vunpack.i.h.bf16 %v8301_v62  ;;  %v8302_v56 = vunpack.i.l.bf16 %v8301_v62 }
0x12fc   :  { %v8645_v46 = vpop.eup %8644  ;;  %v8191_v47 = vpack.c.bf16 %v8298_v41, %v8297_v44 }
0x12fd   :  { %v8647_v51 = vpop.eup %8646  ;;  %v8201_v52 = vpack.c.bf16 %v8303_v45, %v8302_v56  ;;  %v3503_v49 = vmul.f32 %v8645_v46, %v8639_v25  ;;  %v3896_v14 = vpop.permute.xlu0 %3895 }
0x12fe   :  { %v8306_v35 = vpop.permute.xlu1 %8305  ;;  %8192 = vmatprep.subr.bf16.mxu1 %v8191_v47  ;;  %v3505_v26 = vmul.f32 %v8647_v51, %v8637_v19 }
0x12ff   :  { %v8308_v55 = vunpack.i.h.bf16 %v8306_v35  ;;  %v8307_v57 = vunpack.i.l.bf16 %v8306_v35  ;;  %8194 = vmatpush3.bf16.msra.mxu1 %v8191_v47  ;;  %8053 = vmatprep.mubr.msk.f32.mxu1 %vm264_vm8, %v3503_v49 }
0x1300   :  { %v8649_v58 = vpop.eup %8648  ;;  %8202 = vmatprep.subr.bf16.mxu1 %v8201_v52 }
0x1301   :  { %v8651_v1 = vpop.eup %8650  ;;  %v8205_v32 = vpack.c.bf16 %v8308_v55, %v8307_v57  ;;  %v3708_v43 = vmul.f32 %v8649_v58, %v8641_v16 }
0x1302   :  { %8054 = vmatmul.mubr.msk.f32.vlgmr.msra.gmra.mrb[54].mxu1 %vm264_vm8, %v3505_v26  ;;  %v3710_v15 = vmul.f32 %v8651_v1, %v8643_v23  ;;  %v3894_v50 = vpop.permute.xlu1 %3893 }
0x1303   :  { %8204 = vmatpush3.bf16.msra.mxu1 %v8201_v52  ;;  %8067 = vmatprep.mubr.msk.f32.mxu1 %vm264_vm8, %v3708_v43 }
0x1304   :  { %8207 = vmatprep.subr.msk.bf16.mxu0 %vm8877_vm7, %v8205_v32  ;;  %8076 = vmatprep.subr.bf16.mxu1 %v8706_v8 }
0x1306   :  { %8068 = vmatmul.mubr.msk.f32.vlgmr.msra.gmra.mrb[56].mxu1 %vm264_vm8, %v3710_v15 }
0x1307   :  { %8078 = vmatprep.mubr.msk.bf16.mxu1 %vm8707_vm1, %v8706_v8  ;;  %8077 = vmatpush3.bf16.msra.mxu1 %v3850_v63 }
0x13d5   :  { %v8055_v4 = vpop.f32.mrb[54].mxu1 }
0x13d6   :  { %v3584_v0 = vpop.f32.mrb[55].mxu1 }
0x13d7   :  { %v3593_v5 = vpack.c.bf16 %v8055_v4, %v3584_v0 }
0x13d9   :  { %v8069_v9 = vpop.f32.mrb[56].mxu1  ;;  %8079 = vmatmul.mubr.msk.bf16.vlgmr.msra.gmra.mrb[60].mxu1 %vm176_vm6, %v3593_v5 }
0x13da   :  { %v3789_v11 = vpop.f32.mrb[57].mxu1 }
0x13db   :  { %v3798_v12 = vpack.c.bf16 %v8069_v9, %v3789_v11  ;;  %v6985_v11 = vld [vmem:[%s10441_s5 + $0x18] sm:$0xf] }
0x13dd   :  { %8073 = vmatmul.mubr.msk.bf16.vlgmr.msra.gmra.mrb[56].mxu0 %vm176_vm6, %v3798_v12  ;;  %v4102_v12 = vsel %vm583_vm9, %v6985_v11, 0 }
0x13de   :  { %8210 = vmatpush3.bf16.xpose.msk.msra.mxu0 %vm8877_vm7, %v8205_v32  ;;  %8086 = vmatprep.mubr.msk.f32.mxu0 %vm176_vm6, %v3894_v50 }
0x13df   :  { %8096 = vmatprep.subr.bf16.mxu0 %v8706_v8 }
0x13e5   :  { %8087 = vmatmul.mubr.msk.f32.vlgmr.msra.gmra.mrb[54].mxu0 %vm176_vm6, %v3896_v14 }
0x13e6   :  { %8098 = vmatprep.mubr.msk.bf16.mxu0 %vm8707_vm1, %v8706_v8  ;;  %8097 = vmatpush3.bf16.msra.mxu0 %v4102_v12 }
0x14ac   :  { %v3886_v53 = vpop.f32.mrb[60].mxu1 }
0x14ad   :  { %v8080_v18 = vpop.f32.mrb[61].mxu1 }
0x14ae   :  { %v3889_v19 = vpop.f32.mrb[62].mxu1 }
0x14af   :  { %v8081_v20 = vpop.f32.mrb[63].mxu1 }
0x14b0   :  { %v3839_v25 = vpop.f32.mrb[56].mxu0 }
0x14b1   :  { %v9735_v27 = vadd.f32 %v3886_v53, %v3839_v25  ;;  %v8074_v16 = vpop.f32.mrb[57].mxu0 }
0x14b2   :  { %v3842_v23 = vpop.f32.mrb[58].mxu0 }
0x14b3   :  { %v9737_v24 = vadd.f32 %v3889_v19, %v3842_v23  ;;  %v8075_v30 = vpop.f32.mrb[59].mxu0 }
0x14b8   :  { %v8088_v10 = vpop.f32.mrb[54].mxu0 }
0x14b9   :  { %v3985_v33 = vmul.f32 0.35355338, %v8088_v10  ;;  %v3975_v13 = vpop.f32.mrb[55].mxu0 }
0x14ba   :  { %v3984_v34 = vmul.f32 0.35355338, %v3975_v13 }
0x14bb   :  { %v3987_v36 = vadd.f32 %v9680_v48, %v3985_v33 }
0x14bc   :  { %v3986_v39 = vadd.f32 %v9686_v54, %v3984_v34 }
0x14bd   :  { %v3991_v40 = vsel %vm264_vm8, %v3987_v36, -inf }
0x14be   :  { %3992 = vmax.xlane.f32.xlu0 %v3991_v40  ;;  %v3988_v41 = vsel %vm264_vm8, %v3986_v39, -inf }
0x14bf   :  { %3989 = vmax.xlane.f32.xlu1 %v3988_v41 }
0x14d0   :  { %8310 = vrot.lane.b32.xlu1 %v9654_v31, %s10482_s23 }
0x14d4   :  { %4147 = vrot.lane.b32.xlu1 %v9644_v17, %s10483_s0 }
0x14d8   :  { %4149 = vrot.lane.b32.xlu1 %v9646_v29, %s10483_s0 }
0x154b   :  { %v3993_v44 = vpop.xlane.xlu0 %3992 }
0x154c   :  { %v3995_v62 = vsub.f32 %v3987_v36, %v3993_v44  ;;  %v3990_v45 = vpop.xlane.xlu1 %3989 }
0x154d   :  { %v3994_v56 = vsub.f32 %v3986_v39, %v3990_v45 }
0x154e   :  { %v3998_v46 = vmul.f32 1.442695, %v3995_v62 }
0x154f   :  { %v3996_v47 = vmul.f32 1.442695, %v3994_v56 }
0x1550   :  { %8652 = vpow2.f32 %v3998_v46  ;;  %v8311_v51 = vpop.permute.xlu1 %8310 }
0x1551   :  { %v8313_v52 = vunpack.i.h.bf16 %v8311_v51  ;;  %v8312_v49 = vunpack.i.l.bf16 %v8311_v51  ;;  %8654 = vpow2.f32 %v3996_v47 }
0x1553   :  { %v8211_v35 = vpack.c.bf16 %v8313_v52, %v8312_v49 }
0x1554   :  { %v4148_v5 = vpop.permute.xlu1 %4147 }
0x1555   :  { %8212 = vmatprep.subr.bf16.mxu1 %v8211_v35 }
0x1556   :  { %8214 = vmatpush3.bf16.msra.mxu1 %v8211_v35 }
0x1558   :  { %v4150_v9 = vpop.permute.xlu1 %4149 }
0x155a   :  { %v8653_v55 = vpop.eup %8652 }
0x155b   :  { %v4003_v17 = vsel %vm264_vm8, %v8653_v55, 0.0  ;;  %v8655_v57 = vpop.eup %8654 }
0x155c   :  { %4004 = vadd.xlane.f32.xlu0 %v4003_v17  ;;  %v4000_v29 = vsel %vm264_vm8, %v8655_v57, 0.0 }
0x1560   :  { %4001 = vadd.xlane.f32.xlu0 %v4000_v29 }
0x1576   :  { %8315 = vrot.lane.b32.xlu0 %v9654_v31, %s10484_s1  ;;  %s10486_s1 = sld [smem:[#allocation7_spill]] }
0x15e9   :  { %v4005_v58 = vpop.xlane.xlu0 %4004 }
0x15ea   :  { %8656 = vrcp.f32 %v4005_v58 }
0x15ed   :  { %v4002_v26 = vpop.xlane.xlu0 %4001 }
0x15ee   :  { %8658 = vrcp.f32 %v4002_v26 }
0x15f1   :  { %v8316_v1 = vpop.permute.xlu0 %8315 }
0x15f2   :  { %v8318_v32 = vunpack.i.h.bf16 %v8316_v1  ;;  %v8317_v43 = vunpack.i.l.bf16 %v8316_v1 }
0x15f4   :  { %v8215_v15 = vpack.c.bf16 %v8318_v32, %v8317_v43  ;;  %v8657_v38 = vpop.eup %8656 }
0x15f5   :  { %v4009_v0 = vmul.f32 %v8657_v38, %v8653_v55 }
0x15f6   :  { %8217 = vmatprep.subr.msk.bf16.mxu1 %vm8877_vm7, %v8215_v15 }
0x15f8   :  { %v8659_v63 = vpop.eup %8658 }
0x15f9   :  { %v4007_v4 = vmul.f32 %v8659_v63, %v8655_v57 }
0x15fb   :  { %8093 = vmatprep.mubr.msk.f32.mxu1 %vm264_vm8, %v4007_v4 }
0x15fc   :  { %8094 = vmatmul.mubr.msk.f32.vlgmr.msra.gmra.mrb[58].mxu1 %vm264_vm8, %v4009_v0 }
0x15fd   :  { %8220 = vmatpush3.bf16.xpose.msk.msra.mxu1 %vm8877_vm7, %v8215_v15  ;;  %8106 = vmatprep.mubr.msk.f32.mxu1 %vm176_vm6, %v4148_v5  ;;  %v7021_v15 = vld [vmem:[%s10442_s6 + $0x1] ss:$0 sm:$0xff] }
0x15fe   :  { %8116 = vmatprep.subr.bf16.mxu1 %v8706_v8 }
0x1604   :  { %8107 = vmatmul.mubr.msk.f32.vlgmr.msra.gmra.mrb[64].mxu1 %vm176_vm6, %v4150_v9 }
0x1605   :  { %8118 = vmatprep.mubr.msk.bf16.mxu1 %vm8707_vm1, %v8706_v8 }
0x16cf   :  { %v8095_v50 = vpop.f32.mrb[58].mxu1 }
0x16d0   :  { %v4088_v42 = vpop.f32.mrb[59].mxu1 }
0x16d1   :  { %v4097_v14 = vpack.c.bf16 %v8095_v50, %v4088_v42 }
0x16d3   :  { %8099 = vmatmul.mubr.msk.bf16.vlgmr.msra.gmra.mrb[60].mxu0 %vm176_vm6, %v4097_v14 }
0x16d7   :  { %v8108_v53 = vpop.f32.mrb[64].mxu1 }
0x16d8   :  { %v4239_v18 = vmul.f32 0.35355338, %v8108_v53  ;;  %v4229_v19 = vpop.f32.mrb[65].mxu1 }
0x16d9   :  { %v4238_v20 = vmul.f32 0.35355338, %v4229_v19 }
0x16da   :  { %v4241_v25 = vadd.f32 %v9680_v48, %v4239_v18 }
0x16db   :  { %v4240_v16 = vadd.f32 %v9686_v54, %v4238_v20 }
0x16dc   :  { %v4245_v23 = vsel %vm264_vm8, %v4241_v25, -inf }
0x16dd   :  { %4246 = vmax.xlane.f32.xlu0 %v4245_v23  ;;  %v4242_v30 = vsel %vm264_vm8, %v4240_v16, -inf }
0x16de   :  { %4243 = vmax.xlane.f32.xlu1 %v4242_v30 }
0x16ef   :  { %8320 = vrot.lane.b32.xlu1 %v9654_v31, %s10485_s30 }
0x176a   :  { %v4247_v10 = vpop.xlane.xlu0 %4246 }
0x176b   :  { %v4249_v33 = vsub.f32 %v4241_v25, %v4247_v10  ;;  %v4244_v13 = vpop.xlane.xlu1 %4243 }
0x176c   :  { %v4248_v34 = vsub.f32 %v4240_v16, %v4244_v13  ;;  %v7027_v13 = vld [vmem:[%s10445_s9 + $0x108] sm:$0xff] }
0x176d   :  { %v4252_v36 = vmul.f32 1.442695, %v4249_v33  ;;  %v7034_v33 = vld [vmem:[%s10445_s9 + $0x140] sm:$0xff] }
0x176e   :  { %v4250_v39 = vmul.f32 1.442695, %v4248_v34 }
0x176f   :  { %v8321_v40 = vpop.permute.xlu1 %8320 }
0x1770   :  { %8660 = vpow2.f32 %v4250_v39  ;;  %v8323_v48 = vunpack.i.h.bf16 %v8321_v40  ;;  %v8322_v41 = vunpack.i.l.bf16 %v8321_v40 }
0x1771   :  { %8662 = vpow2.f32 %v4252_v36  ;;  %v7035_v36 = vld [vmem:[%s10445_s9 + $0x148] sm:$0xff] }
0x1772   :  { %v8221_v54 = vpack.c.bf16 %v8323_v48, %v8322_v41  ;;  %v7062_v40 = vcombine.low %v7027_v13, %v7035_v36  ;;  %v7063_v48 = vcombine.high %v7027_v13, %v7035_v36  ;;  %v7042_v41 = vld [vmem:[%s10445_s9 + $0x180] sm:$0xff]  ;;  %v7055_v36 = vld [vmem:[%s10445_s9 + $0x1e8] sm:$0xff] }
0x1773   :  { %v7054_v13 = vld [vmem:[%s10445_s9 + $0x1e0] sm:$0xff] }
0x1774   :  { %8222 = vmatprep.subr.bf16.mxu0 %v8221_v54 }
0x1775   :  { %8224 = vmatpush3.bf16.msra.mxu0 %v8221_v54  ;;  %v7050_v54 = vld [vmem:[%s10445_s9 + $0x1c0] sm:$0xff] }
0x177a   :  { %v8661_v44 = vpop.eup %8660 }
0x177b   :  { %v4254_v62 = vsel %vm264_vm8, %v8661_v44, 0.0  ;;  %v8663_v45 = vpop.eup %8662 }
0x177c   :  { %4255 = vadd.xlane.f32.xlu0 %v4254_v62  ;;  %v4257_v31 = vsel %vm264_vm8, %v8663_v45, 0.0  ;;  %v7077_v62 = vcombine.high %v7042_v41, %v7050_v54 }
0x1780   :  { %4258 = vadd.xlane.f32.xlu0 %v4257_v31  ;;  %v7076_v31 = vcombine.low %v7042_v41, %v7050_v54  ;;  %v7032_v54 = vld [vmem:[%s10445_s9 + $0x130] sm:$0xff] }
0x17a6   :  { %v4138_v56 = vpop.f32.mrb[60].mxu0 }
0x17a7   :  { %v4145_v46 = vadd.f32 %v4138_v56, %v9735_v27  ;;  %v8100_v47 = vpop.f32.mrb[61].mxu0  ;;  %v6986_v27 = vld [vmem:[%s10441_s5 + $0x1c] sm:$0xf] }
0x17a8   :  { %v4141_v51 = vpop.f32.mrb[62].mxu0  ;;  %v7028_v47 = vld [vmem:[%s10445_s9 + $0x110] sm:$0xff] }
0x17a9   :  { %v4146_v52 = vadd.f32 %v4141_v51, %v9737_v24  ;;  %v8101_v49 = vpop.f32.mrb[63].mxu0  ;;  %v4356_v24 = vsel %vm583_vm9, %v6986_v27, 0  ;;  %v7036_v51 = vld [vmem:[%s10445_s9 + $0x150] sm:$0xff] }
0x17aa   :  { %8117 = vmatpush3.bf16.msra.mxu1 %v4356_v24  ;;  %v7065_v49 = vcombine.high %v7028_v47, %v7036_v51 }
0x17ab   :  { %4784 = vmatprep.subr.bf16.mxu1 %v7063_v48 }
0x1809   :  { %v4256_v35 = vpop.xlane.xlu0 %4255 }
0x180a   :  { %8664 = vrcp.f32 %v4256_v35  ;;  %v7037_v35 = vld [vmem:[%s10445_s9 + $0x158] sm:$0xff] }
0x180d   :  { %v4259_v55 = vpop.xlane.xlu0 %4258 }
0x180e   :  { %8666 = vrcp.f32 %v4259_v55  ;;  %v7064_v55 = vcombine.low %v7028_v47, %v7036_v51  ;;  %v7048_v51 = vld [vmem:[%s10445_s9 + $0x1b0] sm:$0xff] }
0x1814   :  { %v8665_v17 = vpop.eup %8664 }
0x1815   :  { %v4261_v57 = vmul.f32 %v8665_v17, %v8661_v44  ;;  %v7043_v44 = vld [vmem:[%s10445_s9 + $0x188] sm:$0xff] }
0x1817   :  { %8113 = vmatprep.mubr.msk.f32.mxu0 %vm264_vm8, %v4261_v57 }
0x1818   :  { %v8667_v29 = vpop.eup %8666 }
0x1819   :  { %v4263_v58 = vmul.f32 %v8667_v29, %v8663_v45  ;;  %v7051_v45 = vld [vmem:[%s10445_s9 + $0x1c8] sm:$0xff] }
0x181a   :  { %v7078_v56 = vcombine.low %v7043_v44, %v7051_v45 }
0x181b   :  { %8114 = vmatmul.mubr.msk.f32.vlgmr.msra.gmra.mrb[64].mxu0 %vm264_vm8, %v4263_v58 }
0x181c   :  { %4773 = vmatprep.mubr.bf16.mxu0 %v8719_v37 }
0x18ee   :  { %v8115_v26 = vpop.f32.mrb[64].mxu0 }
0x18ef   :  { %v4342_v1 = vpop.f32.mrb[65].mxu0 }
0x18f0   :  { %v4351_v32 = vpack.c.bf16 %v8115_v26, %v4342_v1 }
0x18f2   :  { %8119 = vmatmul.mubr.msk.bf16.vlgmr.msra.gmra.mrb[68].mxu1 %vm176_vm6, %v4351_v32 }
0x18f3   :  { %4816 = vmatprep.mubr.bf16.mxu1 %v8719_v37  ;;  %4785 = vmatpush1.bf16.msra.mxu1 %v7062_v40 }
0x19c5   :  { %v4392_v43 = vpop.f32.mrb[68].mxu1 }
0x19c6   :  { %v4399_v38 = vadd.f32 %v4392_v43, %v4145_v46  ;;  %v8120_v63 = vpop.f32.mrb[69].mxu1  ;;  %v7079_v46 = vcombine.high %v7043_v44, %v7051_v45  ;;  %v7040_v44 = vld [vmem:[%s10445_s9 + $0x170] sm:$0xff]  ;;  %v7041_v45 = vld [vmem:[%s10445_s9 + $0x178] sm:$0xff] }
0x19c7   :  { %v4395_v4 = vpop.f32.mrb[70].mxu1 }
0x19c8   :  { %v4409_v0 = vadd.f32 %v7021_v15, %v4399_v38  ;;  %v4400_v5 = vadd.f32 %v4395_v4, %v4146_v52  ;;  %v8121_v9 = vpop.f32.mrb[71].mxu1  ;;  %4786 = vmatprep.subr.bf16.mxu1 %v7079_v46  ;;  %v7029_v52 = vld [vmem:[%s10445_s9 + $0x118] sm:$0xff]  ;;  %v7073_v46 = vcombine.high %v7032_v54, %v7040_v44 }
0x19c9   :  { %4787 = vmatpush1.bf16.msra.mxu1 %v7078_v56  ;;  %v7066_v17 = vcombine.low %v7029_v52, %v7037_v35  ;;  %v7067_v57 = vcombine.high %v7029_v52, %v7037_v35  ;;  %v7044_v9 = vld [vmem:[%s10445_s9 + $0x190] sm:$0xff]  ;;  %v7057_v35 = vld [vmem:[%s10445_s9 + $0x1f8] sm:$0xff] }
0x19ca   :  { %v4410_v11 = vadd.f32 %v7021_v15, %v4400_v5  ;;  %v4411_v12 = vadd.f32 %v4409_v0, %v9634_v21  ;;  %v7024_v15 = vld [vmem:[%s10443_s7 + $0x1] ss:$0 sm:$0xff]  ;;  %v7056_v52 = vld [vmem:[%s10445_s9 + $0x1f0] sm:$0xff] }
0x19cb   :  { %4870 = vmatprep.subr.bf16.mxu1 %v7067_v57  ;;  %v7025_v0 = vld [vmem:[%s10444_s8 + $0x1] ss:$0 sm:$0xff]  ;;  %v7089_v57 = vcombine.high %v7048_v51, %v7056_v52 }
0x19cc   :  { %v4417_v50 = vsel %vm71_vm0, %v4411_v12, 0.0  ;;  %v4412_v42 = vadd.f32 %v4410_v11, %v9636_v22  ;;  %v7026_v22 = vld [vmem:[%s10445_s9 + $0x100] sm:$0xff]  ;;  %v7052_v11 = vld [vmem:[%s10445_s9 + $0x1d0] sm:$0xff] }
0x19cd   :  { %4418 = vadd.xlane.f32.xlu0 %v4417_v50  ;;  %v7061_v34 = vcombine.high %v7026_v22, %v7034_v33  ;;  %v7060_v39 = vcombine.low %v7026_v22, %v7034_v33  ;;  %v7053_v50 = vld [vmem:[%s10445_s9 + $0x1d8] sm:$0xff]  ;;  %v7046_v33 = vld [vmem:[%s10445_s9 + $0x1a0] sm:$0xff] }
0x19ce   :  { %v4420_v14 = vsel %vm71_vm0, %v4412_v42, 0.0  ;;  %v7085_v48 = vcombine.high %v7046_v33, %v7054_v13 }
0x19cf   :  { %4741 = vmatprep.subr.bf16.mxu0 %v7061_v34  ;;  %v7047_v34 = vld [vmem:[%s10445_s9 + $0x1a8] sm:$0xff] }
0x19d0   :  { %4742 = vmatpush1.bf16.msra.mxu0 %v7060_v39  ;;  %v7087_v41 = vcombine.high %v7047_v34, %v7055_v36  ;;  %v7086_v56 = vcombine.low %v7047_v34, %v7055_v36  ;;  %v8485_v34 = vld [vmem:[%s10447_s11 + $0x4f8] sm:$0xff]  }
0x19d1   :  { %4421 = vadd.xlane.f32.xlu0 %v4420_v14  ;;  %4743 = vmatprep.subr.bf16.mxu0 %v7077_v62  ;;  %v7033_v62 = vld [vmem:[%s10445_s9 + $0x138] sm:$0xff] }
0x19d2   :  { %v7075_v47 = vcombine.high %v7033_v62, %v7041_v45  ;;  %v8486_v36 = vld [vmem:[%s10447_s11 + $0x438] sm:$0xff]  }
0x19d4   :  { %4744 = vmatpush1.bf16.msra.mxu0 %v7076_v31  ;;  %v7084_v31 = vcombine.low %v7046_v33, %v7054_v13  ;;  %v8483_v33 = vld [vmem:[%s10447_s11 + $0x4b0] sm:$0xff]   ;;  %v8484_v13 = vld [vmem:[%s10447_s11 + $0x478] sm:$0xff]  }
0x19d5   :  { %4827 = vmatprep.subr.bf16.mxu0 %v7065_v49  ;;  %v7049_v49 = vld [vmem:[%s10445_s9 + $0x1b8] sm:$0xff] }
0x1a5a   :  { %v4419_v53 = vpop.xlane.xlu0 %4418 }
0x1a5b   :  { %v4423_v18 = vmul.f32 0.03125, %v4419_v53 }
0x1a5d   :  { %v4425_v19 = vsub.f32 %v4411_v12, %v4423_v18  ;;  %v7045_v12 = vld [vmem:[%s10445_s9 + $0x198] sm:$0xff]  ;;  %v7081_v18 = vcombine.high %v7044_v9, %v7052_v11 }
0x1a5e   :  { %v4422_v20 = vpop.xlane.xlu0 %4421 }
0x1a5f   :  { %v4424_v25 = vmul.f32 0.03125, %v4422_v20  ;;  %v4427_v16 = vmul.f32 %v4425_v19, %v4425_v19  ;;  %v7030_v20 = vld [vmem:[%s10445_s9 + $0x120] sm:$0xff] }
0x1a61   :  { %v4426_v23 = vsub.f32 %v4412_v42, %v4424_v25  ;;  %v4429_v30 = vsel %vm71_vm0, %v4427_v16, 0.0  ;;  %v7038_v25 = vld [vmem:[%s10445_s9 + $0x160] sm:$0xff]  ;;  %v7031_v16 = vld [vmem:[%s10445_s9 + $0x128] sm:$0xff] }
0x1a62   :  { %4430 = vadd.xlane.f32.xlu0 %v4429_v30  ;;  %v7080_v30 = vcombine.low %v7044_v9, %v7052_v11  ;;  %v7068_v39 = vcombine.low %v7030_v20, %v7038_v25  ;;  %v8468_v9 = vld [vmem:[%s10447_s11 + $0x458] sm:$0xff]  }
0x1a63   :  { %v4428_v10 = vmul.f32 %v4426_v23, %v4426_v23  ;;  %v8469_v11 = vld [vmem:[%s10447_s11 + $0x4d8] sm:$0xff]  }
0x1a65   :  { %v4432_v21 = vsel %vm71_vm0, %v4428_v10, 0.0  ;;  %v7082_v10 = vcombine.low %v7045_v12, %v7053_v50 }
0x1a66   :  { %4433 = vadd.xlane.f32.xlu0 %v4432_v21  ;;  %v7069_v21 = vcombine.high %v7030_v20, %v7038_v25  ;;  %v8475_v20 = vld [vmem:[%s10447_s11 + $0x4a0] sm:$0xff]   ;;  %v8476_v25 = vld [vmem:[%s10447_s11 + $0x468] sm:$0xff]  }
0x1aef   :  { %v4431_v29 = vpop.xlane.xlu0 %4430 }
0x1af0   :  { %v4435_v58 = vmul.f32 0.03125, %v4431_v29  ;;  %v7091_v29 = vcombine.high %v7049_v49, %v7057_v35 }
0x1af2   :  { %v4437_v27 = vadd.f32 1e-05, %v4435_v58  ;;  %v7088_v58 = vcombine.low %v7048_v51, %v7056_v52 }
0x1af3   :  { %v4434_v24 = vpop.xlane.xlu0 %4433 }
0x1af4   :  { %8668 = vrsqrt.f32 %v4437_v27  ;;  %v4436_v26 = vmul.f32 0.03125, %v4434_v24  ;;  %v7090_v27 = vcombine.low %v7049_v49, %v7057_v35  ;;  %v8456_v24 = vld [vmem:[%s10447_s11 + $0x440] sm:$0xff]  }
0x1af6   :  { %v4438_v1 = vadd.f32 1e-05, %v4436_v26  ;;  %v8457_v26 = vld [vmem:[%s10447_s11 + $0x4c0] sm:$0xff]  }
0x1af8   :  { %8670 = vrsqrt.f32 %v4438_v1  ;;  %v8458_v1 = vld [vmem:[%s10447_s11 + $0x400] sm:$0xff]  }
0x1afe   :  { %v8669_v32 = vpop.eup %8668 }
0x1aff   :  { %v4441_v43 = vmul.f32 %v8669_v32, %v4425_v19  ;;  %v7083_v19 = vcombine.high %v7045_v12, %v7053_v50  ;;  %v8459_v32 = vld [vmem:[%s10447_s11 + $0x480] sm:$0xff]   ;;  %v8470_v12 = vld [vmem:[%s10447_s11 + $0x418] sm:$0xff]  }
0x1b00   :  { %v8471_v50 = vld [vmem:[%s10447_s11 + $0x498] sm:$0xff]  }
0x1b01   :  { %v4449_v63 = vmul.f32 %v7024_v15, %v4441_v43  ;;  %v8460_v43 = vld [vmem:[%s10447_s11 + $0x448] sm:$0xff]  }
0x1b02   :  { %v8671_v38 = vpop.eup %8670 }
0x1b03   :  { %v4442_v4 = vmul.f32 %v8671_v38, %v4426_v23  ;;  %v9851_v42 = vadd.f32 %v7025_v0, %v4449_v63  ;;  %v7039_v23 = vld [vmem:[%s10445_s9 + $0x168] sm:$0xff]  ;;  %v8464_v63 = vld [vmem:[%s10447_s11 + $0x450] sm:$0xff]  }
0x1b04   :  { %v7071_v22 = vcombine.high %v7031_v16, %v7039_v23  ;;  %v7070_v40 = vcombine.low %v7031_v16, %v7039_v23  ;;  %v8463_v38 = vld [vmem:[%s10447_s11 + $0x488] sm:$0xff]  }
0x1b05   :  { %v4450_v5 = vmul.f32 %v7024_v15, %v4442_v4  ;;  %v8462_v15 = vld [vmem:[%s10447_s11 + $0x408] sm:$0xff]   ;;  %v8465_v4 = vld [vmem:[%s10447_s11 + $0x4d0] sm:$0xff]  }
0x1b06   :  { %v8477_v16 = vld [vmem:[%s10447_s11 + $0x4e8] sm:$0xff]  }
0x1b07   :  { %v9853_v14 = vadd.f32 %v7025_v0, %v4450_v5  ;;  %v8466_v0 = vld [vmem:[%s10447_s11 + $0x410] sm:$0xff]   ;;  %v8478_v23 = vld [vmem:[%s10447_s11 + $0x428] sm:$0xff]  }
0x1b08   :  { %v8467_v5 = vld [vmem:[%s10447_s11 + $0x490] sm:$0xff]  }
0x1b09   :  { %v9857_v53 = vpack.c.bf16 %v9853_v14, %v9851_v42 }
0x1b0b   :  { %7092 = vmatmul.mubr.msk.bf16.vlgmr.msra.gmra.mrb[68].mxu0 %vm71_vm0, %v9857_v53  ;;  %7093 = vmatmul.mubr.msk.bf16.vlgmr.msra.gmra.mrb[72].mxu1 %vm71_vm0, %v9857_v53 }
0x1b0c   :  { %4828 = vmatpush1.bf16.msra.mxu0 %v7064_v55  ;;  %4871 = vmatpush1.bf16.msra.mxu1 %v7066_v17  ;;  %v7072_v55 = vcombine.low %v7032_v54, %v7040_v44  ;;  %v7074_v17 = vcombine.low %v7033_v62, %v7041_v45 }
0x1b0d   :  { %4829 = vmatprep.subr.bf16.mxu0 %v7081_v18  ;;  %4872 = vmatprep.subr.bf16.mxu1 %v7083_v19  ;;  %v8473_v18 = vld [vmem:[%s10447_s11 + $0x4e0] sm:$0xff]  }
0x1b0e   :  { %4859 = vmatprep.mubr.bf16.mxu0 %v8719_v37  ;;  %4902 = vmatprep.mubr.bf16.mxu1 %v8719_v37  ;;  %v8474_v19 = vld [vmem:[%s10447_s11 + $0x420] sm:$0xff]  }
0x1b10   :  { %4830 = vmatpush1.bf16.msra.mxu0 %v7080_v30  ;;  %4873 = vmatpush1.bf16.msra.mxu1 %v7082_v10  ;;  %v8479_v30 = vld [vmem:[%s10447_s11 + $0x4a8] sm:$0xff]   ;;  %v8480_v10 = vld [vmem:[%s10447_s11 + $0x470] sm:$0xff]  }
0x1b11   :  { %4913 = vmatprep.subr.bf16.mxu0 %v7069_v21  ;;  %4956 = vmatprep.subr.bf16.mxu1 %v7071_v22  ;;  %v8481_v21 = vld [vmem:[%s10447_s11 + $0x4f0] sm:$0xff]  }
0x1b12   :  { %v8482_v22 = vld [vmem:[%s10447_s11 + $0x430] sm:$0xff]  }
0x1b13   :  { %7094 = vmatmul.mubr.msk.bf16.vlgmr.msra.gmra.mrb[72].mxu0 %vm71_vm0, %v9857_v53  ;;  %7095 = vmatmul.mubr.msk.bf16.vlgmr.msra.gmra.mrb[76].mxu1 %vm71_vm0, %v9857_v53 }
0x1b14   :  { %4914 = vmatpush1.bf16.msra.mxu0 %v7068_v39  ;;  %4957 = vmatpush1.bf16.msra.mxu1 %v7070_v40  ;;  %v8487_v39 = vld [vmem:[%s10447_s11 + $0x4b8] sm:$0xff]   ;;  %v8488_v40 = vld [vmem:[%s10447_s11 + $0x540] sm:$0xff]  }
0x1b15   :  { %4915 = vmatprep.subr.bf16.mxu0 %v7085_v48  ;;  %4958 = vmatprep.subr.bf16.mxu1 %v7087_v41  ;;  %v8489_v48 = vld [vmem:[%s10447_s11 + $0x5c0] sm:$0xff]   ;;  %v7058_v41 = vld [vmem:[%s10446_s10 + $0x10] sm:$0xff] }
0x1b16   :  { %4945 = vmatprep.mubr.bf16.mxu0 %v8719_v37  ;;  %4988 = vmatprep.mubr.bf16.mxu1 %v8719_v37  ;;  %v4501_v54 = vrot.slane %v7058_v41, %v9249_v59  ;;  %v4509_v44 = vrot.slane %v7058_v41, %v9251_v60  ;;  %v4505_v62 = vrot.slane %v7058_v41, %v9256_v28 }
0x1b17   :  { %v4513_v45 = vrot.slane %v7058_v41, %v9258_v61 }
0x1b18   :  { %4916 = vmatpush1.bf16.msra.mxu0 %v7084_v31  ;;  %4959 = vmatpush1.bf16.msra.mxu1 %v7086_v56 }
0x1b19   :  { %4999 = vmatprep.subr.bf16.mxu0 %v7073_v46  ;;  %5042 = vmatprep.subr.bf16.mxu1 %v7075_v47 }
0x1b1b   :  { %7096 = vmatmul.mubr.msk.bf16.vlgmr.msra.gmra.mrb[76].mxu0 %vm71_vm0, %v9857_v53  ;;  %7097 = vmatmul.mubr.msk.bf16.vlgmr.msra.gmra.mrb[80].mxu1 %vm71_vm0, %v9857_v53 }
0x1b1c   :  { %5000 = vmatpush1.bf16.msra.mxu0 %v7072_v55  ;;  %5043 = vmatpush1.bf16.msra.mxu1 %v7074_v17 }
0x1b1d   :  { %5001 = vmatprep.subr.bf16.mxu0 %v7089_v57  ;;  %5044 = vmatprep.subr.bf16.mxu1 %v7091_v29 }
0x1b1e   :  { %5031 = vmatprep.mubr.bf16.mxu0 %v8719_v37  ;;  %5074 = vmatprep.mubr.bf16.mxu1 %v8719_v37  ;;  %v8461_v37 = vld [vmem:[%s10447_s11 + $0x4c8] sm:$0xff]  }
0x1b20   :  { %5002 = vmatpush1.bf16.msra.mxu0 %v7088_v58  ;;  %5045 = vmatpush1.bf16.msra.mxu1 %v7090_v27 }
0x1b21   :  { %7761 = vmatprep.subr.bf16.mxu0 %v8456_v24  ;;  %7783 = vmatprep.subr.bf16.mxu1 %v8457_v26  ;;  %v4517_v24 = vrot.slane %v7058_v41, %v9264_v2  ;;  %v4525_v26 = vrot.slane %v7058_v41, %v9266_v3 }
0x1b23   :  { %7098 = vmatmul.mubr.msk.bf16.vlgmr.msra.gmra.mrb[80].mxu0 %vm71_vm0, %v9857_v53  ;;  %7099 = vmatmul.mubr.msk.bf16.vlgmr.msra.gmra.mrb[84].mxu1 %vm71_vm0, %v9857_v53  ;;  %v8472_v53 = vld [vmem:[%s10447_s11 + $0x460] sm:$0xff]  }
0x1b24   :  { %7762 = vmatpush3.bf16.msra.mxu0 %v8458_v1  ;;  %7784 = vmatpush3.bf16.msra.mxu1 %v8459_v32 }
0x1b25   :  { %7763 = vmatprep.subr.bf16.mxu0 %v8460_v43  ;;  %7785 = vmatprep.subr.bf16.mxu1 %v8461_v37  ;;  %v4521_v43 = vrot.slane %v7058_v41, %v9268_v6  ;;  %v4529_v37 = vrot.slane %v7058_v41, %v9270_v7 }
0x1b28   :  { %7764 = vmatpush3.bf16.msra.mxu0 %v8462_v15  ;;  %7786 = vmatpush3.bf16.msra.mxu1 %v8463_v38 }
0x1b29   :  { %7765 = vmatprep.subr.bf16.mxu0 %v8464_v63  ;;  %7787 = vmatprep.subr.bf16.mxu1 %v8465_v4 }
0x1b2c   :  { %7766 = vmatpush3.bf16.msra.mxu0 %v8466_v0  ;;  %7788 = vmatpush3.bf16.msra.mxu1 %v8467_v5 }
0x1b2d   :  { %7767 = vmatprep.subr.bf16.mxu0 %v8468_v9  ;;  %7789 = vmatprep.subr.bf16.mxu1 %v8469_v11 }
0x1b30   :  { %7768 = vmatpush3.bf16.msra.mxu0 %v8470_v12  ;;  %7790 = vmatpush3.bf16.msra.mxu1 %v8471_v50  ;;  %v10045_v12 = vld [vmem:[%s10446_s10 + $0x18] sm:$0xff] }
0x1b31   :  { %7769 = vmatprep.subr.bf16.mxu0 %v8472_v53  ;;  %7791 = vmatprep.subr.bf16.mxu1 %v8473_v18  ;;  %v4541_v41 = vrot.slane %v10045_v12, %v9251_v60  ;;  %v8495_v60 = vld [vmem:[%s10447_s11 + $0x588] sm:$0xff]  }
0x1b34   :  { %7770 = vmatpush3.bf16.msra.mxu0 %v8474_v19  ;;  %7792 = vmatpush3.bf16.msra.mxu1 %v8475_v20 }
0x1b35   :  { %7771 = vmatprep.subr.bf16.mxu0 %v8476_v25  ;;  %7793 = vmatprep.subr.bf16.mxu1 %v8477_v16  ;;  %v8490_v16 = vld [vmem:[%s10447_s11 + $0x500] sm:$0xff]  }
0x1b38   :  { %7772 = vmatpush3.bf16.msra.mxu0 %v8478_v23  ;;  %7794 = vmatpush3.bf16.msra.mxu1 %v8479_v30  ;;  %v8491_v23 = vld [vmem:[%s10447_s11 + $0x580] sm:$0xff]  }
0x1b39   :  { %7773 = vmatprep.subr.bf16.mxu0 %v8480_v10  ;;  %7795 = vmatprep.subr.bf16.mxu1 %v8481_v21 }
0x1b3c   :  { %7774 = vmatpush3.bf16.msra.mxu0 %v8482_v22  ;;  %7796 = vmatpush3.bf16.msra.mxu1 %v8483_v33  ;;  %v8492_v33 = vld [vmem:[%s10447_s11 + $0x548] sm:$0xff]  }
0x1b3d   :  { %7775 = vmatprep.subr.bf16.mxu0 %v8484_v13  ;;  %7797 = vmatprep.subr.bf16.mxu1 %v8485_v34  ;;  %v8493_v13 = vld [vmem:[%s10447_s11 + $0x5c8] sm:$0xff]   ;;  %v4533_v34 = vrot.slane %v10045_v12, %v9249_v59 }
0x1b40   :  { %7776 = vmatpush3.bf16.msra.mxu0 %v8486_v36  ;;  %7798 = vmatpush3.bf16.msra.mxu1 %v8487_v39 }
0x1b41   :  { %7805 = vmatprep.subr.bf16.mxu0 %v8488_v40  ;;  %7827 = vmatprep.subr.bf16.mxu1 %v8489_v48 }
0x1bde   :  { %v4775_v31 = vpop.f32.mrb[68].mxu0  ;;  %v4818_v56 = vpop.f32.mrb[72].mxu1 }
0x1bdf   :  { %v4776_v46 = vadd.f32 %v4775_v31, %v4501_v54  ;;  %v4819_v47 = vadd.f32 %v4818_v56, %v4509_v44  ;;  %v4777_v51 = vpop.f32.mrb[69].mxu0  ;;  %v4820_v52 = vpop.f32.mrb[73].mxu1  ;;  %v4537_v31 = vrot.slane %v10045_v12, %v9256_v28  ;;  %v8496_v28 = vld [vmem:[%s10447_s11 + $0x550] sm:$0xff]  }
0x1be0   :  { %v4778_v49 = vadd.f32 %v4777_v51, %v4505_v62  ;;  %v4821_v35 = vadd.f32 %v4820_v52, %v4513_v45  ;;  %v4779_v55 = vpop.f32.mrb[70].mxu0  ;;  %v4822_v17 = vpop.f32.mrb[74].mxu1 }
0x1be1   :  { %v4780_v57 = vadd.f32 %v4779_v55, %v4501_v54  ;;  %v4823_v29 = vadd.f32 %v4822_v17, %v4509_v44  ;;  %v4781_v58 = vpop.f32.mrb[71].mxu0  ;;  %v4824_v27 = vpop.f32.mrb[75].mxu1  ;;  %v5085_v15 = vmax.f32 %v4776_v46, 0.0  ;;  %v5087_v38 = vmax.f32 %v4819_v47, 0.0  ;;  %v8494_v46 = vld [vmem:[%s10447_s11 + $0x508] sm:$0xff]   ;;  %v8497_v55 = vld [vmem:[%s10447_s11 + $0x5d0] sm:$0xff]  }
0x1be2   :  { %v4782_v1 = vadd.f32 %v4781_v58, %v4505_v62  ;;  %v4825_v32 = vadd.f32 %v4824_v27, %v4513_v45  ;;  %v5086_v0 = vmax.f32 %v4778_v49, 0.0  ;;  %v5088_v5 = vmax.f32 %v4821_v35, 0.0 }
0x1be3   :  { %v5101_v63 = vmax.f32 %v4780_v57, 0.0  ;;  %v5103_v4 = vmax.f32 %v4823_v29, 0.0  ;;  %v4545_v47 = vrot.slane %v10045_v12, %v9258_v61 }
0x1be4   :  { %v5102_v9 = vmax.f32 %v4782_v1, 0.0  ;;  %v5104_v11 = vmax.f32 %v4825_v32, 0.0 }
0x1be5   :  { %v5117_v50 = vpack.c.bf16 %v5101_v63, %v5085_v15  ;;  %v5119_v53 = vpack.c.bf16 %v5103_v4, %v5087_v38 }
0x1be6   :  { %v5118_v18 = vpack.c.bf16 %v5102_v9, %v5086_v0  ;;  %v5120_v19 = vpack.c.bf16 %v5104_v11, %v5088_v5  ;;  %v4861_v20 = vpop.f32.mrb[72].mxu0  ;;  %v4904_v25 = vpop.f32.mrb[76].mxu1  ;;  %v8500_v0 = vld [vmem:[%s10447_s11 + $0x558] sm:$0xff]  }
0x1be7   :  { %v4862_v30 = vadd.f32 %v4861_v20, %v4517_v24  ;;  %v4905_v10 = vadd.f32 %v4904_v25, %v4525_v26  ;;  %v4863_v21 = vpop.f32.mrb[73].mxu0  ;;  %v4906_v22 = vpop.f32.mrb[77].mxu1  ;;  %v8501_v5 = vld [vmem:[%s10447_s11 + $0x5d8] sm:$0xff]  }
0x1be8   :  { %v4864_v36 = vadd.f32 %v4863_v21, %v4521_v43  ;;  %v4907_v39 = vadd.f32 %v4906_v22, %v4529_v37  ;;  %v4865_v40 = vpop.f32.mrb[74].mxu0  ;;  %v4908_v48 = vpop.f32.mrb[78].mxu1  ;;  %6198 = vmatprep.mubr.bf16.mxu0 %v5118_v18  ;;  %6239 = vmatprep.mubr.bf16.mxu1 %v5120_v19  ;;  %v4549_v18 = vrot.slane %v10045_v12, %v9264_v2  ;;  %v8502_v22 = vld [vmem:[%s10447_s11 + $0x518] sm:$0xff]  }
0x1be9   :  { %v4866_v54 = vadd.f32 %v4865_v40, %v4517_v24  ;;  %v4909_v44 = vadd.f32 %v4908_v48, %v4525_v26  ;;  %v4867_v62 = vpop.f32.mrb[75].mxu0  ;;  %v4910_v45 = vpop.f32.mrb[79].mxu1  ;;  %6199 = vmatmul.mubr.bf16.vlgmr.msra.gmra.mrb[84].mxu0 %v5117_v50  ;;  %6240 = vmatmul.mubr.bf16.vlgmr.msra.gmra.mrb[88].mxu1 %v5119_v53  ;;  %v5089_v51 = vmax.f32 %v4862_v30, 0.0  ;;  %v5091_v52 = vmax.f32 %v4905_v10, 0.0  ;;  %v8503_v2 = vld [vmem:[%s10447_s11 + $0x598] sm:$0xff]  }
0x1bea   :  { %v4868_v56 = vadd.f32 %v4867_v62, %v4521_v43  ;;  %v4911_v59 = vadd.f32 %v4910_v45, %v4529_v37  ;;  %7806 = vmatpush3.bf16.msra.mxu0 %v8490_v16  ;;  %7828 = vmatpush3.bf16.msra.mxu1 %v8491_v23  ;;  %v5090_v17 = vmax.f32 %v4864_v36, 0.0  ;;  %v5092_v57 = vmax.f32 %v4907_v39, 0.0  ;;  %v8498_v43 = vld [vmem:[%s10447_s11 + $0x510] sm:$0xff]   ;;  %v8505_v39 = vld [vmem:[%s10447_s11 + $0x5e0] sm:$0xff]  }
0x1beb   :  { %v5105_v49 = vmax.f32 %v4866_v54, 0.0  ;;  %v5107_v35 = vmax.f32 %v4909_v44, 0.0  ;;  %7807 = vmatprep.subr.bf16.mxu0 %v8492_v33  ;;  %7829 = vmatprep.subr.bf16.mxu1 %v8493_v13  ;;  %v8499_v37 = vld [vmem:[%s10447_s11 + $0x590] sm:$0xff]   ;;  %v4557_v23 = vrot.slane %v10045_v12, %v9266_v3  ;;  %v4553_v30 = vrot.slane %v10045_v12, %v9268_v6  ;;  %v8504_v6 = vld [vmem:[%s10447_s11 + $0x560] sm:$0xff]  }
0x1bec   :  { %v5106_v29 = vmax.f32 %v4868_v56, 0.0  ;;  %v5108_v58 = vmax.f32 %v4911_v59, 0.0  ;;  %v4561_v33 = vrot.slane %v10045_v12, %v9270_v7  ;;  %v8506_v56 = vld [vmem:[%s10447_s11 + $0x520] sm:$0xff]  }
0x1bed   :  { %v10079_v27 = vpack.c.bf16 %v5105_v49, %v5089_v51  ;;  %v10081_v61 = vpack.c.bf16 %v5107_v35, %v5091_v52  ;;  %v8507_v59 = vld [vmem:[%s10447_s11 + $0x5a0] sm:$0xff]   ;;  %v8508_v52 = vld [vmem:[%s10447_s11 + $0x568] sm:$0xff]  }
0x1bee   :  { %v5122_v24 = vpack.c.bf16 %v5106_v29, %v5090_v17  ;;  %v5124_v26 = vpack.c.bf16 %v5108_v58, %v5092_v57  ;;  %7808 = vmatpush3.bf16.msra.mxu0 %v8494_v46  ;;  %7830 = vmatpush3.bf16.msra.mxu1 %v8495_v60  ;;  %v4947_v1 = vpop.f32.mrb[76].mxu0  ;;  %v4990_v32 = vpop.f32.mrb[80].mxu1  ;;  %v8509_v49 = vld [vmem:[%s10447_s11 + $0x5e8] sm:$0xff]  }
0x1bef   :  { %v4948_v15 = vadd.f32 %v4947_v1, %v4533_v34  ;;  %v4991_v38 = vadd.f32 %v4990_v32, %v4541_v41  ;;  %v4949_v63 = vpop.f32.mrb[77].mxu0  ;;  %v4992_v4 = vpop.f32.mrb[81].mxu1  ;;  %7809 = vmatprep.subr.bf16.mxu0 %v8496_v28  ;;  %7831 = vmatprep.subr.bf16.mxu1 %v8497_v55  ;;  %v8510_v32 = vld [vmem:[%s10447_s11 + $0x528] sm:$0xff]  }
0x1bf0   :  { %v4950_v9 = vadd.f32 %v4949_v63, %v4537_v31  ;;  %v4993_v11 = vadd.f32 %v4992_v4, %v4545_v47  ;;  %v4951_v50 = vpop.f32.mrb[78].mxu0  ;;  %v4994_v53 = vpop.f32.mrb[82].mxu1  ;;  %6280 = vmatprep.mubr.bf16.mxu0 %v5122_v24  ;;  %6321 = vmatprep.mubr.bf16.mxu1 %v5124_v26  ;;  %v8512_v4 = vld [vmem:[%s10447_s11 + $0x570] sm:$0xff]  }
0x1bf1   :  { %v4952_v19 = vadd.f32 %v4951_v50, %v4533_v34  ;;  %v4995_v20 = vadd.f32 %v4994_v53, %v4541_v41  ;;  %v4953_v25 = vpop.f32.mrb[79].mxu0  ;;  %v4996_v16 = vpop.f32.mrb[83].mxu1  ;;  %v5093_v13 = vmax.f32 %v4948_v15, 0.0  ;;  %v5095_v3 = vmax.f32 %v4991_v38, 0.0 }
0x1bf2   :  { %v4954_v10 = vadd.f32 %v4953_v25, %v4537_v31  ;;  %v4997_v21 = vadd.f32 %v4996_v16, %v4545_v47  ;;  %7810 = vmatpush3.bf16.msra.mxu0 %v8498_v43  ;;  %7832 = vmatpush3.bf16.msra.mxu1 %v8499_v37  ;;  %v5094_v40 = vmax.f32 %v4950_v9, 0.0  ;;  %v5096_v48 = vmax.f32 %v4993_v11, 0.0  ;;  %v8511_v43 = vld [vmem:[%s10447_s11 + $0x5a8] sm:$0xff]   ;;  %v8514_v25 = vld [vmem:[%s10447_s11 + $0x530] sm:$0xff]  }
0x1bf3   :  { %v5109_v34 = vmax.f32 %v4952_v19, 0.0  ;;  %v5111_v36 = vmax.f32 %v4995_v20, 0.0  ;;  %7811 = vmatprep.subr.bf16.mxu0 %v8500_v0  ;;  %7833 = vmatprep.subr.bf16.mxu1 %v8501_v5  ;;  %v8513_v0 = vld [vmem:[%s10447_s11 + $0x5f0] sm:$0xff]  }
0x1bf4   :  { %v5110_v41 = vmax.f32 %v4954_v10, 0.0  ;;  %v5112_v54 = vmax.f32 %v4997_v21, 0.0  ;;  %v8515_v16 = vld [vmem:[%s10447_s11 + $0x5b0] sm:$0xff]   ;;  %v8518_v10 = vld [vmem:[%s10447_s11 + $0x538] sm:$0xff]  }
0x1bf5   :  { %v10115_v44 = vpack.c.bf16 %v5109_v34, %v5093_v13  ;;  %v10117_v7 = vpack.c.bf16 %v5111_v36, %v5095_v3  ;;  %v8519_v21 = vld [vmem:[%s10447_s11 + $0x5b8] sm:$0xff]   ;;  %v8523_v13 = vld [vmem:[%s10447_s11 + $0x680] sm:$0xff]   ;;  %v8524_v3 = vld [vmem:[%s10447_s11 + $0x648] sm:$0xff]  }
0x1bf6   :  { %v10119_v12 = vpack.c.bf16 %v5110_v41, %v5094_v40  ;;  %v10121_v62 = vpack.c.bf16 %v5112_v54, %v5096_v48  ;;  %7812 = vmatpush3.bf16.msra.mxu0 %v8502_v22  ;;  %7834 = vmatpush3.bf16.msra.mxu1 %v8503_v2  ;;  %v5033_v45 = vpop.f32.mrb[80].mxu0  ;;  %v5076_v31 = vpop.f32.mrb[84].mxu1  ;;  %v8520_v22 = vld [vmem:[%s10447_s11 + $0x640] sm:$0xff]   ;;  %v8525_v34 = vld [vmem:[%s10447_s11 + $0x6c8] sm:$0xff]   ;;  %v8531_v40 = vld [vmem:[%s10447_s11 + $0x690] sm:$0xff]  }
0x1bf7   :  { %v5034_v46 = vadd.f32 %v5033_v45, %v4549_v18  ;;  %v5077_v60 = vadd.f32 %v5076_v31, %v4557_v23  ;;  %v5035_v47 = vpop.f32.mrb[81].mxu0  ;;  %v5078_v51 = vpop.f32.mrb[85].mxu1  ;;  %7813 = vmatprep.subr.bf16.mxu0 %v8504_v6  ;;  %7835 = vmatprep.subr.bf16.mxu1 %v8505_v39  ;;  %v8521_v2 = vld [vmem:[%s10447_s11 + $0x6c0] sm:$0xff]   ;;  %v8526_v36 = vld [vmem:[%s10447_s11 + $0x608] sm:$0xff]   ;;  %v8530_v39 = vld [vmem:[%s10447_s11 + $0x610] sm:$0xff]  }
0x1bf8   :  { %v5036_v35 = vadd.f32 %v5035_v47, %v4553_v30  ;;  %v5079_v28 = vadd.f32 %v5078_v51, %v4561_v33  ;;  %v5037_v55 = vpop.f32.mrb[82].mxu0  ;;  %v5080_v17 = vpop.f32.mrb[86].mxu1  ;;  %v8527_v6 = vld [vmem:[%s10447_s11 + $0x688] sm:$0xff]   ;;  %v8532_v48 = vld [vmem:[%s10447_s11 + $0x658] sm:$0xff]   ;;  %v8537_v45 = vld [vmem:[%s10447_s11 + $0x6e0] sm:$0xff]  }
0x1bf9   :  { %v5038_v57 = vadd.f32 %v5037_v55, %v4549_v18  ;;  %v5081_v29 = vadd.f32 %v5080_v17, %v4557_v23  ;;  %v5039_v58 = vpop.f32.mrb[83].mxu0  ;;  %v5082_v24 = vpop.f32.mrb[87].mxu1  ;;  %v5097_v37 = vmax.f32 %v5034_v46, 0.0  ;;  %v5099_v15 = vmax.f32 %v5077_v60, 0.0  ;;  %v8516_v23 = vld [vmem:[%s10447_s11 + $0x578] sm:$0xff]   ;;  %v8538_v31 = vld [vmem:[%s10447_s11 + $0x620] sm:$0xff]  }
0x1bfa   :  { %v5040_v26 = vadd.f32 %v5039_v58, %v4553_v30  ;;  %v5083_v1 = vadd.f32 %v5082_v24, %v4561_v33  ;;  %7814 = vmatpush3.bf16.msra.mxu0 %v8506_v56  ;;  %7836 = vmatpush3.bf16.msra.mxu1 %v8507_v59  ;;  %v5098_v5 = vmax.f32 %v5036_v35, 0.0  ;;  %v5100_v9 = vmax.f32 %v5079_v28, 0.0  ;;  %v8517_v30 = vld [vmem:[%s10447_s11 + $0x5f8] sm:$0xff]   ;;  %v8522_v33 = vld [vmem:[%s10447_s11 + $0x600] sm:$0xff]   ;;  %v8540_v59 = vld [vmem:[%s10447_s11 + $0x668] sm:$0xff]  }
0x1bfb   :  { %v5113_v38 = vmax.f32 %v5038_v57, 0.0  ;;  %v5115_v63 = vmax.f32 %v5081_v29, 0.0  ;;  %7815 = vmatprep.subr.bf16.mxu0 %v8508_v52  ;;  %7837 = vmatprep.subr.bf16.mxu1 %v8509_v49  ;;  %v8533_v41 = vld [vmem:[%s10447_s11 + $0x6d8] sm:$0xff]   ;;  %v8539_v56 = vld [vmem:[%s10447_s11 + $0x6a0] sm:$0xff]   ;;  %v8541_v46 = vld [vmem:[%s10447_s11 + $0x6e8] sm:$0xff]  }
0x1bfc   :  { %v5114_v11 = vmax.f32 %v5040_v26, 0.0  ;;  %v5116_v50 = vmax.f32 %v5083_v1, 0.0  ;;  %v8534_v54 = vld [vmem:[%s10447_s11 + $0x618] sm:$0xff]   ;;  %v8542_v60 = vld [vmem:[%s10447_s11 + $0x628] sm:$0xff]   ;;  %v8544_v51 = vld [vmem:[%s10447_s11 + $0x670] sm:$0xff]  }
0x1bfd   :  { %v10147_v53 = vpack.c.bf16 %v5113_v38, %v5097_v37  ;;  %v10149_v18 = vpack.c.bf16 %v5115_v63, %v5099_v15  ;;  %v8543_v47 = vld [vmem:[%s10447_s11 + $0x6a8] sm:$0xff]   ;;  %v8545_v52 = vld [vmem:[%s10447_s11 + $0x6f0] sm:$0xff]   ;;  %v8548_v28 = vld [vmem:[%s10447_s11 + $0x678] sm:$0xff]  }
0x1bfe   :  { %v10151_v19 = vpack.c.bf16 %v5114_v11, %v5098_v5  ;;  %v10153_v20 = vpack.c.bf16 %v5116_v50, %v5100_v9  ;;  %7816 = vmatpush3.bf16.msra.mxu0 %v8510_v32  ;;  %7838 = vmatpush3.bf16.msra.mxu1 %v8511_v43  ;;  %v8546_v49 = vld [vmem:[%s10447_s11 + $0x630] sm:$0xff]   ;;  %v8549_v55 = vld [vmem:[%s10447_s11 + $0x6f8] sm:$0xff]   ;;  %v8552_v29 = vld [vmem:[%s10447_s11 + $0x740] sm:$0xff]  }
0x1bff   :  { %7817 = vmatprep.subr.bf16.mxu0 %v8512_v4  ;;  %7839 = vmatprep.subr.bf16.mxu1 %v8513_v0  ;;  %v8547_v35 = vld [vmem:[%s10447_s11 + $0x6b0] sm:$0xff]   ;;  %v8550_v17 = vld [vmem:[%s10447_s11 + $0x638] sm:$0xff]   ;;  %v8553_v58 = vld [vmem:[%s10447_s11 + $0x7c0] sm:$0xff]  }
0x1c00   :  { %v8551_v57 = vld [vmem:[%s10447_s11 + $0x6b8] sm:$0xff]   ;;  %v8554_v24 = vld [vmem:[%s10447_s11 + $0x700] sm:$0xff]   ;;  %v8556_v1 = vld [vmem:[%s10447_s11 + $0x748] sm:$0xff]  }
0x1c01   :  { %v8555_v26 = vld [vmem:[%s10447_s11 + $0x780] sm:$0xff]   ;;  %v8557_v32 = vld [vmem:[%s10447_s11 + $0x7c8] sm:$0xff]   ;;  %v8562_v15 = vld [vmem:[%s10447_s11 + $0x710] sm:$0xff]  }
0x1c02   :  { %7818 = vmatpush3.bf16.msra.mxu0 %v8514_v25  ;;  %7840 = vmatpush3.bf16.msra.mxu1 %v8515_v16  ;;  %v8558_v43 = vld [vmem:[%s10447_s11 + $0x708] sm:$0xff]   ;;  %v8563_v38 = vld [vmem:[%s10447_s11 + $0x790] sm:$0xff]   ;;  %v8564_v63 = vld [vmem:[%s10447_s11 + $0x758] sm:$0xff]  }
0x1c03   :  { %7819 = vmatprep.subr.bf16.mxu0 %v8516_v23  ;;  %7841 = vmatprep.subr.bf16.mxu1 %v8517_v30  ;;  %v8559_v37 = vld [vmem:[%s10447_s11 + $0x788] sm:$0xff]   ;;  %v8565_v4 = vld [vmem:[%s10447_s11 + $0x7d8] sm:$0xff]   ;;  %v8568_v9 = vld [vmem:[%s10447_s11 + $0x760] sm:$0xff]  }
0x1c04   :  { %v8566_v0 = vld [vmem:[%s10447_s11 + $0x718] sm:$0xff]   ;;  %v8569_v11 = vld [vmem:[%s10447_s11 + $0x7e0] sm:$0xff]   ;;  %v8573_v25 = vld [vmem:[%s10447_s11 + $0x7e8] sm:$0xff]  }
0x1c05   :  { %v8567_v5 = vld [vmem:[%s10447_s11 + $0x798] sm:$0xff]   ;;  %v8570_v50 = vld [vmem:[%s10447_s11 + $0x720] sm:$0xff]   ;;  %v8574_v16 = vld [vmem:[%s10447_s11 + $0x728] sm:$0xff]  }
0x1c06   :  { %7820 = vmatpush3.bf16.msra.mxu0 %v8518_v10  ;;  %7842 = vmatpush3.bf16.msra.mxu1 %v8519_v21  ;;  %v8575_v23 = vld [vmem:[%s10447_s11 + $0x7a8] sm:$0xff]   ;;  %v8576_v30 = vld [vmem:[%s10447_s11 + $0x770] sm:$0xff]  }
0x1c07   :  { %7849 = vmatprep.subr.bf16.mxu0 %v8520_v22  ;;  %7871 = vmatprep.subr.bf16.mxu1 %v8521_v2  ;;  %v8577_v10 = vld [vmem:[%s10447_s11 + $0x7f0] sm:$0xff]   ;;  %v8580_v2 = vld [vmem:[%s10447_s11 + $0x778] sm:$0xff]  }
0x1c08   :  { %v8578_v21 = vld [vmem:[%s10447_s11 + $0x730] sm:$0xff]  }
0x1c09   :  { %6281 = vmatmul.mubr.bf16.vlgmr.msra.gmra.mrb[88].mxu0 %v10079_v27  ;;  %6322 = vmatmul.mubr.bf16.vlgmr.msra.gmra.mrb[92].mxu1 %v10081_v61  ;;  %v8528_v27 = vld [vmem:[%s10447_s11 + $0x650] sm:$0xff]  }
0x1c0a   :  { %7850 = vmatpush3.bf16.msra.mxu0 %v8522_v33  ;;  %6362 = vmatprep.mubr.bf16.mxu0 %v10119_v12  ;;  %v8529_v61 = vld [vmem:[%s10447_s11 + $0x6d0] sm:$0xff]   ;;  %v8535_v12 = vld [vmem:[%s10447_s11 + $0x698] sm:$0xff]  }
0x1c0b   :  { %7872 = vmatpush3.bf16.msra.mxu1 %v8523_v13  ;;  %6403 = vmatprep.mubr.bf16.mxu1 %v10121_v62  ;;  %v8536_v62 = vld [vmem:[%s10447_s11 + $0x660] sm:$0xff]   ;;  %v8579_v22 = vld [vmem:[%s10447_s11 + $0x7b0] sm:$0xff]   ;;  %v8581_v33 = vld [vmem:[%s10447_s11 + $0x7f8] sm:$0xff]  }
0x1c0c   :  { %7851 = vmatprep.subr.bf16.mxu0 %v8524_v3  ;;  %7873 = vmatprep.subr.bf16.mxu1 %v8525_v34  ;;  %v8582_v13 = vld [vmem:[%s10447_s11 + $0x738] sm:$0xff]  }
0x1c0d   :  { %v8583_v3 = vld [vmem:[%s10447_s11 + $0x7b8] sm:$0xff]  }
0x1c0e   :  { %7852 = vmatpush3.bf16.msra.mxu0 %v8526_v36 }
0x1c0f   :  { %7874 = vmatpush3.bf16.msra.mxu1 %v8527_v6  ;;  %7853 = vmatprep.subr.bf16.mxu0 %v8528_v27  ;;  %v7357_v6 = vld [vmem:[%s10448_s12 + $0x1] ss:$0 sm:$0xff] }
0x1c10   :  { %7875 = vmatprep.subr.bf16.mxu1 %v8529_v61 }
0x1c12   :  { %7854 = vmatpush3.bf16.msra.mxu0 %v8530_v39 }
0x1c13   :  { %7876 = vmatpush3.bf16.msra.mxu1 %v8531_v40  ;;  %7855 = vmatprep.subr.bf16.mxu0 %v8532_v48 }
0x1c14   :  { %7877 = vmatprep.subr.bf16.mxu1 %v8533_v41 }
0x1c16   :  { %7856 = vmatpush3.bf16.msra.mxu0 %v8534_v54 }
0x1c17   :  { %7878 = vmatpush3.bf16.msra.mxu1 %v8535_v12  ;;  %7857 = vmatprep.subr.bf16.mxu0 %v8536_v62 }
0x1c18   :  { %7879 = vmatprep.subr.bf16.mxu1 %v8537_v45 }
0x1c1a   :  { %7858 = vmatpush3.bf16.msra.mxu0 %v8538_v31 }
0x1c1b   :  { %7880 = vmatpush3.bf16.msra.mxu1 %v8539_v56  ;;  %7859 = vmatprep.subr.bf16.mxu0 %v8540_v59 }
0x1c1c   :  { %7881 = vmatprep.subr.bf16.mxu1 %v8541_v46 }
0x1c1e   :  { %7860 = vmatpush3.bf16.msra.mxu0 %v8542_v60 }
0x1c1f   :  { %7882 = vmatpush3.bf16.msra.mxu1 %v8543_v47  ;;  %7861 = vmatprep.subr.bf16.mxu0 %v8544_v51 }
0x1c20   :  { %7883 = vmatprep.subr.bf16.mxu1 %v8545_v52 }
0x1c22   :  { %7862 = vmatpush3.bf16.msra.mxu0 %v8546_v49 }
0x1c23   :  { %7884 = vmatpush3.bf16.msra.mxu1 %v8547_v35  ;;  %7863 = vmatprep.subr.bf16.mxu0 %v8548_v28 }
0x1c24   :  { %7885 = vmatprep.subr.bf16.mxu1 %v8549_v55 }
0x1c26   :  { %7864 = vmatpush3.bf16.msra.mxu0 %v8550_v17 }
0x1c27   :  { %7886 = vmatpush3.bf16.msra.mxu1 %v8551_v57  ;;  %7893 = vmatprep.subr.bf16.mxu0 %v8552_v29 }
0x1c28   :  { %7915 = vmatprep.subr.bf16.mxu1 %v8553_v58 }
0x1c29   :  { %6363 = vmatmul.mubr.bf16.vlgmr.msra.gmra.mrb[92].mxu0 %v10115_v44  ;;  %v8560_v44 = vld [vmem:[%s10447_s11 + $0x750] sm:$0xff]  }
0x1c2a   :  { %6404 = vmatmul.mubr.bf16.vlgmr.msra.gmra.mrb[96].mxu1 %v10117_v7  ;;  %7894 = vmatpush3.bf16.msra.mxu0 %v8554_v24  ;;  %v8561_v7 = vld [vmem:[%s10447_s11 + $0x7d0] sm:$0xff]  }
0x1c2b   :  { %6444 = vmatprep.mubr.bf16.mxu0 %v10151_v19  ;;  %7916 = vmatpush3.bf16.msra.mxu1 %v8555_v26  ;;  %v8571_v19 = vld [vmem:[%s10447_s11 + $0x7a0] sm:$0xff]  }
0x1c2c   :  { %6485 = vmatprep.mubr.bf16.mxu1 %v10153_v20  ;;  %7895 = vmatprep.subr.bf16.mxu0 %v8556_v1  ;;  %v8572_v20 = vld [vmem:[%s10447_s11 + $0x768] sm:$0xff]  }
0x1c2d   :  { %7917 = vmatprep.subr.bf16.mxu1 %v8557_v32 }
0x1c2e   :  { %7896 = vmatpush3.bf16.msra.mxu0 %v8558_v43 }
0x1c2f   :  { %7918 = vmatpush3.bf16.msra.mxu1 %v8559_v37  ;;  %7897 = vmatprep.subr.bf16.mxu0 %v8560_v44 }
0x1c30   :  { %7919 = vmatprep.subr.bf16.mxu1 %v8561_v7 }
0x1c32   :  { %7898 = vmatpush3.bf16.msra.mxu0 %v8562_v15 }
0x1c33   :  { %7920 = vmatpush3.bf16.msra.mxu1 %v8563_v38  ;;  %7899 = vmatprep.subr.bf16.mxu0 %v8564_v63 }
0x1c34   :  { %7921 = vmatprep.subr.bf16.mxu1 %v8565_v4 }
0x1c36   :  { %7900 = vmatpush3.bf16.msra.mxu0 %v8566_v0 }
0x1c37   :  { %7922 = vmatpush3.bf16.msra.mxu1 %v8567_v5  ;;  %7901 = vmatprep.subr.bf16.mxu0 %v8568_v9 }
0x1c38   :  { %7923 = vmatprep.subr.bf16.mxu1 %v8569_v11 }
0x1c3a   :  { %7902 = vmatpush3.bf16.msra.mxu0 %v8570_v50 }
0x1c3b   :  { %7924 = vmatpush3.bf16.msra.mxu1 %v8571_v19  ;;  %7903 = vmatprep.subr.bf16.mxu0 %v8572_v20 }
0x1c3c   :  { %7925 = vmatprep.subr.bf16.mxu1 %v8573_v25 }
0x1c3e   :  { %7904 = vmatpush3.bf16.msra.mxu0 %v8574_v16 }
0x1c3f   :  { %7926 = vmatpush3.bf16.msra.mxu1 %v8575_v23  ;;  %7905 = vmatprep.subr.bf16.mxu0 %v8576_v30 }
0x1c40   :  { %7927 = vmatprep.subr.bf16.mxu1 %v8577_v10 }
0x1c42   :  { %7906 = vmatpush3.bf16.msra.mxu0 %v8578_v21 }
0x1c43   :  { %7928 = vmatpush3.bf16.msra.mxu1 %v8579_v22  ;;  %7907 = vmatprep.subr.bf16.mxu0 %v8580_v2 }
0x1c44   :  { %7929 = vmatprep.subr.bf16.mxu1 %v8581_v33 }
0x1c46   :  { %7908 = vmatpush3.bf16.msra.mxu0 %v8582_v13 }
0x1c47   :  { %7930 = vmatpush3.bf16.msra.mxu1 %v8583_v3 }
0x1c48   :  { %8129 = vmatprep.subr.bf16.mxu1 %v8706_v8 }
0x1c49   :  { %6445 = vmatmul.mubr.bf16.vlgmr.msra.gmra.mrb[96].mxu0 %v10147_v53 }
0x1c4a   :  { %6486 = vmatmul.mubr.bf16.vlgmr.msra.gmra.mrb[100].mxu1 %v10149_v18  ;;  %8126 = vmatprep.mubr.msk.f32.mxu0 %vm8707_vm1, %v8706_v8 }
0x1c4b   :  { %8133 = vmatprep.mubr.msk.bf16.mxu1 %vm8707_vm1, %v8706_v8 }
0x1cbc   :  { %v7777_v34 = vpop.f32.mrb[84].mxu0  ;;  %v7799_v36 = vpop.f32.mrb[88].mxu1 }
0x1cbd   :  { %v7778_v27 = vpop.f32.mrb[85].mxu0  ;;  %v7800_v61 = vpop.f32.mrb[89].mxu1 }
0x1cbe   :  { %v7779_v39 = vadd.f32 %v7778_v27, %v7777_v34  ;;  %v7801_v40 = vadd.f32 %v7800_v61, %v7799_v36  ;;  %v7780_v48 = vpop.f32.mrb[86].mxu0  ;;  %v7802_v53 = vpop.f32.mrb[90].mxu1 }
0x1cbf   :  { %v7781_v41 = vpop.f32.mrb[87].mxu0  ;;  %v7803_v18 = vpop.f32.mrb[91].mxu1 }
0x1cc0   :  { %v6201_v54 = vadd.f32 %v7779_v39, %v7357_v6  ;;  %v7782_v12 = vadd.f32 %v7781_v41, %v7780_v48  ;;  %v7804_v62 = vadd.f32 %v7803_v18, %v7802_v53 }
0x1cc2   :  { %v6242_v45 = vadd.f32 %v7801_v40, %v6201_v54  ;;  %v6204_v31 = vadd.f32 %v7782_v12, %v7357_v6 }
0x1cc4   :  { %v6245_v56 = vadd.f32 %v7804_v62, %v6204_v31 }
0x1cdc   :  { %v7821_v59 = vpop.f32.mrb[88].mxu0  ;;  %v7843_v46 = vpop.f32.mrb[92].mxu1 }
0x1cdd   :  { %v7822_v60 = vpop.f32.mrb[89].mxu0  ;;  %v7844_v47 = vpop.f32.mrb[93].mxu1 }
0x1cde   :  { %v7823_v51 = vadd.f32 %v7822_v60, %v7821_v59  ;;  %v7845_v52 = vadd.f32 %v7844_v47, %v7843_v46  ;;  %v7824_v49 = vpop.f32.mrb[90].mxu0  ;;  %v7846_v35 = vpop.f32.mrb[94].mxu1  ;;  %v8720_v59 = vmov 0.0|0.0   ;;  %v8584_v60 = vld [vmem:[%s10451_s15] sm:$0xff]  }
0x1cdf   :  { %v7825_v28 = vpop.f32.mrb[91].mxu0  ;;  %v7847_v55 = vpop.f32.mrb[95].mxu1  ;;  %8225 = vmatprep.subr.bf16.mxu0 %v8720_v59  ;;  %8130 = vmatpush3.bf16.msra.mxu1 %v8584_v60 }
0x1ce0   :  { %v6283_v17 = vadd.f32 %v7823_v51, %v6242_v45  ;;  %v7826_v57 = vadd.f32 %v7825_v28, %v7824_v49  ;;  %v7848_v29 = vadd.f32 %v7847_v55, %v7846_v35  ;;  %8131 = vmatprep.subr.bf16.mxu1 %v8706_v8 }
0x1ce2   :  { %v6324_v58 = vadd.f32 %v7845_v52, %v6283_v17  ;;  %v6286_v24 = vadd.f32 %v7826_v57, %v6245_v56  ;;  %v7488_v57 = vld [vmem:[%s10449_s13 + $0x1] ss:$0 sm:$0xff] }
0x1ce4   :  { %v6327_v26 = vadd.f32 %v7848_v29, %v6286_v24 }
0x1cfc   :  { %v7865_v1 = vpop.f32.mrb[92].mxu0 }
0x1cfd   :  { %v7887_v32 = vpop.f32.mrb[96].mxu1  ;;  %v7866_v43 = vpop.f32.mrb[93].mxu0 }
0x1cfe   :  { %v7867_v37 = vadd.f32 %v7866_v43, %v7865_v1  ;;  %v7888_v44 = vpop.f32.mrb[97].mxu1  ;;  %v7868_v7 = vpop.f32.mrb[94].mxu0 }
0x1cff   :  { %v7889_v15 = vadd.f32 %v7888_v44, %v7887_v32  ;;  %v7890_v38 = vpop.f32.mrb[98].mxu1  ;;  %v7869_v63 = vpop.f32.mrb[95].mxu0  ;;  %v8585_v44 = vld [vmem:[%s10451_s15 + $0x8] sm:$0xff]  }
0x1d00   :  { %v6365_v4 = vadd.f32 %v7867_v37, %v6324_v58  ;;  %v7870_v0 = vadd.f32 %v7869_v63, %v7868_v7  ;;  %v7891_v5 = vpop.f32.mrb[99].mxu1  ;;  %8132 = vmatpush3.bf16.msra.mxu1 %v8585_v44 }
0x1d01   :  { %v7892_v9 = vadd.f32 %v7891_v5, %v7890_v38 }
0x1d02   :  { %v6406_v11 = vadd.f32 %v7889_v15, %v6365_v4  ;;  %v6368_v50 = vadd.f32 %v7870_v0, %v6327_v26  ;;  %v7489_v26 = vld [vmem:[%s10450_s14 + $0x1] ss:$0 sm:$0xff] }
0x1d04   :  { %v6409_v19 = vadd.f32 %v7892_v9, %v6368_v50  ;;  %v8586_v9 = vld [vmem:[%s10453_s17] sm:$0xff]  }
0x1d05   :  { %v7491_v50 = vld [vmem:[%s10452_s16] ss:$0 sm:$0xff] }
0x1d1c   :  { %v7909_v20 = vpop.f32.mrb[96].mxu0 }
0x1d1d   :  { %v7931_v25 = vpop.f32.mrb[100].mxu1  ;;  %v7910_v16 = vpop.f32.mrb[97].mxu0 }
0x1d1e   :  { %v7911_v23 = vadd.f32 %v7910_v16, %v7909_v20  ;;  %v7932_v30 = vpop.f32.mrb[101].mxu1  ;;  %v7912_v10 = vpop.f32.mrb[98].mxu0 }
0x1d1f   :  { %v7933_v21 = vadd.f32 %v7932_v30, %v7931_v25  ;;  %v7934_v22 = vpop.f32.mrb[102].mxu1  ;;  %v7913_v2 = vpop.f32.mrb[99].mxu0 }
0x1d20   :  { %v6447_v33 = vadd.f32 %v7911_v23, %v6406_v11  ;;  %v7914_v13 = vadd.f32 %v7913_v2, %v7912_v10  ;;  %v7935_v3 = vpop.f32.mrb[103].mxu1  ;;  %v8587_v11 = vld [vmem:[%s10453_s17 + $0x8] sm:$0xff]   ;;  %s6765_s17 = sshll.u32 %s8721_s29, 4  ;;  %s6766_s17 = int_to_ptr.vmem [resolvable:$true] %s6765_s17 }
0x1d21   :  { %v7936_v34 = vadd.f32 %v7935_v3, %v7934_v22  ;;  %s8682_s16 = scalar_lea.vmem %s6766_s17, 32  ;;  %p8687_p1 = scmp.lt.s32.totalorder %s6766_s17, %s6766_s17 }
0x1d22   :  { %v6488_v36 = vadd.f32 %v7933_v21, %v6447_v33  ;;  %v6450_v6 = vadd.f32 %v7914_v13, %v6409_v19  ;;  %p8683_p0 = scmp.ne.s32.totalorder %s6766_s17, %s8682_s16  ;;  %p8688_p2 = scmp.lt.s32.totalorder %s8682_s16, %s8682_s16 }
0x1d24   :  { %v6491_v27 = vadd.f32 %v7936_v34, %v6450_v6  ;;  %v6494_v61 = vadd.f32 %v6488_v36, %v9851_v42  ;;  %p8689_p3 = por %p8688_p2, %p8687_p1 }
0x1d26   :  { %v6500_v39 = vsel %vm71_vm0, %v6494_v61, 0.0  ;;  %v6495_v40 = vadd.f32 %v6491_v27, %v9853_v14  ;;  %v68_v14 = vld [vmem:[%s10486_s1] sm:$0x3]  ;;  %p8690_p4 = pnand %p8689_p3, %p8683_p0 }
0x1d27   :  { %6501 = vadd.xlane.f32.xlu1 %v6500_v39  ;;  %v6616_v46 = vsel %vm6615_vm10, %v68_v14, 0.0 }
0x1d28   :  { %v6503_v48 = vsel %vm71_vm0, %v6495_v40, 0.0 }
0x1d29   :  { %6504 = vadd.xlane.f32.xlu0 %v6503_v48 }
0x1db4   :  { %v6502_v53 = vpop.xlane.xlu1 %6501 }
0x1db5   :  { %v6506_v41 = vmul.f32 0.03125, %v6502_v53 }
0x1db6   :  { %v6505_v18 = vpop.xlane.xlu0 %6504 }
0x1db7   :  { %v6508_v54 = vsub.f32 %v6494_v61, %v6506_v41  ;;  %v6507_v12 = vmul.f32 0.03125, %v6505_v18 }
0x1db9   :  { %v6509_v62 = vsub.f32 %v6495_v40, %v6507_v12  ;;  %v6510_v45 = vmul.f32 %v6508_v54, %v6508_v54 }
0x1dbb   :  { %v6512_v31 = vsel %vm71_vm0, %v6510_v45, 0.0  ;;  %v6511_v56 = vmul.f32 %v6509_v62, %v6509_v62 }
0x1dbc   :  { %6513 = vadd.xlane.f32.xlu0 %v6512_v31 }
0x1dbd   :  { %v6515_v42 = vsel %vm71_vm0, %v6511_v56, 0.0 }
0x1dc0   :  { %6516 = vadd.xlane.f32.xlu0 %v6515_v42 }
0x1dc4   :  { %6617 = vadd.xlane.f32.xlu0 %v6616_v46 }
0x1e49   :  { %v6514_v47 = vpop.xlane.xlu0 %6513 }
0x1e4a   :  { %v6518_v51 = vmul.f32 0.03125, %v6514_v47 }
0x1e4c   :  { %v6520_v52 = vadd.f32 1e-05, %v6518_v51 }
0x1e4d   :  { %v6517_v49 = vpop.xlane.xlu0 %6516 }
0x1e4e   :  { %8672 = vrsqrt.f32 %v6520_v52  ;;  %v6519_v35 = vmul.f32 0.03125, %v6517_v49 }
0x1e50   :  { %v6521_v28 = vadd.f32 1e-05, %v6519_v35 }
0x1e51   :  { %v6618_v7 = vpop.xlane.xlu0 %6617 }
0x1e52   :  { %8674 = vrsqrt.f32 %v6521_v28  ;;  %v6619_v15 = vmax.f32 %v6618_v7, 1.0 }
0x1e54   :  { %8676 = vrcp.f32 %v6619_v15 }
0x1e58   :  { %v8673_v55 = vpop.eup %8672 }
0x1e59   :  { %v6524_v17 = vmul.f32 %v8673_v55, %v6508_v54 }
0x1e5b   :  { %v6532_v24 = vmul.f32 %v7488_v57, %v6524_v17 }
0x1e5c   :  { %v8675_v29 = vpop.eup %8674 }
0x1e5d   :  { %v6525_v58 = vmul.f32 %v8675_v29, %v6509_v62  ;;  %v6540_v32 = vadd.f32 %v7489_v26, %v6532_v24 }
0x1e5e   :  { %v8677_v38 = vpop.eup %8676 }
0x1e5f   :  { %v6533_v1 = vmul.f32 %v7488_v57, %v6525_v58 }
0x1e61   :  { %v6541_v43 = vadd.f32 %v7489_v26, %v6533_v1 }
0x1e63   :  { %v8226_v37 = vpack.c.bf16 %v6541_v43, %v6540_v32 }
0x1e65   :  { %8227 = vmatpush3.bf16.msra.mxu0 %v8226_v37 }
0x1e66   :  { %8137 = vmatprep.subr.bf16.mxu0 %v8706_v8 }
0x1e68   :  { %8127 = vmatmul.mubr.msk.f32.vlgmr.msra.gmra.mrb[66].mxu0 %vm264_vm8, %v68_v14 }
0x1e69   :  { %8141 = vmatprep.mubr.msk.bf16.mxu0 %vm8707_vm1, %v8706_v8  ;;  %8138 = vmatpush3.bf16.msra.mxu0 %v8586_v9 }
0x1e6a   :  { %8139 = vmatprep.subr.bf16.mxu0 %v8706_v8  ;;  %v7495_v8 = vld [vmem:[%s10454_s18] ss:$0 sm:$0xff] }
0x1e6d   :  { %8140 = vmatpush3.bf16.msra.mxu0 %v8587_v11 }
0x1f3b   :  { %v6611_v63 = vpop.f32.mrb[66].mxu0 }
0x1f3c   :  { %v6621_v4 = vmul.f32 %v8677_v38, %v6611_v63  ;;  %v8128_v0 = vpop.f32.mrb[67].mxu0 }
0x1f3e   :  { %v6622_v5 = vpack.c.bf16 %v6621_v4, %v6621_v4 }
0x1f40   :  { %8134 = vmatmul.mubr.msk.bf16.vlgmr.msra.gmra.mrb[104].mxu1 %vm71_vm0, %v6622_v5 }
0x2013   :  { %v6683_v19 = vpop.f32.mrb[104].mxu1 }
0x2014   :  { %v6684_v20 = vadd.f32 %v7491_v50, %v6683_v19  ;;  %v8135_v25 = vpop.f32.mrb[105].mxu1 }
0x2015   :  { %v6686_v16 = vpop.f32.mrb[106].mxu1 }
0x2016   :  { %v6689_v23 = vmax.f32 %v6684_v20, 0.0  ;;  %v8136_v30 = vpop.f32.mrb[107].mxu1 }
0x2018   :  { %v6690_v10 = vpack.c.bf16 %v6689_v23, %v6689_v23 }
0x201a   :  { %8142 = vmatmul.mubr.msk.bf16.vlgmr.msra.gmra.mrb[100].mxu0 %vm71_vm0, %v6690_v10 }
0x20ed   :  { %v6751_v21 = vpop.f32.mrb[100].mxu0 }
0x20ee   :  { %v6752_v22 = vadd.f32 %v7495_v8, %v6751_v21  ;;  %v8143_v2 = vpop.f32.mrb[101].mxu0 }
0x20ef   :  { %v6754_v33 = vpop.f32.mrb[102].mxu0 }
0x20f0   :  { %v8144_v13 = vpop.f32.mrb[103].mxu0  ;;  %6758 = vst.msk [vmem:[#allocation2] sm:$0x3] %vm6757_vm11, %v6752_v22 }
0x20f1   :  { %8693 = shalt.err (!%p8690_p4)
}
0x20f2   :  { %s8694_s18 = scalar_lea.hbm %s10455_s19, 32 }
0x20f3   :  { %p8695_p5 = scmp.ne.s32.totalorder %s10455_s19, %s8694_s18  ;;  %p8698_p6 = scmp.lt.u32.totalorder %s8694_s18, %s10455_s19 }
0x20f5   :  { %p8700_p7 = pnand %p8698_p6, %p8695_p5 }
0x20f7   :  { %8703 = shalt.err (!%p8700_p7)
}
0x20f8   :  { %6768 = dma.vmem_to_hbm [thread:$0]  %s6766_s17, 32, %s10455_s19, [#allocation3]  }
0x20f9   :  { %8704 = dma.done.wait [#allocation3], 32  }
0x20fa   :  { %8705 = vsyncadd [#allocation3], 4294967264 }
0x20fb   :  { %6772 = vsyncpa [#allocation3], 1 }

</bundles_post_ra>
